<compile_context>
chip_gen: v5e
topology: v5e:2x2
jax: 0.10.0
libtpu: 0.0.40
codegen_flags: <defaults>
</compile_context>

<pallas_src>
import jax
import jax.numpy as jnp
from jax.experimental import pallas as pl
from jax.experimental.pallas import tpu as pltpu


def _q_mlp_kernel(xt_ref, w1_ref, b1_ref, w2_ref, b2_ref, w3_ref, b3_ref, o_ref):
    # Layer 1: (H1p, Dp) @ (Dp, tile_b) on the MXU (bf16 in, f32 accumulate).
    h1 = jnp.dot(w1_ref[...], xt_ref[...], preferred_element_type=jnp.float32)
    # Bias is (H1p, 1): lane broadcast. Cast to bf16 right after ReLU so the
    # big intermediate spills at half width.
    h1 = jnp.maximum(h1 + b1_ref[...], 0.0).astype(w2_ref.dtype)
    # Layer 2: (H2p, H1p) @ (H1p, tile_b).
    h2 = jnp.dot(w2_ref[...], h1, preferred_element_type=jnp.float32)
    h2 = jnp.maximum(h2 + b2_ref[...], 0.0).astype(w3_ref.dtype)
    # Head: (1, H2p) @ (H2p, tile_b) -> lane-dense (1, tile_b) directly.
    q = jnp.dot(w3_ref[...], h2, preferred_element_type=jnp.float32)
    o_ref[...] = (q + b3_ref[0]).astype(o_ref.dtype)


def _round_up(n, m):
    return (n + m - 1) // m * m


def _pad_axis(x, axis, target):
    pad = target - x.shape[axis]
    if pad == 0:
        return x
    widths = [(0, 0)] * x.ndim
    widths[axis] = (0, pad)
    return jnp.pad(x, widths)


def prepare_params(params, compute_dtype=jnp.bfloat16):
    """One-time: pad feature dims to lane multiples, cast, and transpose the
    weights into the (out_features, in_features) layout the kernel uses.
    Zero padding is exact through matmul + ReLU (padded biases stay 0)."""
    w1, b1, w2, b2, w3, b3 = params
    D, H1 = w1.shape
    H2 = w2.shape[1]
    Dp, H1p, H2p = _round_up(D, 128), _round_up(H1, 128), _round_up(H2, 128)

    w1t = _pad_axis(_pad_axis(w1, 0, Dp), 1, H1p).T.astype(compute_dtype)   # (H1p, Dp)
    b1t = _pad_axis(b1, 1, H1p).T.astype(jnp.float32)                       # (H1p, 1)
    w2t = _pad_axis(_pad_axis(w2, 0, H1p), 1, H2p).T.astype(compute_dtype)  # (H2p, H1p)
    b2t = _pad_axis(b2, 1, H2p).T.astype(jnp.float32)                       # (H2p, 1)
    w3r = _pad_axis(w3, 0, H2p).T.astype(compute_dtype)                     # (1, H2p), bf16 head
    b3s = jnp.reshape(b3, (1,)).astype(jnp.float32)                         # SMEM scalar
    return (w1t, b1t, w2t, b2t, w3r, b3s)


def q_function_forward(obs, prepared, *, tile_b=1024, compute_dtype=jnp.bfloat16):
    """Pallas forward for q_function.  obs: (B, obs_dim) f32 -> (B, 1) f32.
    `prepared` comes from prepare_params (weights are not touched per call)."""
    w1t, b1t, w2t, b2t, w3r, b3s = prepared
    B, D = obs.shape
    H1p, Dp = w1t.shape
    H2p = w2t.shape[0]
    assert D <= Dp

    # Only lane-align the batch; use a single grid step when B is small.
    Bp_lane = _round_up(B, 128)
    tile_b = min(tile_b, Bp_lane)
    Bp = _round_up(B, tile_b)
    grid = (Bp // tile_b,)

    # Per-call obs prep only: pad features + batch, cast bf16, transpose to
    # feature-major (Dp, Bp) so the kernel's matmuls need no transposes.
    obs_t = _pad_axis(_pad_axis(obs, 1, Dp), 0, Bp).astype(compute_dtype).T

    out = pl.pallas_call(
        _q_mlp_kernel,
        out_shape=jax.ShapeDtypeStruct((1, Bp), jnp.float32),
        grid=grid,
        in_specs=[
            pl.BlockSpec((Dp, tile_b), lambda i: (0, i)),        # obs tile (moves)
            pl.BlockSpec((H1p, Dp), lambda i: (0, 0)),           # W1^T (resident)
            pl.BlockSpec((H1p, 1), lambda i: (0, 0)),            # b1 column
            pl.BlockSpec((H2p, H1p), lambda i: (0, 0)),          # W2^T (resident)
            pl.BlockSpec((H2p, 1), lambda i: (0, 0)),            # b2 column
            pl.BlockSpec((1, H2p), lambda i: (0, 0)),            # W3 row (bf16 head)
            pl.BlockSpec(memory_space=pltpu.MemorySpace.SMEM),   # b3 scalar
        ],
        out_specs=pl.BlockSpec((1, tile_b), lambda i: (0, i)),   # lane-dense row
        compiler_params=pltpu.CompilerParams(
            dimension_semantics=("parallel",)),                  # 2-TC split on v7x
    )(obs_t, w1t, b1t, w2t, b2t, w3r, b3s)

    return out.reshape(Bp)[:B].reshape(B, 1)


def init_params(key, obs_dim, hidden_layer=(400, 300)):
    """Deterministic synthetic init mirroring nn.Linear shapes.

    PyTorch stores Linear weights as (out, in); we keep them as (in, out)
    here and prepare_params transposes once (a pure layout choice)."""
    dims = (obs_dim,) + tuple(hidden_layer) + (1,)
    params = []
    for i in range(len(dims) - 1):
        fan_in, fan_out = dims[i], dims[i + 1]
        key, kw, kb = jax.random.split(key, 3)
        bound = 1.0 / jnp.sqrt(fan_in)
        w = jax.random.uniform(kw, (fan_in, fan_out), jnp.float32, -bound, bound)
        b = jax.random.uniform(kb, (1, fan_out), jnp.float32, -bound, bound)
        params += [w, b]
    return params


def reference_forward(obs, params, compute_dtype=jnp.bfloat16):
    """Pure-JAX reference mirroring the kernel's bf16-in / f32-accumulate math
    (including the bf16 head)."""
    w1, b1, w2, b2, w3, b3 = params
    f32, cd = jnp.float32, compute_dtype
    x = obs.astype(cd).astype(f32)
    h1 = jnp.maximum(x @ w1.astype(cd).astype(f32) + b1, 0.0)
    h1 = h1.astype(cd).astype(f32)
    h2 = jnp.maximum(h1 @ w2.astype(cd).astype(f32) + b2, 0.0)
    h2 = h2.astype(cd).astype(f32)
    return h2 @ w3.astype(cd).astype(f32) + b3


if __name__ == "__main__":
    key = jax.random.PRNGKey(0)
    B, OBS_DIM = 300, 24
    HIDDEN = (400, 300)   # module defaults; padded to (512, 384) internally

    key, kobs = jax.random.split(key)
    obs = jax.random.normal(kobs, (B, OBS_DIM), jnp.float32)
    params = init_params(key, OBS_DIM, HIDDEN)

    prepared = prepare_params(params)               # one-time weight prep
    out = q_function_forward(obs, prepared)         # B=300 -> Bp=384, 1 grid step
    out = jax.block_until_ready(out)

    ref = reference_forward(obs, params)
    assert out.shape == (B, 1)
    assert jnp.allclose(out, ref, atol=1e-2, rtol=1e-2), (
        f"mismatch vs reference, max abs diff = {float(jnp.max(jnp.abs(out - ref)))}"
    )

    print("KERNEL_OK")
</pallas_src>

<mosaic_0001>
module attributes {stable_mosaic.version = 11 : i64} {
  func.func @_q_mlp_kernel(%arg0: i32, %arg1: memref<128x384xbf16, #tpu.memory_space<vmem>>, %arg2: memref<512x128xbf16, #tpu.memory_space<vmem>>, %arg3: memref<512x1xf32, #tpu.memory_space<vmem>>, %arg4: memref<384x512xbf16, #tpu.memory_space<vmem>>, %arg5: memref<384x1xf32, #tpu.memory_space<vmem>>, %arg6: memref<1x384xbf16, #tpu.memory_space<vmem>>, %arg7: memref<1xf32, #tpu.memory_space<smem>>, %arg8: memref<1x384xf32, #tpu.memory_space<vmem>>) attributes {dimension_semantics = [#tpu.dimension_semantics<parallel>], iteration_bounds = array<i64: 1>, scalar_prefetch = 0 : i64, scratch_operands = 0 : i64, tpu.core_type = #tpu.core_type<tc>, window_params = [{transform_indices = @transform_0, window_bounds = array<i64: 128, 384>}, {pipeline_mode = #tpu.pipeline_mode<synchronous>, transform_indices = @transform_1, window_bounds = array<i64: 512, 128>}, {pipeline_mode = #tpu.pipeline_mode<synchronous>, transform_indices = @transform_2, window_bounds = array<i64: 512, 1>}, {pipeline_mode = #tpu.pipeline_mode<synchronous>, transform_indices = @transform_3, window_bounds = array<i64: 384, 512>}, {pipeline_mode = #tpu.pipeline_mode<synchronous>, transform_indices = @transform_4, window_bounds = array<i64: 384, 1>}, {pipeline_mode = #tpu.pipeline_mode<synchronous>, transform_indices = @transform_5, window_bounds = array<i64: 1, 384>}, {transform_indices = @transform_6, window_bounds = array<i64: 1>}, {transform_indices = @transform_7, window_bounds = array<i64: 1, 384>}]} {
    %c0 = arith.constant 0 : index
    %c0_0 = arith.constant 0 : index
    %0 = vector.load %arg2[%c0, %c0_0] : memref<512x128xbf16, #tpu.memory_space<vmem>>, vector<512x128xbf16>
    %c0_1 = arith.constant 0 : index
    %c0_2 = arith.constant 0 : index
    %1 = vector.load %arg1[%c0_1, %c0_2] : memref<128x384xbf16, #tpu.memory_space<vmem>>, vector<128x384xbf16>
    %cst = arith.constant dense<0.000000e+00> : vector<512x384xf32>
    %2 = tpu.matmul %0, %1, %cst {dimension_numbers = #tpu.dot_dimension_numbers<[1], [0], [0], [1], [0, 0, 1, 1], [], []>} : vector<512x128xbf16>, vector<128x384xbf16>, vector<512x384xf32> -> vector<512x384xf32>
    %c0_3 = arith.constant 0 : index
    %c0_4 = arith.constant 0 : index
    %3 = vector.load %arg3[%c0_3, %c0_4] : memref<512x1xf32, #tpu.memory_space<vmem>>, vector<512x1xf32>
    %4 = vector.broadcast %3 : vector<512x1xf32> to vector<512x384xf32>
    %5 = arith.addf %2, %4 : vector<512x384xf32>
    %cst_5 = arith.constant 0.000000e+00 : f32
    %6 = vector.broadcast %cst_5 : f32 to vector<512x384xf32>
    %7 = arith.maximumf %5, %6 : vector<512x384xf32>
    %8 = arith.truncf %7 : vector<512x384xf32> to vector<512x384xbf16>
    %c0_6 = arith.constant 0 : index
    %c0_7 = arith.constant 0 : index
    %9 = vector.load %arg4[%c0_6, %c0_7] : memref<384x512xbf16, #tpu.memory_space<vmem>>, vector<384x512xbf16>
    %cst_8 = arith.constant dense<0.000000e+00> : vector<384x384xf32>
    %10 = tpu.matmul %9, %8, %cst_8 {dimension_numbers = #tpu.dot_dimension_numbers<[1], [0], [0], [1], [0, 0, 1, 1], [], []>} : vector<384x512xbf16>, vector<512x384xbf16>, vector<384x384xf32> -> vector<384x384xf32>
    %c0_9 = arith.constant 0 : index
    %c0_10 = arith.constant 0 : index
    %11 = vector.load %arg5[%c0_9, %c0_10] : memref<384x1xf32, #tpu.memory_space<vmem>>, vector<384x1xf32>
    %12 = vector.broadcast %11 : vector<384x1xf32> to vector<384x384xf32>
    %13 = arith.addf %10, %12 : vector<384x384xf32>
    %cst_11 = arith.constant 0.000000e+00 : f32
    %14 = vector.broadcast %cst_11 : f32 to vector<384x384xf32>
    %15 = arith.maximumf %13, %14 : vector<384x384xf32>
    %16 = arith.truncf %15 : vector<384x384xf32> to vector<384x384xbf16>
    %c0_12 = arith.constant 0 : index
    %c0_13 = arith.constant 0 : index
    %17 = vector.load %arg6[%c0_12, %c0_13] : memref<1x384xbf16, #tpu.memory_space<vmem>>, vector<1x384xbf16>
    %cst_14 = arith.constant dense<0.000000e+00> : vector<1x384xf32>
    %18 = tpu.matmul %17, %16, %cst_14 {dimension_numbers = #tpu.dot_dimension_numbers<[1], [0], [0], [1], [0, 0, 1, 1], [], []>} : vector<1x384xbf16>, vector<384x384xbf16>, vector<1x384xf32> -> vector<1x384xf32>
    %c0_15 = arith.constant 0 : index
    %19 = memref.load %arg7[%c0_15] : memref<1xf32, #tpu.memory_space<smem>>
    %20 = vector.broadcast %19 : f32 to vector<1x384xf32>
    %21 = arith.addf %18, %20 : vector<1x384xf32>
    %c0_16 = arith.constant 0 : index
    %c0_17 = arith.constant 0 : index
    %22 = vector.load %arg8[%c0_16, %c0_17] : memref<1x384xf32, #tpu.memory_space<vmem>>, vector<1x384xf32>
    tpu.vector_store %arg8[%c0_16, %c0_17], %21 {strides = array<i32>} : memref<1x384xf32, #tpu.memory_space<vmem>>, vector<1x384xf32>,
    return
  }
  func.func @transform_0(%arg0: i32) -> (i32, i32) {
    %c0_i32 = arith.constant 0 : i32
    %c0_i32_0 = arith.constant 0 : i32
    return %c0_i32, %arg0 : i32, i32
  }
  func.func @transform_1(%arg0: i32) -> (i32, i32) {
    %c0_i32 = arith.constant 0 : i32
    %c0_i32_0 = arith.constant 0 : i32
    %c0_i32_1 = arith.constant 0 : i32
    return %c0_i32, %c0_i32_0 : i32, i32
  }
  func.func @transform_2(%arg0: i32) -> (i32, i32) {
    %c0_i32 = arith.constant 0 : i32
    %c0_i32_0 = arith.constant 0 : i32
    %c0_i32_1 = arith.constant 0 : i32
    return %c0_i32, %c0_i32_0 : i32, i32
  }
  func.func @transform_3(%arg0: i32) -> (i32, i32) {
    %c0_i32 = arith.constant 0 : i32
    %c0_i32_0 = arith.constant 0 : i32
    %c0_i32_1 = arith.constant 0 : i32
    return %c0_i32, %c0_i32_0 : i32, i32
  }
  func.func @transform_4(%arg0: i32) -> (i32, i32) {
    %c0_i32 = arith.constant 0 : i32
    %c0_i32_0 = arith.constant 0 : i32
    %c0_i32_1 = arith.constant 0 : i32
    return %c0_i32, %c0_i32_0 : i32, i32
  }
  func.func @transform_5(%arg0: i32) -> (i32, i32) {
    %c0_i32 = arith.constant 0 : i32
    %c0_i32_0 = arith.constant 0 : i32
    %c0_i32_1 = arith.constant 0 : i32
    return %c0_i32, %c0_i32_0 : i32, i32
  }
  func.func @transform_6(%arg0: i32) -> i32 {
    %c0_i32 = arith.constant 0 : i32
    %c0_i32_0 = arith.constant 0 : i32
    return %c0_i32 : i32
  }
  func.func @transform_7(%arg0: i32) -> (i32, i32) {
    %c0_i32 = arith.constant 0 : i32
    %c0_i32_0 = arith.constant 0 : i32
    return %c0_i32, %arg0 : i32, i32
  }
}

</mosaic_0001>

<bundles_post_ra>
// kernel: tpu_custom_call.1
= control target key start
LH: loop header
LB: loop body
LE: loop exit
PB: predicated region body
PF: predicated region fallthrough
CT: control target
= control target key end

     0   :  { %13 = vsyncpa [#allocation4], 0  ;;  %s8527_s0 = inlined_call_operand.hbm [shape: bf16[128,384], index: 0, kind: input, shape index: {}]   ;;  %s8528_s1 = inlined_call_operand.hbm [shape: bf16[512,128], index: 1, kind: input, shape index: {}]   ;;  %s8529_s2 = inlined_call_operand.vmem [shape: f32[512,1], index: 2, kind: input, shape index: {}]   ;;  %s8530_s3 = inlined_call_operand.vmem [shape: bf16[384,512], index: 3, kind: input, shape index: {}]   ;;  %s8531_s4 = inlined_call_operand.vmem [shape: f32[384,1], index: 4, kind: input, shape index: {}]   ;;  %s8532_s5 = inlined_call_operand.vmem [shape: bf16[1,384], index: 5, kind: input, shape index: {}]   ;;  %s8533_s6 = inlined_call_operand.<no memory space> [shape: f32[1], index: 6, kind: input, shape index: {}]   ;;  %s8534_s7 = inlined_call_operand.hbm [shape: f32[1,384], index: 7, kind: output, shape index: {}]  }
   0x1   :  { %14 = vsyncpa [#allocation7], 0 }
   0x2   :  { %15 = vsyncpa [#allocation5], 0  ;;  %s20_s26 = sshll.u32 %s8527_s0, 4  ;;  %s5315_s27 = smov [#allocation3]   ;;  %s21_s26 = int_to_ptr.hbm [resolvable:$true] %s20_s26 }
   0x3   :  { %s22_s28 = sshll.u32 %s5315_s27, 4  ;;  %s33_s8 = sshll.u32 %s8528_s1, 4  ;;  %s23_s28 = int_to_ptr.vmem [resolvable:$true] %s22_s28  ;;  %s34_s8 = int_to_ptr.hbm [resolvable:$true] %s33_s8 }
   0x4   :  { %s5316_s9 = smov 192   ;;  %s5317_s10 = smov 12  }
   0x5   :  { %28 = dma.hbm_to_vmem [thread:$0]  %s21_s26, 3072, %s23_s28, [#allocation4], %s5316_s9, %s5316_s9, %s5317_s10  }
   0x6   :  { %s5318_s11 = smov [#allocation6]   ;;  %s5319_s13 = smov 64  }
   0x7   :  { %s35_s12 = sshll.u32 %s5318_s11, 4  ;;  %s5320_s14 = smov 4   ;;  %s36_s12 = int_to_ptr.vmem [resolvable:$true] %s35_s12 }
   0x8   :  { %41 = dma.hbm_to_vmem [thread:$0]  %s34_s8, 4096, %s36_s12, [#allocation7], %s5319_s13, %s5319_s13, %s5320_s14  }
   0x9   :  { %5309 = dma.done.wait [#allocation4], 3072  }
   0xa   :  { %5310 = vsyncadd [#allocation4], 4294964224 }
   0xb   :  { %5311 = dma.done.wait [#allocation7], 4096  }
   0xc   :  { %5312 = vsyncadd [#allocation7], 4294963200  ;;  %v5321_v0 = vmov 0   ;;  %v4658_v1 = vld [vmem:[#allocation3 + $0xa8] sm:$0xf]  ;;  %v171_v24 = vld [vmem:[%s8529_s2 + $0x78] sm:$0xff] }
   0xd   :  { %5228 = vset.pattern.permute.xlu0 %v5321_v0  ;;  %5230 = vset.pattern.permute.xlu2 %v5321_v0  ;;  %v5106_v2 = vld [vmem:[#allocation3 + $0xb0] sm:$0xf0]  ;;  %v5105_v3 = vld [vmem:[#allocation3 + $0xac] sm:$0xf]  ;;  %v4660_v5 = vld [vmem:[#allocation3 + $0xb4] sm:$0xf0] }
   0xe   :  { %5229 = vset.pattern.permute.xlu1 %v5321_v0  ;;  %v4659_v4 = vor.u32 %v5106_v2, %v4658_v1  ;;  %v4646_v6 = vld [vmem:[#allocation3 + $0x90] sm:$0xf]  ;;  %v5103_v7 = vld [vmem:[#allocation3 + $0x98] sm:$0xf0]  ;;  %v4663_v8 = vor.u32 %v5105_v3, %v4660_v5  ;;  %v5102_v9 = vld [vmem:[#allocation3 + $0x94] sm:$0xf] }
   0xf   :  { %v4648_v10 = vld [vmem:[#allocation3 + $0x9c] sm:$0xf0]  ;;  %v4647_v11 = vor.u32 %v5103_v7, %v4646_v6  ;;  %v4634_v13 = vld [vmem:[#allocation3 + $0x78] sm:$0xf]  ;;  %v5100_v14 = vld [vmem:[#allocation3 + $0x80] sm:$0xf0] }
  0x10   :  { %860 = vmatpush.bf16.msra.mxu0 %v4659_v4  ;;  %5204 = vmatpush.bf16.msra.mxu3 %v4659_v4  ;;  %v4651_v12 = vor.u32 %v5102_v9, %v4648_v10  ;;  %v170_v15 = vld [vmem:[%s8529_s2 + $0x70] sm:$0xff]  ;;  %v5099_v16 = vld [vmem:[#allocation3 + $0x7c] sm:$0xf]  ;;  %v4635_v18 = vor.u32 %v5100_v14, %v4634_v13  ;;  %v4622_v20 = vld [vmem:[#allocation3 + $0x60] sm:$0xf]  ;;  %vm4416_vm0 = vcmask 1040384  }
  0x11   :  { %1029 = vmatpush.bf16.msra.mxu1 %v4663_v8  ;;  %5212 = vmatpush.bf16.msra.mxu2 %v4663_v8  ;;  %v4636_v17 = vld [vmem:[#allocation3 + $0x84] sm:$0xf0]  ;;  %v5097_v21 = vld [vmem:[#allocation3 + $0x68] sm:$0xf0]  ;;  %v5096_v22 = vld [vmem:[#allocation3 + $0x64] sm:$0xf] }
  0x12   :  { %292 = vperm.xlu0 %5228, %v170_v15   ;;  %v4639_v19 = vor.u32 %v5099_v16, %v4636_v17  ;;  %v4624_v23 = vld [vmem:[#allocation3 + $0x6c] sm:$0xf0]  ;;  %v4623_v25 = vor.u32 %v5097_v21, %v4622_v20  ;;  %v4610_v26 = vld [vmem:[#allocation3 + $0x48] sm:$0xf]  ;;  %v5094_v28 = vld [vmem:[#allocation3 + $0x50] sm:$0xf0] }
  0x13   :  { %v4627_v27 = vor.u32 %v5096_v22, %v4624_v23  ;;  %v168_v29 = vld [vmem:[%s8529_s2 + $0x60] sm:$0xff]  ;;  %v166_v30 = vld [vmem:[%s8529_s2 + $0x50] sm:$0xff]  ;;  %v4611_v33 = vor.u32 %v5094_v28, %v4610_v26  ;;  %v4598_v35 = vld [vmem:[#allocation3 + $0x30] sm:$0xf]  ;;  %vm4418_vm1 = vcmask 1041408  }
  0x14   :  { %861 = vmatpush.bf16.msra.mxu0 %v4647_v11  ;;  %5205 = vmatpush.bf16.msra.mxu3 %v4647_v11  ;;  %v5093_v31 = vld [vmem:[#allocation3 + $0x4c] sm:$0xf]  ;;  %v4612_v32 = vld [vmem:[#allocation3 + $0x54] sm:$0xf0]  ;;  %v5091_v36 = vld [vmem:[#allocation3 + $0x38] sm:$0xf0] }
  0x15   :  { %1030 = vmatpush.bf16.msra.mxu1 %v4651_v12  ;;  %5213 = vmatpush.bf16.msra.mxu2 %v4651_v12  ;;  %v4615_v34 = vor.u32 %v5093_v31, %v4612_v32  ;;  %v5090_v37 = vld [vmem:[#allocation3 + $0x34] sm:$0xf]  ;;  %v4600_v38 = vld [vmem:[#allocation3 + $0x3c] sm:$0xf0]  ;;  %v164_v39 = vld [vmem:[%s8529_s2 + $0x40] sm:$0xff]  ;;  %v4599_v41 = vor.u32 %v5091_v36, %v4598_v35 }
  0x16   :  { %282 = vperm.xlu1 %5229, %v168_v29   ;;  %272 = vperm.xlu2 %5230, %v166_v30   ;;  %v169_v40 = vld [vmem:[%s8529_s2 + $0x68] sm:$0xff]  ;;  %v167_v42 = vld [vmem:[%s8529_s2 + $0x58] sm:$0xff]  ;;  %v4603_v43 = vor.u32 %v5090_v37, %v4600_v38  ;;  %v4586_v44 = vld [vmem:[#allocation3 + $0x18] sm:$0xf] }
  0x17   :  { %v5088_v45 = vld [vmem:[#allocation3 + $0x20] sm:$0xf0]  ;;  %v5087_v46 = vld [vmem:[#allocation3 + $0x1c] sm:$0xf]  ;;  %v4588_v47 = vld [vmem:[#allocation3 + $0x24] sm:$0xf0] }
  0x18   :  { %862 = vmatpush.bf16.msra.mxu0 %v4635_v18  ;;  %5206 = vmatpush.bf16.msra.mxu3 %v4635_v18  ;;  %v4587_v48 = vor.u32 %v5088_v45, %v4586_v44  ;;  %v4591_v49 = vor.u32 %v5087_v46, %v4588_v47  ;;  %v4574_v50 = vld [vmem:[#allocation3] sm:$0xf]  ;;  %v5085_v51 = vld [vmem:[#allocation3 + $0x8] sm:$0xf0]  ;;  %v5084_v52 = vld [vmem:[#allocation3 + $0x4] sm:$0xf] }
  0x19   :  { %1031 = vmatpush.bf16.msra.mxu1 %v4639_v19  ;;  %5214 = vmatpush.bf16.msra.mxu2 %v4639_v19  ;;  %v4576_v53 = vld [vmem:[#allocation3 + $0xc] sm:$0xf0]  ;;  %v5107_v56 = vld [vmem:[#allocation3 + $0xb8] sm:$0xf0]  ;;  %v165_v57 = vld [vmem:[%s8529_s2 + $0x48] sm:$0xff]  ;;  %v4575_v58 = vor.u32 %v5085_v51, %v4574_v50 }
  0x1a   :  { %297 = vperm.xlu0 %5228, %v171_v24   ;;  %v163_v54 = vld [vmem:[%s8529_s2 + $0x38] sm:$0xff]  ;;  %v162_v59 = vld [vmem:[%s8529_s2 + $0x30] sm:$0xff]  ;;  %v4579_v60 = vor.u32 %v5084_v52, %v4576_v53  ;;  %v5399_v62 = vld [vmem:[#allocation6] sm:$0xff] }
  0x1b   :  { %v4666_v55 = vld [vmem:[#allocation3 + $0xb0] sm:$0xf]  ;;  %v4654_v63 = vld [vmem:[#allocation3 + $0x98] sm:$0xf]  ;;  %v5104_v0 = vld [vmem:[#allocation3 + $0xa0] sm:$0xf0] }
  0x1c   :  { %863 = vmatpush.bf16.msra.mxu0 %v4623_v25  ;;  %5207 = vmatpush.bf16.msra.mxu3 %v4623_v25  ;;  %v4667_v61 = vor.u32 %v5107_v56, %v4666_v55  ;;  %v5081_v1 = vld [vmem:[#allocation6 + $0xe8] sm:$0xff]  ;;  %v4655_v2 = vor.u32 %v5104_v0, %v4654_v63  ;;  %v4642_v4 = vld [vmem:[#allocation3 + $0x80] sm:$0xf]  ;;  %v160_v7 = vld [vmem:[%s8529_s2 + $0x20] sm:$0xff] }
  0x1d   :  { %1032 = vmatpush.bf16.msra.mxu1 %v4627_v27  ;;  %5215 = vmatpush.bf16.msra.mxu2 %v4627_v27  ;;  %v158_v3 = vld [vmem:[%s8529_s2 + $0x10] sm:$0xff]  ;;  %v161_v6 = vld [vmem:[%s8529_s2 + $0x28] sm:$0xff]  ;;  %v5098_v10 = vld [vmem:[#allocation3 + $0x70] sm:$0xf0] }
  0x1e   :  { %287 = vperm.xlu1 %5229, %v169_v40   ;;  %277 = vperm.xlu2 %5230, %v167_v42   ;;  %v5101_v5 = vld [vmem:[#allocation3 + $0x88] sm:$0xf0]  ;;  %v4630_v9 = vld [vmem:[#allocation3 + $0x68] sm:$0xf]  ;;  %v157_v12 = vld [vmem:[%s8529_s2 + $0x8] sm:$0xff] }
  0x1f   :  { %v4643_v8 = vor.u32 %v5101_v5, %v4642_v4  ;;  %v4631_v11 = vor.u32 %v5098_v10, %v4630_v9  ;;  %v4618_v13 = vld [vmem:[#allocation3 + $0x50] sm:$0xf]  ;;  %v5095_v14 = vld [vmem:[#allocation3 + $0x58] sm:$0xf0]  ;;  %v5421_v18 = vld [vmem:[#allocation6 + $0x8] sm:$0xff] }
  0x20   :  { %864 = vmatpush.bf16.msra.mxu0 %v4611_v33  ;;  %5208 = vmatpush.bf16.msra.mxu3 %v4611_v33  ;;  %v159_v15 = vld [vmem:[%s8529_s2 + $0x18] sm:$0xff]  ;;  %v156_v16 = vld [vmem:[%s8529_s2] sm:$0xff]  ;;  %v4619_v17 = vor.u32 %v5095_v14, %v4618_v13  ;;  %v5092_v20 = vld [vmem:[#allocation3 + $0x40] sm:$0xf0] }
  0x21   :  { %1033 = vmatpush.bf16.msra.mxu1 %v4615_v34  ;;  %5216 = vmatpush.bf16.msra.mxu2 %v4615_v34  ;;  %v4606_v19 = vld [vmem:[#allocation3 + $0x38] sm:$0xf]  ;;  %v5082_v21 = vld [vmem:[#allocation6 + $0xf0] sm:$0xff]  ;;  %v4594_v23 = vld [vmem:[#allocation3 + $0x20] sm:$0xf] }
  0x22   :  { %262 = vperm.xlu0 %5228, %v164_v39   ;;  %v4607_v22 = vor.u32 %v5092_v20, %v4606_v19  ;;  %v5089_v24 = vld [vmem:[#allocation3 + $0x28] sm:$0xf0]  ;;  %v184_v25 = vld [vmem:[%s8529_s2 + $0xe0] sm:$0xff]  ;;  %v187_v26 = vld [vmem:[%s8529_s2 + $0xf8] sm:$0xff] }
  0x23   :  { %v186_v27 = vld [vmem:[%s8529_s2 + $0xf0] sm:$0xff]  ;;  %v4595_v28 = vor.u32 %v5089_v24, %v4594_v23  ;;  %v5086_v30 = vld [vmem:[#allocation3 + $0x10] sm:$0xf0]  ;;  %v185_v34 = vld [vmem:[%s8529_s2 + $0xe8] sm:$0xff] }
  0x24   :  { %865 = vmatpush.bf16.msra.mxu0 %v4599_v41  ;;  %5209 = vmatpush.bf16.msra.mxu3 %v4599_v41  ;;  %v4582_v29 = vld [vmem:[#allocation3 + $0x8] sm:$0xf]  ;;  %v183_v32 = vld [vmem:[%s8529_s2 + $0xd8] sm:$0xff]  ;;  %v5083_v36 = vld [vmem:[#allocation6 + $0xf8] sm:$0xff] }
  0x25   :  { %1034 = vmatpush.bf16.msra.mxu1 %v4603_v43  ;;  %5217 = vmatpush.bf16.msra.mxu2 %v4603_v43  ;;  %v4583_v31 = vor.u32 %v5086_v30, %v4582_v29  ;;  %v182_v33 = vld [vmem:[%s8529_s2 + $0xd0] sm:$0xff]  ;;  %v5054_v35 = vld [vmem:[#allocation6 + $0x10] sm:$0xff]  ;;  %v181_v40 = vld [vmem:[%s8529_s2 + $0xc8] sm:$0xff] }
  0x26   :  { %267 = vperm.xlu1 %5229, %v165_v57   ;;  %252 = vperm.xlu2 %5230, %v162_v59   ;;  %v218_v37 = vld [vmem:[%s8529_s2 + $0x1f0] sm:$0xff]  ;;  %v203_v38 = vld [vmem:[%s8529_s2 + $0x178] sm:$0xff]  ;;  %v180_v41 = vld [vmem:[%s8529_s2 + $0xc0] sm:$0xff] }
  0x27   :  { %v202_v39 = vld [vmem:[%s8529_s2 + $0x170] sm:$0xff]  ;;  %v219_v42 = vld [vmem:[%s8529_s2 + $0x1f8] sm:$0xff]  ;;  %v5055_v43 = vld [vmem:[#allocation6 + $0x18] sm:$0xff] }
  0x28   :  { %866 = vmatpush.bf16.msra.mxu0 %v4587_v48  ;;  %5210 = vmatpush.bf16.msra.mxu3 %v4587_v48  ;;  %v216_v44 = vld [vmem:[%s8529_s2 + $0x1e0] sm:$0xff]  ;;  %v201_v45 = vld [vmem:[%s8529_s2 + $0x168] sm:$0xff]  ;;  %v179_v47 = vld [vmem:[%s8529_s2 + $0xb8] sm:$0xff] }
  0x29   :  { %1035 = vmatpush.bf16.msra.mxu1 %v4591_v49  ;;  %5218 = vmatpush.bf16.msra.mxu2 %v4591_v49  ;;  %v200_v46 = vld [vmem:[%s8529_s2 + $0x160] sm:$0xff]  ;;  %v178_v48 = vld [vmem:[%s8529_s2 + $0xb0] sm:$0xff]  ;;  %v217_v49 = vld [vmem:[%s8529_s2 + $0x1e8] sm:$0xff] }
  0x2a   :  { %257 = vperm.xlu0 %5228, %v163_v54   ;;  %v5056_v50 = vld [vmem:[#allocation6 + $0x20] sm:$0xff]  ;;  %v214_v51 = vld [vmem:[%s8529_s2 + $0x1d0] sm:$0xff]  ;;  %v199_v52 = vld [vmem:[%s8529_s2 + $0x158] sm:$0xff] }
  0x2b   :  { %v198_v53 = vld [vmem:[%s8529_s2 + $0x150] sm:$0xff]  ;;  %v177_v54 = vld [vmem:[%s8529_s2 + $0xa8] sm:$0xff]  ;;  %v176_v55 = vld [vmem:[%s8529_s2 + $0xa0] sm:$0xff] }
  0x2c   :  { %867 = vmatpush.bf16.msra.mxu0 %v4575_v58  ;;  %5211 = vmatpush.bf16.msra.mxu3 %v4575_v58  ;;  %v215_v56 = vld [vmem:[%s8529_s2 + $0x1d8] sm:$0xff]  ;;  %v5499_v57 = vld [vmem:[#allocation6 + $0x28] sm:$0xff]  ;;  %v212_v58 = vld [vmem:[%s8529_s2 + $0x1c0] sm:$0xff] }
  0x2d   :  { %1036 = vmatpush.bf16.msra.mxu1 %v4579_v60  ;;  %5219 = vmatpush.bf16.msra.mxu2 %v4579_v60  ;;  %v197_v59 = vld [vmem:[%s8529_s2 + $0x148] sm:$0xff]  ;;  %v196_v60 = vld [vmem:[%s8529_s2 + $0x140] sm:$0xff]  ;;  %v174_v63 = vld [vmem:[%s8529_s2 + $0x90] sm:$0xff] }
  0x2e   :  { %247 = vperm.xlu2 %5230, %v161_v6   ;;  %242 = vperm.xlu1 %5229, %v160_v7   ;;  %v213_v0 = vld [vmem:[%s8529_s2 + $0x1c8] sm:$0xff]  ;;  %v210_v5 = vld [vmem:[%s8529_s2 + $0x1b0] sm:$0xff]  ;;  %v195_v6 = vld [vmem:[%s8529_s2 + $0x138] sm:$0xff] }
  0x2f   :  { %868 = vmatmul.bf16.vlgmr.msra.gmra.mxu0 %v5399_v62  ;;  %1013 = vmatmul.bf16.vlgmr.msra.gmra.mxu3 %v5081_v1  ;;  %v194_v7 = vld [vmem:[%s8529_s2 + $0x130] sm:$0xff]  ;;  %v173_v10 = vld [vmem:[%s8529_s2 + $0x88] sm:$0xff]  ;;  %v211_v13 = vld [vmem:[%s8529_s2 + $0x1b8] sm:$0xff] }
  0x30   :  { %1037 = vmatmul.bf16.vlgmr.msra.gmra.mxu1 %v5399_v62  ;;  %1182 = vmatmul.bf16.vlgmr.msra.gmra.mxu2 %v5081_v1  ;;  %v5557_v14 = vld [vmem:[#allocation6 + $0x38] sm:$0xff]  ;;  %v193_v19 = vld [vmem:[%s8529_s2 + $0x128] sm:$0xff]  ;;  %v190_v24 = vld [vmem:[%s8529_s2 + $0x110] sm:$0xff] }
  0x31   :  { %1198 = vmatpush.bf16.msrb.mxu2 %v4667_v61  ;;  %v209_v23 = vld [vmem:[%s8529_s2 + $0x1a8] sm:$0xff]  ;;  %v188_v30 = vld [vmem:[%s8529_s2 + $0x100] sm:$0xff] }
  0x32   :  { %232 = vperm.xlu0 %5228, %v158_v3  }
  0x35   :  { %1199 = vmatpush.bf16.msrb.mxu2 %v4655_v2  ;;  %v5525_v2 = vld [vmem:[#allocation6 + $0x30] sm:$0xff] }
  0x36   :  { %237 = vperm.xlu1 %5229, %v159_v15   ;;  %222 = vperm.xlu2 %5230, %v156_v16   ;;  %v208_v16 = vld [vmem:[%s8529_s2 + $0x1a0] sm:$0xff] }
  0x39   :  { %1200 = vmatpush.bf16.msrb.mxu2 %v4643_v8 }
  0x3a   :  { %227 = vperm.xlu0 %5228, %v157_v12   ;;  %v172_v12 = vld [vmem:[%s8529_s2 + $0x80] sm:$0xff] }
  0x3d   :  { %1201 = vmatpush.bf16.msrb.mxu2 %v4631_v11 }
  0x3e   :  { %377 = vperm.xlu2 %5230, %v187_v26   ;;  %372 = vperm.xlu1 %5229, %v186_v27   ;;  %v5589_v26 = vld [vmem:[#allocation6 + $0x40] sm:$0xff] }
  0x3f   :  { %873 = vmatmul.bf16.gmra.mxu0 %v5421_v18  ;;  %1018 = vmatmul.bf16.gmra.mxu3 %v5082_v21 }
  0x40   :  { %1042 = vmatmul.bf16.gmra.mxu1 %v5421_v18  ;;  %1187 = vmatmul.bf16.gmra.mxu2 %v5082_v21  ;;  %v191_v21 = vld [vmem:[%s8529_s2 + $0x118] sm:$0xff] }
  0x41   :  { %1202 = vmatpush.bf16.msrb.mxu2 %v4619_v17 }
  0x42   :  { %362 = vperm.xlu0 %5228, %v184_v25  }
  0x45   :  { %1203 = vmatpush.bf16.msrb.mxu2 %v4607_v22 }
  0x46   :  { %352 = vperm.xlu2 %5230, %v182_v33   ;;  %367 = vperm.xlu1 %5229, %v185_v34  }
  0x49   :  { %1204 = vmatpush.bf16.msrb.mxu2 %v4595_v28 }
  0x4a   :  { %357 = vperm.xlu0 %5228, %v183_v32   ;;  %v207_v32 = vld [vmem:[%s8529_s2 + $0x198] sm:$0xff] }
  0x4d   :  { %1205 = vmatpush.bf16.msrb.mxu2 %v4583_v31  ;;  %v206_v31 = vld [vmem:[%s8529_s2 + $0x190] sm:$0xff] }
  0x4e   :  { %457 = vperm.xlu2 %5230, %v203_v38   ;;  %452 = vperm.xlu1 %5229, %v202_v39  }
  0x4f   :  { %878 = vmatmul.bf16.gmra.mxu0 %v5054_v35  ;;  %1023 = vmatmul.bf16.gmra.mxu3 %v5083_v36 }
  0x50   :  { %1047 = vmatmul.bf16.gmra.mxu1 %v5054_v35  ;;  %1192 = vmatmul.bf16.gmra.mxu2 %v5083_v36 }
  0x52   :  { %532 = vperm.xlu0 %5228, %v218_v37  }
  0x56   :  { %342 = vperm.xlu2 %5230, %v180_v41   ;;  %537 = vperm.xlu1 %5229, %v219_v42  }
  0x5a   :  { %347 = vperm.xlu0 %5228, %v181_v40  }
  0x5e   :  { %447 = vperm.xlu2 %5230, %v201_v45   ;;  %442 = vperm.xlu1 %5229, %v200_v46   ;;  %v189_v45 = vld [vmem:[%s8529_s2 + $0x108] sm:$0xff]  ;;  %v204_v46 = vld [vmem:[%s8529_s2 + $0x180] sm:$0xff] }
  0x5f   :  { %883 = vmatmul.bf16.gmra.mxu0 %v5055_v43 }
  0x60   :  { %1052 = vmatmul.bf16.gmra.mxu1 %v5055_v43  ;;  %1206 = vmatmul.bf16.vlgmr.msrb.gmra.mxu2 %v5399_v62  ;;  %v175_v62 = vld [vmem:[%s8529_s2 + $0x98] sm:$0xff] }
  0x62   :  { %522 = vperm.xlu0 %5228, %v216_v44   ;;  %v205_v44 = vld [vmem:[%s8529_s2 + $0x188] sm:$0xff] }
  0x66   :  { %332 = vperm.xlu2 %5230, %v178_v48   ;;  %527 = vperm.xlu1 %5229, %v217_v49   ;;  %v5633_v49 = vld [vmem:[#allocation6 + $0x48] sm:$0xff] }
  0x6a   :  { %337 = vperm.xlu0 %5228, %v179_v47  }
  0x6e   :  { %437 = vperm.xlu2 %5230, %v199_v52   ;;  %432 = vperm.xlu1 %5229, %v198_v53   ;;  %v1763_v52 = vld [vmem:[%s8531_s4 + $0x60] sm:$0xff] }
  0x6f   :  { %888 = vmatmul.bf16.gmra.mxu0 %v5056_v50 }
  0x70   :  { %1057 = vmatmul.bf16.gmra.mxu1 %v5056_v50  ;;  %1211 = vmatmul.bf16.gmra.mxu2 %v5421_v18  ;;  %v5523_v1 = vpop.permute.xlu2 %272  ;;  %v192_v18 = vld [vmem:[%s8529_s2 + $0x120] sm:$0xff]  ;;  %s4433_s2 = sshll.u32 %s8534_s7, 4  ;;  %s4434_s2 = int_to_ptr.hbm [resolvable:$true] %s4433_s2 }
  0x72   :  { %512 = vperm.xlu0 %5228, %v214_v51  }
  0x76   :  { %322 = vperm.xlu2 %5230, %v176_v55   ;;  %517 = vperm.xlu1 %5229, %v215_v56   ;;  %v1766_v55 = vld [vmem:[%s8531_s4 + $0x78] sm:$0xff] }
  0x78   :  { %v5542_v8 = vpop.permute.xlu2 %277 }
  0x7a   :  { %327 = vperm.xlu0 %5228, %v177_v54   ;;  %v1765_v54 = vld [vmem:[%s8531_s4 + $0x70] sm:$0xff] }
  0x7e   :  { %427 = vperm.xlu2 %5230, %v197_v59   ;;  %422 = vperm.xlu1 %5229, %v196_v60  }
  0x7f   :  { %893 = vmatmul.bf16.gmra.mxu0 %v5499_v57 }
  0x80   :  { %1062 = vmatmul.bf16.gmra.mxu1 %v5499_v57  ;;  %1216 = vmatmul.bf16.gmra.mxu2 %v5054_v35  ;;  %v5559_v15 = vpop.permute.xlu2 %252 }
  0x82   :  { %502 = vperm.xlu0 %5228, %v212_v58  }
  0x84   :  { %v5512_v61 = vpop.permute.xlu0 %292 }
  0x86   :  { %312 = vperm.xlu2 %5230, %v174_v63   ;;  %507 = vperm.xlu1 %5229, %v213_v0  }
  0x88   :  { %v5529_v4 = vpop.permute.xlu1 %282  ;;  %v5579_v22 = vpop.permute.xlu2 %247 }
  0x8a   :  { %317 = vperm.xlu0 %5228, %v175_v62  }
  0x8c   :  { %v5527_v3 = vpop.permute.xlu0 %297 }
  0x8e   :  { %417 = vperm.xlu2 %5230, %v195_v6   ;;  %412 = vperm.xlu1 %5229, %v194_v7   ;;  %v1764_v6 = vld [vmem:[%s8531_s4 + $0x68] sm:$0xff]  ;;  %v1761_v7 = vld [vmem:[%s8531_s4 + $0x50] sm:$0xff] }
  0x8f   :  { %898 = vmatmul.bf16.gmra.mxu0 %v5525_v2 }
  0x90   :  { %1067 = vmatmul.bf16.gmra.mxu1 %v5525_v2  ;;  %1221 = vmatmul.bf16.gmra.mxu2 %v5055_v43  ;;  %v5549_v11 = vpop.permute.xlu1 %287  ;;  %v5607_v33 = vpop.permute.xlu2 %222 }
  0x92   :  { %492 = vperm.xlu0 %5228, %v210_v5   ;;  %v1762_v5 = vld [vmem:[%s8531_s4 + $0x58] sm:$0xff] }
  0x94   :  { %v5544_v9 = vpop.permute.xlu0 %262 }
  0x96   :  { %302 = vperm.xlu2 %5230, %v172_v12   ;;  %497 = vperm.xlu1 %5229, %v211_v13  }
  0x98   :  { %v5574_v20 = vpop.permute.xlu1 %267  ;;  %v5654_v59 = vpop.permute.xlu2 %377 }
  0x99   :  { %8794 = vst [vmem:[#allocation15_spill] sm:$0xff] %v5654_v59 }
  0x9a   :  { %307 = vperm.xlu0 %5228, %v173_v10  }
  0x9c   :  { %v5566_v17 = vpop.permute.xlu0 %257 }
  0x9e   :  { %402 = vperm.xlu1 %5229, %v192_v18   ;;  %407 = vperm.xlu2 %5230, %v193_v19  }
  0x9f   :  { %903 = vmatmul.bf16.gmra.mxu0 %v5557_v14 }
  0xa0   :  { %1072 = vmatmul.bf16.gmra.mxu1 %v5557_v14  ;;  %1226 = vmatmul.bf16.gmra.mxu2 %v5056_v50  ;;  %v5591_v28 = vpop.permute.xlu1 %242 }
  0xa2   :  { %482 = vperm.xlu0 %5228, %v208_v16   ;;  %v5676_v16 = vld [vmem:[#allocation6 + $0x50] sm:$0xff] }
  0xa4   :  { %v5587_v25 = vpop.permute.xlu0 %232 }
  0xa6   :  { %487 = vperm.xlu1 %5229, %v209_v23   ;;  %392 = vperm.xlu2 %5230, %v190_v24   ;;  %v1757_v23 = vld [vmem:[%s8531_s4 + $0x30] sm:$0xff] }
  0xa8   :  { %v5618_v41 = vpop.permute.xlu1 %237 }
  0xaa   :  { %397 = vperm.xlu0 %5228, %v191_v21   ;;  %v5680_v21 = vpop.permute.xlu2 %352 }
  0xab   :  { %8797 = vst [vmem:[#allocation18_spill] sm:$0xff] %v5680_v21 }
  0xac   :  { %v869_v27 = vpop.f32.mrf.mxu0  ;;  %v5612_v36 = vpop.permute.xlu0 %227 }
  0xad   :  { %v5593_v29 = vpop.f32.mrf.mxu1  ;;  %v870_v34 = vadd.f32 %v869_v27, %v5607_v33  ;;  %v1759_v27 = vld [vmem:[%s8531_s4 + $0x40] sm:$0xff] }
  0xae   :  { %472 = vperm.xlu1 %5229, %v206_v31   ;;  %477 = vperm.xlu2 %5230, %v207_v32  }
  0xaf   :  { %908 = vmatmul.bf16.gmra.mxu0 %v5589_v26  ;;  %v1367_v42 = vmax.f32 %v870_v34, 0.0 }
  0xb0   :  { %1077 = vmatmul.bf16.gmra.mxu1 %v5589_v26  ;;  %1231 = vmatmul.bf16.gmra.mxu2 %v5499_v57  ;;  %v5643_v53 = vpop.permute.xlu1 %372 }
  0xb1   :  { %8793 = vst [vmem:[#allocation14_spill] sm:$0xff] %v5643_v53 }
  0xb2   :  { %382 = vperm.xlu0 %5228, %v188_v30   ;;  %v1760_v30 = vld [vmem:[%s8531_s4 + $0x48] sm:$0xff] }
  0xb3   :  { %v5610_v35 = vpop.f32.mrf.mxu2 }
  0xb4   :  { %8791 = vst [vmem:[#allocation12_spill] sm:$0xff] %v5610_v35  ;;  %v871_v37 = vpop.f32.mrf.mxu0  ;;  %v5659_v63 = vpop.permute.xlu0 %362 }
  0xb5   :  { %v872_v38 = vadd.f32 %v871_v37, %v5612_v36  ;;  %v1040_v39 = vpop.f32.mrf.mxu1  ;;  %8795 = vst [vmem:[#allocation16_spill] sm:$0xff] %v5659_v63  ;;  %v1773_v63 = vld [vmem:[%s8531_s4 + $0xb0] sm:$0xff] }
  0xb6   :  { %v5616_v40 = vadd.f32 %v1040_v39, %v5612_v36  ;;  %387 = vperm.xlu1 %5229, %v189_v45   ;;  %462 = vperm.xlu2 %5230, %v204_v46   ;;  %v5702_v39 = vpop.f32.mrf.mxu3  ;;  %v5707_v45 = vpop.permute.xlu2 %457  ;;  %v1758_v46 = vld [vmem:[%s8531_s4 + $0x38] sm:$0xff] }
  0xb7   :  { %v1370_v43 = vmax.f32 %v872_v38, 0.0  ;;  %8800 = vst [vmem:[#allocation21_spill] sm:$0xff] %v5707_v45 }
  0xb8   :  { %v5672_v12 = vpop.permute.xlu1 %367  ;;  %v1371_v53 = vmax.f32 %v5616_v40, 0.0 }
  0xb9   :  { %v5629_v47 = vpack.c.bf16 %v1370_v43, %v1367_v42  ;;  %8796 = vst [vmem:[#allocation17_spill] sm:$0xff] %v5672_v12 }
  0xba   :  { %467 = vperm.xlu0 %5228, %v205_v44   ;;  %v1782_v44 = vld [vmem:[%s8531_s4 + $0xf8] sm:$0xff] }
  0xbb   :  { %v5631_v48 = vpop.f32.mrf.mxu2 }
  0xbc   :  { %8792 = vst [vmem:[#allocation13_spill] sm:$0xff] %v5631_v48  ;;  %v874_v50 = vpop.f32.mrf.mxu0  ;;  %v5688_v24 = vpop.permute.xlu0 %357 }
  0xbd   :  { %v5635_v51 = vpop.f32.mrf.mxu1  ;;  %v875_v56 = vadd.f32 %v874_v50, %v5587_v25  ;;  %8798 = vst [vmem:[#allocation19_spill] sm:$0xff] %v5688_v24  ;;  %v1781_v50 = vld [vmem:[%s8531_s4 + $0xf0] sm:$0xff] }
  0xbe   :  { %1871 = vperm.xlu1 %5229, %v1765_v54   ;;  %1876 = vperm.xlu2 %5230, %v1766_v55  }
  0xbf   :  { %913 = vmatmul.bf16.gmra.mxu0 %v5633_v49  ;;  %v1373_v0 = vmax.f32 %v875_v56, 0.0  ;;  %v5719_v56 = vld [vmem:[#allocation6 + $0x58] sm:$0xff] }
  0xc0   :  { %1082 = vmatmul.bf16.gmra.mxu1 %v5633_v49  ;;  %1236 = vmatmul.bf16.gmra.mxu2 %v5525_v2  ;;  %v5697_v37 = vpop.permute.xlu1 %452 }
  0xc1   :  { %8799 = vst [vmem:[#allocation20_spill] sm:$0xff] %v5697_v37 }
  0xc2   :  { %1861 = vperm.xlu0 %5228, %v1763_v52  }
  0xc3   :  { %v5652_v57 = vpop.f32.mrf.mxu2 }
  0xc4   :  { %v876_v58 = vpop.f32.mrf.mxu0  ;;  %v5717_v54 = vpop.permute.xlu0 %532 }
  0xc5   :  { %v877_v60 = vadd.f32 %v876_v58, %v5618_v41  ;;  %v5657_v62 = vpop.f32.mrf.mxu1  ;;  %8801 = vst [vmem:[#allocation22_spill] sm:$0xff] %v5717_v54 }
  0xc6   :  { %1866 = vperm.xlu1 %5229, %v1764_v6   ;;  %1851 = vperm.xlu2 %5230, %v1761_v7   ;;  %v1755_v6 = vld [vmem:[%s8531_s4 + $0x20] sm:$0xff]  ;;  %v1756_v7 = vld [vmem:[%s8531_s4 + $0x28] sm:$0xff] }
  0xc7   :  { %v1376_v2 = vmax.f32 %v877_v60, 0.0 }
  0xc9   :  { %v5670_v10 = vpack.c.bf16 %v1376_v2, %v1373_v0  ;;  %v5723_v0 = vpop.permute.xlu1 %537  ;;  %v5725_v2 = vpop.f32.mrf.mxu3 }
  0xca   :  { %1856 = vperm.xlu0 %5228, %v1762_v5   ;;  %8802 = vst [vmem:[#allocation23_spill] sm:$0xff] %v5723_v0  ;;  %v1779_v5 = vld [vmem:[%s8531_s4 + $0xe0] sm:$0xff] }
  0xcb   :  { %v5674_v13 = vpop.f32.mrf.mxu2 }
  0xcc   :  { %v879_v18 = vpop.f32.mrf.mxu0 }
  0xcd   :  { %v5678_v19 = vpop.f32.mrf.mxu1  ;;  %v880_v31 = vadd.f32 %v879_v18, %v5591_v28  ;;  %v5739_v18 = vpop.permute.xlu2 %342 }
  0xce   :  { %1841 = vperm.xlu1 %5229, %v1759_v27   ;;  %1846 = vperm.xlu2 %5230, %v1760_v30   ;;  %8803 = vst [vmem:[#allocation24_spill] sm:$0xff] %v5739_v18  ;;  %v5822_v18 = vadd.f32 %v5593_v29, %v5607_v33 }
  0xcf   :  { %918 = vmatmul.bf16.gmra.mxu0 %v5676_v16  ;;  %v1379_v42 = vmax.f32 %v880_v31, 0.0  ;;  %v5745_v31 = vpop.permute.xlu0 %347 }
  0xd0   :  { %1087 = vmatmul.bf16.gmra.mxu1 %v5676_v16  ;;  %1241 = vmatmul.bf16.gmra.mxu2 %v5557_v14  ;;  %8804 = vst [vmem:[#allocation25_spill] sm:$0xff] %v5745_v31 }
  0xd2   :  { %1831 = vperm.xlu0 %5228, %v1757_v23  }
  0xd3   :  { %v1193_v32 = vpop.f32.mrf.mxu2 }
  0xd4   :  { %v881_v34 = vpop.f32.mrf.mxu0 }
  0xd5   :  { %v882_v14 = vadd.f32 %v881_v34, %v5579_v22  ;;  %v5700_v38 = vpop.f32.mrf.mxu1  ;;  %v5773_v48 = vpop.permute.xlu2 %447 }
  0xd6   :  { %1836 = vperm.xlu1 %5229, %v1758_v46   ;;  %1951 = vperm.xlu2 %5230, %v1781_v50   ;;  %v1754_v46 = vld [vmem:[%s8531_s4 + $0x18] sm:$0xff]  ;;  %8806 = vst [vmem:[#allocation27_spill] sm:$0xff] %v5773_v48  ;;  %v5812_v48 = vld [vmem:[#allocation6 + $0x68] sm:$0xff] }
  0xd7   :  { %v1382_v43 = vmax.f32 %v882_v14, 0.0 }
  0xd9   :  { %v5715_v52 = vpack.c.bf16 %v1382_v43, %v1379_v42  ;;  %v5750_v42 = vpop.f32.mrf.mxu3 }
  0xda   :  { %1956 = vperm.xlu0 %5228, %v1782_v44  }
  0xdb   :  { %v1195_v55 = vpop.f32.mrf.mxu2 }
  0xdc   :  { %v884_v58 = vpop.f32.mrf.mxu0 }
  0xdd   :  { %v5721_v60 = vpop.f32.mrf.mxu1  ;;  %v885_v23 = vadd.f32 %v884_v58, %v5559_v15  ;;  %v1196_v58 = vadd.f32 %v1195_v55, %v5723_v0 }
  0xde   :  { %1821 = vperm.xlu1 %5229, %v1755_v6   ;;  %1826 = vperm.xlu2 %5230, %v1756_v7   ;;  %v1753_v6 = vld [vmem:[%s8531_s4 + $0x10] sm:$0xff] }
  0xdf   :  { %923 = vmatmul.bf16.gmra.mxu0 %v5719_v56  ;;  %v1385_v43 = vmax.f32 %v885_v23, 0.0  ;;  %v1557_v23 = vmax.f32 %v1196_v58, 0.0 }
  0xe0   :  { %1092 = vmatmul.bf16.gmra.mxu1 %v5719_v56  ;;  %1246 = vmatmul.bf16.gmra.mxu2 %v5589_v26  ;;  %v1194_v26 = vadd.f32 %v1193_v32, %v5717_v54  ;;  %v1780_v32 = vld [vmem:[%s8531_s4 + $0xe8] sm:$0xff] }
  0xe2   :  { %1941 = vperm.xlu0 %5228, %v1779_v5   ;;  %v1554_v50 = vmax.f32 %v1194_v26, 0.0  ;;  %v5756_v5 = vpop.permute.xlu1 %442 }
  0xe3   :  { %v5742_v27 = vpop.f32.mrf.mxu2  ;;  %8805 = vst [vmem:[#allocation26_spill] sm:$0xff] %v5756_v5 }
  0xe4   :  { %v886_v30 = vpop.f32.mrf.mxu0  ;;  %v5775_v35 = vpack.c.bf16 %v1557_v23, %v1554_v50  ;;  %v1778_v50 = vld [vmem:[%s8531_s4 + $0xd8] sm:$0xff] }
  0xe5   :  { %v887_v34 = vadd.f32 %v886_v30, %v5566_v17  ;;  %v5748_v14 = vpop.f32.mrf.mxu1 }
  0xe6   :  { %1946 = vperm.xlu1 %5229, %v1780_v32   ;;  %1811 = vperm.xlu2 %5230, %v1753_v6   ;;  %8807 = vst [vmem:[#allocation28_spill] sm:$0xff] %v5775_v35  ;;  %v1776_v35 = vld [vmem:[%s8531_s4 + $0xc8] sm:$0xff] }
  0xe7   :  { %v1388_v44 = vmax.f32 %v887_v34, 0.0  ;;  %v5766_v34 = vld [vmem:[#allocation6 + $0x60] sm:$0xff] }
  0xe9   :  { %v5764_v7 = vpack.c.bf16 %v1388_v44, %v1385_v43  ;;  %v5779_v43 = vpop.permute.xlu0 %522  ;;  %v1021_v44 = vpop.f32.mrf.mxu3 }
  0xea   :  { %1816 = vperm.xlu0 %5228, %v1754_v46   ;;  %8808 = vst [vmem:[#allocation29_spill] sm:$0xff] %v5779_v43  ;;  %v1751_v46 = vld [vmem:[%s8531_s4] sm:$0xff]  ;;  %v5793_v58 = vpop.permute.xlu1 %527  ;;  %v1189_v59 = vadd.f32 %v5652_v57, %v5779_v43 }
  0xeb   :  { %v1209_v30 = vpop.f32.mrf.mxu2  ;;  %8809 = vst [vmem:[#allocation30_spill] sm:$0xff] %v5793_v58 }
  0xec   :  { %v5769_v55 = vadd.f32 %v1209_v30, %v5612_v36  ;;  %v5771_v26 = vpop.f32.mrf.mxu0  ;;  %v1777_v36 = vld [vmem:[%s8531_s4 + $0xd0] sm:$0xff]  ;;  %v5799_v30 = vpop.permute.xlu2 %332 }
  0xed   :  { %v5777_v5 = vpop.f32.mrf.mxu1 }
  0xee   :  { %1931 = vperm.xlu1 %5229, %v1777_v36   ;;  %1936 = vperm.xlu2 %5230, %v1778_v50   ;;  %v1775_v36 = vld [vmem:[%s8531_s4 + $0xc0] sm:$0xff] }
  0xef   :  { %928 = vmatmul.bf16.gmra.mxu0 %v5766_v34 }
  0xf0   :  { %1097 = vmatmul.bf16.gmra.mxu1 %v5766_v34  ;;  %1251 = vmatmul.bf16.gmra.mxu2 %v5633_v49 }
  0xf1   :  { %v1024_v49 = vpop.f32.mrf.mxu3  ;;  %v5804_v45 = vpop.permute.xlu0 %337 }
  0xf2   :  { %1801 = vperm.xlu0 %5228, %v1751_v46   ;;  %8810 = vst [vmem:[#allocation31_spill] sm:$0xff] %v5804_v45  ;;  %v1752_v46 = vld [vmem:[%s8531_s4 + $0x8] sm:$0xff]  ;;  %v5816_v31 = vpop.permute.xlu1 %432 }
  0xf3   :  { %v1212_v32 = vpop.f32.mrf.mxu2  ;;  %8811 = vst [vmem:[#allocation32_spill] sm:$0xff] %v5816_v31  ;;  %v5832_v31 = vadd.f32 %v5635_v51, %v5587_v25 }
  0xf4   :  { %v5795_v6 = vpop.f32.mrf.mxu0  ;;  %v5836_v29 = vpop.permute.xlu2 %437  ;;  %v1213_v57 = vadd.f32 %v1212_v32, %v5587_v25 }
  0xf5   :  { %v5797_v23 = vpop.f32.mrf.mxu1  ;;  %8812 = vst [vmem:[#allocation33_spill] sm:$0xff] %v5836_v29  ;;  %v1056_v29 = vadd.f32 %v5748_v14, %v5566_v17  ;;  %v1208_v14 = vadd.f32 %v5742_v27, %v5607_v33  ;;  %v1051_v33 = vadd.f32 %v5700_v38, %v5579_v22  ;;  %v1548_v27 = vmax.f32 %v1189_v59, 0.0  ;;  %v1798_v59 = vld [vmem:[%s8531_s4 + $0x178] sm:$0xff] }
  0xf6   :  { %1806 = vperm.xlu1 %5229, %v1752_v46   ;;  %1921 = vperm.xlu2 %5230, %v1775_v36   ;;  %v1025_v46 = vadd.f32 %v1024_v49, %v5717_v54  ;;  %v1774_v49 = vld [vmem:[%s8531_s4 + $0xb8] sm:$0xff]  ;;  %v1368_v54 = vmax.f32 %v5822_v18, 0.0  ;;  %v1022_v18 = vadd.f32 %v1021_v44, %v5793_v58 }
  0xf8   :  { %v1550_v44 = vmax.f32 %v1022_v18, 0.0 }
  0xf9   :  { %v1026_v24 = vpop.f32.mrf.mxu3  ;;  %v5853_v12 = vpop.permute.xlu0 %512 }
  0xfa   :  { %1926 = vperm.xlu0 %5228, %v1776_v35   ;;  %v1797_v35 = vld [vmem:[%s8531_s4 + $0x170] sm:$0xff]  ;;  %v1027_v36 = vadd.f32 %v1026_v24, %v5723_v0  ;;  %v1046_v24 = vadd.f32 %v5657_v62, %v5618_v41  ;;  %v1553_v0 = vmax.f32 %v1025_v46, 0.0  ;;  %8813 = vst [vmem:[#allocation34_spill] sm:$0xff] %v5853_v12  ;;  %v1020_v62 = vadd.f32 %v5750_v42, %v5779_v43 }
  0xfb   :  { %v1214_v50 = vpop.f32.mrf.mxu2  ;;  %v1374_v46 = vmax.f32 %v5832_v31, 0.0  ;;  %v1191_v42 = vadd.f32 %v5674_v13, %v5793_v58  ;;  %v1389_v31 = vmax.f32 %v1056_v29, 0.0  ;;  %v1772_v13 = vld [vmem:[%s8531_s4 + $0xa8] sm:$0xff]  ;;  %v1372_v29 = vmax.f32 %v5769_v55, 0.0 }
  0xfc   :  { %v5814_v37 = vpop.f32.mrf.mxu0  ;;  %v1556_v51 = vmax.f32 %v1027_v36, 0.0  ;;  %v1377_v40 = vmax.f32 %v1046_v24, 0.0  ;;  %v1369_v24 = vmax.f32 %v1208_v14, 0.0 }
  0xfd   :  { %v5818_v21 = vpop.f32.mrf.mxu1 }
  0xfe   :  { %1911 = vperm.xlu1 %5229, %v1773_v63   ;;  %1916 = vperm.xlu2 %5230, %v1774_v49   ;;  %v1547_v49 = vmax.f32 %v1020_v62, 0.0 }
  0xff   :  { %933 = vmatmul.bf16.gmra.mxu0 %v5812_v48 }
 0x100   :  { %1102 = vmatmul.bf16.gmra.mxu1 %v5812_v48  ;;  %1256 = vmatmul.bf16.gmra.mxu2 %v5676_v16  ;;  %v1054_v16 = vadd.f32 %v5721_v60, %v5559_v15  ;;  %v1652_v60 = vpack.c.bf16 %v1556_v51, %v1553_v0  ;;  %v1049_v0 = vadd.f32 %v5678_v19, %v5591_v28  ;;  %v1375_v51 = vmax.f32 %v1213_v57, 0.0 }
 0x102   :  { %2031 = vperm.xlu0 %5228, %v1797_v35   ;;  %v1215_v35 = vadd.f32 %v1214_v50, %v5618_v41  ;;  %2906 = vmatpush.bf16.msrb.mxu1 %v1652_v60  ;;  %v1386_v25 = vmax.f32 %v1054_v16, 0.0  ;;  %v5874_v41 = vpop.permute.xlu1 %517  ;;  %v1015_v50 = vadd.f32 %v5702_v39, %v5853_v12  ;;  %v1551_v16 = vmax.f32 %v1191_v42, 0.0  ;;  %v5891_v60 = vpop.permute.xlu2 %322 }
 0x103   :  { %v1217_v45 = vpop.f32.mrf.mxu2  ;;  %8814 = vst [vmem:[#allocation35_spill] sm:$0xff] %v5874_v41  ;;  %v1017_v19 = vadd.f32 %v5725_v2, %v5874_v41  ;;  %v1380_v18 = vmax.f32 %v1049_v0, 0.0  ;;  %v1383_v2 = vmax.f32 %v1051_v33, 0.0  ;;  %v5902_v0 = vpack.c.bf16 %v1371_v53, %v1368_v54  ;;  %v1795_v53 = vld [vmem:[%s8531_s4 + $0x160] sm:$0xff]  ;;  %v1796_v54 = vld [vmem:[%s8531_s4 + $0x168] sm:$0xff] }
 0x104   :  { %v5864_v36 = vpop.f32.mrf.mxu0  ;;  %v1218_v32 = vadd.f32 %v1217_v45, %v5591_v28  ;;  %v1378_v38 = vmax.f32 %v1215_v35, 0.0  ;;  %v1771_v28 = vld [vmem:[%s8531_s4 + $0xa0] sm:$0xff]  ;;  %v1649_v45 = vpack.c.bf16 %v1550_v44, %v1547_v49  ;;  %v1541_v62 = vmax.f32 %v1015_v50, 0.0  ;;  %v5893_v35 = vld [vmem:[#allocation6 + $0x70] sm:$0xff]  ;;  %v5900_v44 = vpop.permute.xlu0 %327 }
 0x105   :  { %v5866_v63 = vpop.f32.mrf.mxu1  ;;  %v1544_v39 = vmax.f32 %v1017_v19, 0.0  ;;  %v5895_v43 = vpack.c.bf16 %v1389_v31, %v1386_v25  ;;  %v5897_v49 = vpack.c.bf16 %v1377_v40, %v1374_v46  ;;  %v5906_v50 = vpack.c.bf16 %v1372_v29, %v1369_v24 }
 0x106   :  { %2907 = vmatpush.bf16.msrb.mxu1 %v1649_v45  ;;  %v1381_v14 = vmax.f32 %v1218_v32, 0.0  ;;  %2036 = vperm.xlu1 %5229, %v1798_v59   ;;  %v5908_v19 = vpack.c.bf16 %v1551_v16, %v1548_v27  ;;  %v5914_v46 = vpack.c.bf16 %v1383_v2, %v1380_v18  ;;  %v1793_v45 = vld [vmem:[%s8531_s4 + $0x150] sm:$0xff]  ;;  %v5940_v16 = vld [vmem:[#allocation6 + $0x78] sm:$0xff] }
 0x107   :  { %1901 = vperm.xlu2 %5230, %v1771_v28   ;;  %v1646_v33 = vpack.c.bf16 %v1544_v39, %v1541_v62  ;;  %v1770_v28 = vld [vmem:[%s8531_s4 + $0x98] sm:$0xff] }
 0x108   :  { %8815 = vst [vmem:[#allocation36_spill] sm:$0xff] %v5908_v19  ;;  %v8835_v19 = vld [vmem:[#allocation24_spill] sm:$0xff] }
 0x10a   :  { %1906 = vperm.xlu0 %5228, %v1772_v13   ;;  %v5904_v13 = vpack.c.bf16 %v1378_v38, %v1375_v51  ;;  %2908 = vmatpush.bf16.msrb.mxu1 %v1646_v33  ;;  %v5926_v27 = vpop.permute.xlu2 %427  ;;  %v1768_v33 = vld [vmem:[%s8531_s4 + $0x88] sm:$0xff] }
 0x10b   :  { %v1219_v57 = vpop.f32.mrf.mxu2 }
 0x10c   :  { %v1220_v55 = vadd.f32 %v1219_v57, %v5579_v22  ;;  %v899_v42 = vpop.f32.mrf.mxu0  ;;  %v1769_v22 = vld [vmem:[%s8531_s4 + $0x90] sm:$0xff]  ;;  %v5928_v51 = vpop.permute.xlu0 %502  ;;  %v1791_v57 = vld [vmem:[%s8531_s4 + $0x140] sm:$0xff] }
 0x10d   :  { %v1068_v32 = vpop.f32.mrf.mxu1 }
 0x10e   :  { %v1384_v59 = vmax.f32 %v1220_v55, 0.0  ;;  %2021 = vperm.xlu1 %5229, %v1795_v53  }
 0x10f   :  { %938 = vmatmul.bf16.gmra.mxu0 %v5893_v35  ;;  %2026 = vperm.xlu2 %5230, %v1796_v54  }
 0x110   :  { %1107 = vmatmul.bf16.gmra.mxu1 %v5893_v35  ;;  %1261 = vmatmul.bf16.gmra.mxu2 %v5719_v56  ;;  %v5924_v40 = vpack.c.bf16 %v1384_v59, %v1381_v14  ;;  %v1794_v56 = vld [vmem:[%s8531_s4 + $0x158] sm:$0xff] }
 0x112   :  { %1891 = vperm.xlu0 %5228, %v1769_v22   ;;  %v5943_v14 = vpop.permute.xlu2 %312 }
 0x113   :  { %v1222_v25 = vpop.f32.mrf.mxu2 }
 0x114   :  { %v901_v31 = vpop.f32.mrf.mxu0  ;;  %v1223_v38 = vadd.f32 %v1222_v25, %v5559_v15  ;;  %v5951_v55 = vpop.permute.xlu0 %317 }
 0x115   :  { %v1070_v24 = vpop.f32.mrf.mxu1  ;;  %v902_v25 = vadd.f32 %v901_v31, %v5549_v11 }
 0x116   :  { %1896 = vperm.xlu1 %5229, %v1770_v28   ;;  %v1387_v62 = vmax.f32 %v1223_v38, 0.0  ;;  %v900_v28 = vadd.f32 %v899_v42, %v5529_v4  ;;  %v1792_v42 = vld [vmem:[%s8531_s4 + $0x148] sm:$0xff] }
 0x117   :  { %2011 = vperm.xlu2 %5230, %v1793_v45  }
 0x11a   :  { %2016 = vperm.xlu0 %5228, %v1794_v56  }
 0x11b   :  { %v1224_v29 = vpop.f32.mrf.mxu2 }
 0x11c   :  { %v1225_v39 = vadd.f32 %v1224_v29, %v5566_v17  ;;  %v904_v18 = vpop.f32.mrf.mxu0  ;;  %v1767_v17 = vld [vmem:[%s8531_s4 + $0x80] sm:$0xff]  ;;  %v1069_v29 = vadd.f32 %v1068_v32, %v5529_v4  ;;  %v1406_v32 = vmax.f32 %v902_v25, 0.0 }
 0x11d   :  { %v1073_v2 = vpop.f32.mrf.mxu1  ;;  %v905_v22 = vadd.f32 %v904_v18, %v5512_v61 }
 0x11e   :  { %v1390_v15 = vmax.f32 %v1225_v39, 0.0  ;;  %1881 = vperm.xlu1 %5229, %v1767_v17   ;;  %v897_v17 = vadd.f32 %v5864_v36, %v5542_v8  ;;  %v1403_v36 = vmax.f32 %v900_v28, 0.0  ;;  %v1404_v25 = vmax.f32 %v1069_v29, 0.0 }
 0x11f   :  { %943 = vmatmul.bf16.gmra.mxu0 %v5940_v16  ;;  %1886 = vperm.xlu2 %5230, %v1768_v33   ;;  %v1409_v39 = vmax.f32 %v905_v22, 0.0  ;;  %v895_v22 = vadd.f32 %v5814_v37, %v5523_v1  ;;  %v1059_v28 = vadd.f32 %v5777_v5, %v5544_v9  ;;  %v1061_v29 = vadd.f32 %v5797_v23, %v5574_v20  ;;  %v1787_v5 = vld [vmem:[%s8531_s4 + $0x120] sm:$0xff] }
 0x120   :  { %1112 = vmatmul.bf16.gmra.mxu1 %v5940_v16  ;;  %1266 = vmatmul.bf16.gmra.mxu2 %v5766_v34  ;;  %v5959_v59 = vpack.c.bf16 %v1390_v15, %v1387_v62  ;;  %v1074_v34 = vadd.f32 %v1073_v2, %v5512_v61  ;;  %v1071_v62 = vadd.f32 %v1070_v24, %v5549_v11  ;;  %v1790_v2 = vld [vmem:[%s8531_s4 + $0x138] sm:$0xff]  ;;  %v1789_v24 = vld [vmem:[%s8531_s4 + $0x130] sm:$0xff] }
 0x122   :  { %2001 = vperm.xlu0 %5228, %v1791_v57   ;;  %v1410_v15 = vmax.f32 %v1074_v34, 0.0  ;;  %v5974_v57 = vpop.permute.xlu2 %417  ;;  %v1064_v34 = vadd.f32 %v5818_v21, %v5523_v1  ;;  %v892_v21 = vadd.f32 %v5795_v6, %v5574_v20  ;;  %v1785_v6 = vld [vmem:[%s8531_s4 + $0x110] sm:$0xff] }
 0x123   :  { %v5962_v53 = vpop.f32.mrf.mxu2 }
 0x124   :  { %v906_v54 = vpop.f32.mrf.mxu0 }
 0x125   :  { %v907_v56 = vadd.f32 %v906_v54, %v5527_v3  ;;  %v1075_v38 = vpop.f32.mrf.mxu1 }
 0x126   :  { %v1076_v45 = vadd.f32 %v1075_v38, %v5527_v3  ;;  %v1066_v38 = vadd.f32 %v5866_v63, %v5542_v8  ;;  %2006 = vperm.xlu1 %5229, %v1792_v42   ;;  %v890_v63 = vadd.f32 %v5771_v26, %v5544_v9  ;;  %v1398_v42 = vmax.f32 %v1064_v34, 0.0 }
 0x127   :  { %v1412_v18 = vmax.f32 %v907_v56, 0.0  ;;  %v5988_v56 = vpop.permute.xlu0 %492  ;;  %1991 = vperm.xlu2 %5230, %v1789_v24   ;;  %v1394_v26 = vmax.f32 %v892_v21, 0.0  ;;  %v1392_v34 = vmax.f32 %v1059_v28, 0.0 }
 0x128   :  { %v1413_v31 = vmax.f32 %v1076_v45, 0.0  ;;  %8816 = vst [vmem:[#allocation37_spill] sm:$0xff] %v5988_v56  ;;  %v1407_v45 = vmax.f32 %v1071_v62, 0.0  ;;  %v1397_v62 = vmax.f32 %v895_v22, 0.0  ;;  %v1391_v24 = vmax.f32 %v890_v63, 0.0 }
 0x129   :  { %v1580_v33 = vpack.c.bf16 %v1412_v18, %v1409_v39  ;;  %v5994_v18 = vld [vmem:[#allocation6 + $0x80] sm:$0xff] }
 0x12a   :  { %v1581_v54 = vpack.c.bf16 %v1413_v31, %v1410_v15  ;;  %1996 = vperm.xlu0 %5228, %v1790_v2   ;;  %v1400_v15 = vmax.f32 %v897_v17, 0.0  ;;  %v1577_v31 = vpack.c.bf16 %v1406_v32, %v1403_v36  ;;  %v1578_v17 = vpack.c.bf16 %v1407_v45, %v1404_v25  ;;  %v1788_v32 = vld [vmem:[%s8531_s4 + $0x128] sm:$0xff]  ;;  %v6016_v22 = vpop.permute.xlu2 %302 }
 0x12b   :  { %v5992_v39 = vpop.f32.mrf.mxu2  ;;  %2519 = vmatpush.bf16.msrb.mxu3 %v1580_v33  ;;  %v1401_v33 = vmax.f32 %v1066_v38, 0.0  ;;  %v1571_v63 = vpack.c.bf16 %v1394_v26, %v1391_v24 }
 0x12c   :  { %v909_v37 = vpop.f32.mrf.mxu0  ;;  %3035 = vmatpush.bf16.msra.mxu2 %v1581_v54  ;;  %v1574_v23 = vpack.c.bf16 %v1400_v15, %v1397_v62  ;;  %v1395_v54 = vmax.f32 %v1061_v29, 0.0  ;;  %v1784_v62 = vld [vmem:[%s8531_s4 + $0x108] sm:$0xff] }
 0x12d   :  { %v1078_v2 = vpop.f32.mrf.mxu1  ;;  %v910_v38 = vadd.f32 %v909_v37, %v6016_v22  ;;  %v1575_v36 = vpack.c.bf16 %v1401_v33, %v1398_v42 }
 0x12e   :  { %1981 = vperm.xlu1 %5229, %v1787_v5   ;;  %v1079_v25 = vadd.f32 %v1078_v2, %v6016_v22  ;;  %v1572_v42 = vpack.c.bf16 %v1395_v54, %v1392_v34 }
 0x12f   :  { %948 = vmatmul.bf16.gmra.mxu0 %v5994_v18  ;;  %2520 = vmatpush.bf16.msrb.mxu3 %v1577_v31  ;;  %v6022_v45 = vpop.permute.xlu0 %307  ;;  %v1415_v29 = vmax.f32 %v910_v38, 0.0  ;;  %v4670_v38 = vld [vmem:[%s8530_s3] sm:$0xf] }
 0x130   :  { %1117 = vmatmul.bf16.gmra.mxu1 %v5994_v18  ;;  %1271 = vmatmul.bf16.gmra.mxu2 %v5812_v48  ;;  %v1416_v2 = vmax.f32 %v1079_v25, 0.0 }
 0x131   :  { %3036 = vmatpush.bf16.msra.mxu2 %v1578_v17  ;;  %1986 = vperm.xlu2 %5230, %v1788_v32   ;;  %v1783_v17 = vld [vmem:[%s8531_s4 + $0x100] sm:$0xff]  ;;  %v6042_v32 = vld [vmem:[#allocation6 + $0x88] sm:$0xff] }
 0x132   :  { %1971 = vperm.xlu0 %5228, %v1785_v6   ;;  %v1786_v6 = vld [vmem:[%s8531_s4 + $0x118] sm:$0xff] }
 0x133   :  { %v6019_v48 = vpop.f32.mrf.mxu2  ;;  %2521 = vmatpush.bf16.msrb.mxu3 %v1574_v23 }
 0x134   :  { %v911_v21 = vpop.f32.mrf.mxu0 }
 0x135   :  { %v912_v15 = vadd.f32 %v911_v21, %v6022_v45  ;;  %v1080_v31 = vpop.f32.mrf.mxu1  ;;  %3037 = vmatpush.bf16.msra.mxu2 %v1575_v36 }
 0x136   :  { %v1081_v28 = vadd.f32 %v1080_v31, %v6022_v45  ;;  %1976 = vperm.xlu1 %5229, %v1786_v6  }
 0x137   :  { %v1418_v37 = vmax.f32 %v912_v15, 0.0  ;;  %2522 = vmatpush.bf16.msrb.mxu3 %v1571_v63 }
 0x138   :  { %v1419_v33 = vmax.f32 %v1081_v28, 0.0 }
 0x139   :  { %3038 = vmatpush.bf16.msra.mxu2 %v1572_v42  ;;  %v6035_v5 = vpack.c.bf16 %v1418_v37, %v1415_v29  ;;  %1961 = vperm.xlu2 %5230, %v1783_v17  }
 0x13a   :  { %1966 = vperm.xlu0 %5228, %v1784_v62   ;;  %v6037_v26 = vpack.c.bf16 %v1419_v33, %v1416_v2  ;;  %v5114_v33 = vld [vmem:[%s8530_s3 + $0x2c] sm:$0xf0] }
 0x13b   :  { %v6039_v23 = vpop.f32.mrf.mxu2  ;;  %2523 = vmatpush.bf16.msrb.mxu3 %v5764_v7 }
 0x13c   :  { %v914_v24 = vpop.f32.mrf.mxu0 }
 0x13d   :  { %v1083_v34 = vpop.f32.mrf.mxu1  ;;  %3039 = vmatpush.bf16.msra.mxu2 %v5895_v43  ;;  %v915_v7 = vadd.f32 %v914_v24, %v5943_v14  ;;  %v5110_v43 = vld [vmem:[%s8530_s3 + $0xc] sm:$0xf0] }
 0x13e   :  { %v6062_v21 = vor.u32 %v5110_v43, %v4670_v38 }
 0x13f   :  { %953 = vmatmul.bf16.gmra.mxu0 %v6042_v32  ;;  %2524 = vmatpush.bf16.msrb.mxu3 %v5715_v52  ;;  %v1084_v52 = vadd.f32 %v1083_v34, %v5943_v14 }
 0x140   :  { %1122 = vmatmul.bf16.gmra.mxu1 %v6042_v32  ;;  %1276 = vmatmul.bf16.gmra.mxu2 %v5893_v35 }
 0x141   :  { %3040 = vmatpush.bf16.msra.mxu2 %v5914_v46  ;;  %v1422_v31 = vmax.f32 %v1084_v52, 0.0 }
 0x143   :  { %v1237_v54 = vpop.f32.mrf.mxu2  ;;  %2525 = vmatpush.bf16.msrb.mxu3 %v5670_v10  ;;  %v1421_v10 = vmax.f32 %v915_v7, 0.0 }
 0x144   :  { %v916_v36 = vpop.f32.mrf.mxu0 }
 0x145   :  { %v917_v35 = vadd.f32 %v916_v36, %v5951_v55  ;;  %v1085_v25 = vpop.f32.mrf.mxu1  ;;  %3041 = vmatpush.bf16.msra.mxu2 %v5897_v49  ;;  %v6071_v49 = vld [vmem:[#allocation6 + $0x90] sm:$0xff] }
 0x146   :  { %v1086_v46 = vadd.f32 %v1085_v25, %v5951_v55 }
 0x147   :  { %v1424_v15 = vmax.f32 %v917_v35, 0.0  ;;  %2526 = vmatpush.bf16.msrb.mxu3 %v5629_v47 }
 0x148   :  { %v1425_v63 = vmax.f32 %v1086_v46, 0.0 }
 0x149   :  { %v6065_v28 = vpack.c.bf16 %v1424_v15, %v1421_v10  ;;  %3042 = vmatpush.bf16.msra.mxu2 %v5902_v0  ;;  %v4686_v0 = vld [vmem:[%s8530_s3 + $0x20] sm:$0xf] }
 0x14a   :  { %2527 = vmatmul.bf16.vlgmr.msrb.gmra.mxu3 %v6062_v21  ;;  %v6069_v29 = vpack.c.bf16 %v1425_v63, %v1422_v31  ;;  %v6094_v15 = vld [vmem:[#allocation6 + $0x98] sm:$0xff] }
 0x14b   :  { %v1239_v37 = vpop.f32.mrf.mxu2 }
 0x14c   :  { %v919_v62 = vpop.f32.mrf.mxu0  ;;  %v1240_v31 = vadd.f32 %v1239_v37, %v5549_v11  ;;  %v4702_v37 = vld [vmem:[%s8530_s3 + $0x40] sm:$0xf] }
 0x14d   :  { %v1088_v42 = vpop.f32.mrf.mxu1  ;;  %v920_v47 = vadd.f32 %v919_v62, %v5891_v60 }
 0x14e   :  { %v1089_v6 = vadd.f32 %v1088_v42, %v5891_v60 }
 0x14f   :  { %958 = vmatmul.bf16.gmra.mxu0 %v6071_v49  ;;  %v1427_v38 = vmax.f32 %v920_v47, 0.0  ;;  %v1238_v47 = vadd.f32 %v1237_v54, %v5529_v4 }
 0x150   :  { %1127 = vmatmul.bf16.gmra.mxu1 %v6071_v49  ;;  %1281 = vmatmul.bf16.gmra.mxu2 %v5940_v16  ;;  %v6086_v16 = vor.u32 %v5114_v33, %v4686_v0  ;;  %v1428_v52 = vmax.f32 %v1089_v6, 0.0 }
 0x151   :  { %v1405_v11 = vmax.f32 %v1238_v47, 0.0 }
 0x153   :  { %v1242_v2 = vpop.f32.mrf.mxu2 }
 0x154   :  { %v921_v17 = vpop.f32.mrf.mxu0  ;;  %v1243_v25 = vadd.f32 %v1242_v2, %v5512_v61  ;;  %v1235_v61 = vadd.f32 %v6039_v23, %v5542_v8  ;;  %v1408_v2 = vmax.f32 %v1240_v31, 0.0  ;;  %v5118_v8 = vld [vmem:[%s8530_s3 + $0x4c] sm:$0xf0]  ;;  %v1230_v23 = vadd.f32 %v5992_v39, %v5574_v20 }
 0x155   :  { %v922_v24 = vadd.f32 %v921_v17, %v5900_v44  ;;  %v1090_v34 = vpop.f32.mrf.mxu1 }
 0x156   :  { %v1091_v7 = vadd.f32 %v1090_v34, %v5900_v44  ;;  %v1411_v0 = vmax.f32 %v1243_v25, 0.0  ;;  %v1396_v20 = vmax.f32 %v1230_v23, 0.0 }
 0x157   :  { %v1430_v43 = vmax.f32 %v922_v24, 0.0  ;;  %v8817_v24 = vld [vmem:[#allocation31_spill] sm:$0xff] }
 0x158   :  { %v1431_v36 = vmax.f32 %v1091_v7, 0.0 }
 0x159   :  { %v6088_v35 = vpack.c.bf16 %v1430_v43, %v1427_v38  ;;  %v1228_v38 = vadd.f32 %v5962_v53, %v5544_v9 }
 0x15a   :  { %2532 = vmatmul.bf16.gmra.mxu3 %v6086_v16  ;;  %v6092_v46 = vpack.c.bf16 %v1431_v36, %v1428_v52  ;;  %v6120_v36 = vor.u32 %v5118_v8, %v4702_v37  ;;  %v5122_v37 = vld [vmem:[%s8530_s3 + $0x6c] sm:$0xf0] }
 0x15b   :  { %v1244_v10 = vpop.f32.mrf.mxu2 }
 0x15c   :  { %v1245_v63 = vadd.f32 %v1244_v10, %v5527_v3  ;;  %v924_v62 = vpop.f32.mrf.mxu0  ;;  %v1233_v3 = vadd.f32 %v6019_v48, %v5523_v1  ;;  %v1579_v48 = vpack.c.bf16 %v1408_v2, %v1405_v11  ;;  %8818 = vst [vmem:[#allocation31_spill] sm:$0xff] %v6120_v36 }
 0x15d   :  { %v1093_v42 = vpop.f32.mrf.mxu1  ;;  %v925_v4 = vadd.f32 %v924_v62, %v5799_v30 }
 0x15e   :  { %v1414_v33 = vmax.f32 %v1245_v63, 0.0  ;;  %v1094_v17 = vadd.f32 %v1093_v42, %v5799_v30  ;;  %v1399_v43 = vmax.f32 %v1233_v3, 0.0  ;;  %v1393_v42 = vmax.f32 %v1228_v38, 0.0  ;;  %v6135_v3 = vpop.permute.xlu1 %422 }
 0x15f   :  { %963 = vmatmul.bf16.gmra.mxu0 %v6094_v15  ;;  %v1433_v25 = vmax.f32 %v925_v4, 0.0 }
 0x160   :  { %v1582_v6 = vpack.c.bf16 %v1414_v33, %v1411_v0  ;;  %1132 = vmatmul.bf16.gmra.mxu1 %v6094_v15  ;;  %1286 = vmatmul.bf16.gmra.mxu2 %v5994_v18  ;;  %v1402_v18 = vmax.f32 %v1235_v61, 0.0  ;;  %v1434_v39 = vmax.f32 %v1094_v17, 0.0  ;;  %v6128_v0 = vld [vmem:[#allocation6 + $0xa0] sm:$0xff]  ;;  %v1573_v2 = vpack.c.bf16 %v1396_v20, %v1393_v42 }
 0x162   :  { %3551 = vmatpush.bf16.msrb.mxu2 %v1582_v6  ;;  %v1576_v63 = vpack.c.bf16 %v1402_v18, %v1399_v43 }
 0x163   :  { %v1247_v54 = vpop.f32.mrf.mxu2 }
 0x164   :  { %v926_v1 = vpop.f32.mrf.mxu0  ;;  %v1248_v47 = vadd.f32 %v1247_v54, %v6016_v22  ;;  %v4718_v54 = vld [vmem:[%s8530_s3 + $0x60] sm:$0xf] }
 0x165   :  { %v927_v34 = vadd.f32 %v926_v1, %v8817_v24  ;;  %v1095_v7 = vpop.f32.mrf.mxu1  ;;  %v6153_v18 = vor.u32 %v5122_v37, %v4718_v54  ;;  %v6161_v1 = vld [vmem:[#allocation6 + $0xa8] sm:$0xff] }
 0x166   :  { %v1096_v52 = vadd.f32 %v1095_v7, %v8817_v24  ;;  %3552 = vmatpush.bf16.msrb.mxu2 %v1579_v48  ;;  %v1417_v11 = vmax.f32 %v1248_v47, 0.0 }
 0x167   :  { %v1436_v10 = vmax.f32 %v927_v34, 0.0  ;;  %8820 = vst [vmem:[#allocation39_spill] sm:$0xff] %v6153_v18 }
 0x168   :  { %v1437_v31 = vmax.f32 %v1096_v52, 0.0  ;;  %v5126_v52 = vld [vmem:[%s8530_s3 + $0x8c] sm:$0xf0] }
 0x169   :  { %v6122_v62 = vpack.c.bf16 %v1436_v10, %v1433_v25 }
 0x16a   :  { %2537 = vmatmul.bf16.gmra.mxu3 %v6120_v36  ;;  %3553 = vmatpush.bf16.msrb.mxu2 %v1576_v63  ;;  %v6126_v9 = vpack.c.bf16 %v1437_v31, %v1434_v39  ;;  %v6188_v39 = vld [vmem:[#allocation6 + $0xb0] sm:$0xff] }
 0x16b   :  { %v1249_v53 = vpop.f32.mrf.mxu2 }
 0x16c   :  { %v1250_v33 = vadd.f32 %v1249_v53, %v6022_v45  ;;  %v6131_v61 = vpop.f32.mrf.mxu0 }
 0x16d   :  { %v6133_v6 = vpop.f32.mrf.mxu1 }
 0x16e   :  { %v1420_v4 = vmax.f32 %v1250_v33, 0.0  ;;  %3554 = vmatpush.bf16.msrb.mxu2 %v1573_v2 }
 0x16f   :  { %968 = vmatmul.bf16.gmra.mxu0 %v6128_v0 }
 0x170   :  { %1137 = vmatmul.bf16.gmra.mxu1 %v6128_v0  ;;  %1291 = vmatmul.bf16.gmra.mxu2 %v6042_v32  ;;  %v6140_v22 = vpack.c.bf16 %v1420_v4, %v1417_v11  ;;  %v6156_v32 = vpop.permute.xlu1 %507  ;;  %v4750_v11 = vld [vmem:[%s8530_s3 + $0xa0] sm:$0xf] }
 0x172   :  { %8819 = vst [vmem:[#allocation38_spill] sm:$0xff] %v6140_v22  ;;  %3555 = vmatpush.bf16.msrb.mxu2 %v5959_v59 }
 0x173   :  { %v1252_v45 = vpop.f32.mrf.mxu2 }
 0x174   :  { %v6149_v8 = vpop.f32.mrf.mxu0  ;;  %v1253_v59 = vadd.f32 %v1252_v45, %v5943_v14 }
 0x175   :  { %v6151_v23 = vpop.f32.mrf.mxu1 }
 0x176   :  { %3556 = vmatpush.bf16.msrb.mxu2 %v5924_v40  ;;  %v1423_v38 = vmax.f32 %v1253_v59, 0.0 }
 0x178   :  { %v6174_v40 = vpop.permute.xlu1 %412 }
 0x17a   :  { %2542 = vmatmul.bf16.gmra.mxu3 %v6153_v18  ;;  %3557 = vmatpush.bf16.msrb.mxu2 %v5904_v13 }
 0x17b   :  { %v1254_v17 = vpop.f32.mrf.mxu2 }
 0x17c   :  { %v1255_v48 = vadd.f32 %v1254_v17, %v5951_v55  ;;  %v6164_v34 = vpop.f32.mrf.mxu0  ;;  %v4734_v55 = vld [vmem:[%s8530_s3 + $0x80] sm:$0xf] }
 0x17d   :  { %v6166_v7 = vpop.f32.mrf.mxu1  ;;  %v6184_v10 = vor.u32 %v5126_v52, %v4734_v55  ;;  %v6214_v17 = vld [vmem:[#allocation6 + $0xb8] sm:$0xff] }
 0x17e   :  { %v1426_v43 = vmax.f32 %v1255_v48, 0.0  ;;  %3558 = vmatpush.bf16.msrb.mxu2 %v5906_v50 }
 0x17f   :  { %973 = vmatmul.bf16.gmra.mxu0 %v6161_v1  ;;  %8822 = vst [vmem:[#allocation41_spill] sm:$0xff] %v6184_v10 }
 0x180   :  { %1142 = vmatmul.bf16.gmra.mxu1 %v6161_v1  ;;  %1296 = vmatmul.bf16.gmra.mxu2 %v6071_v49  ;;  %v6172_v13 = vpack.c.bf16 %v1426_v43, %v1423_v38  ;;  %v6190_v31 = vpop.permute.xlu1 %497 }
 0x182   :  { %8821 = vst [vmem:[#allocation40_spill] sm:$0xff] %v6172_v13 }
 0x183   :  { %v1257_v14 = vpop.f32.mrf.mxu2 }
 0x184   :  { %v936_v50 = vpop.f32.mrf.mxu0  ;;  %v1258_v49 = vadd.f32 %v1257_v14, %v5891_v60  ;;  %v6219_v14 = vpop.permute.xlu0 %482 }
 0x185   :  { %v6182_v25 = vpop.f32.mrf.mxu1  ;;  %8825 = vst [vmem:[#allocation44_spill] sm:$0xff] %v6219_v14 }
 0x186   :  { %v1429_v53 = vmax.f32 %v1258_v49, 0.0 }
 0x188   :  { %v6208_v54 = vpop.permute.xlu1 %402 }
 0x18a   :  { %2547 = vmatmul.bf16.gmra.mxu3 %v6184_v10 }
 0x18b   :  { %v1259_v20 = vpop.f32.mrf.mxu2 }
 0x18c   :  { %v1260_v63 = vadd.f32 %v1259_v20, %v5900_v44  ;;  %v939_v42 = vpop.f32.mrf.mxu0  ;;  %v5130_v44 = vld [vmem:[%s8530_s3 + $0xac] sm:$0xf0]  ;;  %v8828_v20 = vld [vmem:[#allocation14_spill] sm:$0xff]  ;;  %v6242_v13 = vpop.permute.xlu0 %397 }
 0x18d   :  { %v6193_v47 = vpop.f32.mrf.mxu1  ;;  %v6210_v37 = vor.u32 %v5130_v44, %v4750_v11  ;;  %v8829_v11 = vld [vmem:[#allocation17_spill] sm:$0xff] }
 0x18e   :  { %v1432_v33 = vmax.f32 %v1260_v63, 0.0 }
 0x18f   :  { %978 = vmatmul.bf16.gmra.mxu0 %v6188_v39  ;;  %8824 = vst [vmem:[#allocation43_spill] sm:$0xff] %v6210_v37 }
 0x190   :  { %1147 = vmatmul.bf16.gmra.mxu1 %v6188_v39  ;;  %1301 = vmatmul.bf16.gmra.mxu2 %v6094_v15  ;;  %v6198_v60 = vpack.c.bf16 %v1432_v33, %v1429_v53  ;;  %v6222_v49 = vpop.permute.xlu1 %487  ;;  %v4766_v53 = vld [vmem:[%s8530_s3 + $0xc0] sm:$0xf]  ;;  %v5134_v33 = vld [vmem:[%s8530_s3 + $0xcc] sm:$0xf0] }
 0x191   :  { %8826 = vst [vmem:[#allocation45_spill] sm:$0xff] %v6222_v49  ;;  %v8870_v49 = vld [vmem:[#allocation32_spill] sm:$0xff] }
 0x192   :  { %8823 = vst [vmem:[#allocation42_spill] sm:$0xff] %v6198_v60  ;;  %v8833_v60 = vld [vmem:[#allocation19_spill] sm:$0xff] }
 0x193   :  { %v1262_v2 = vpop.f32.mrf.mxu2  ;;  %v937_v58 = vadd.f32 %v936_v50, %v8833_v60 }
 0x194   :  { %v941_v4 = vpop.f32.mrf.mxu0  ;;  %v1263_v15 = vadd.f32 %v1262_v2, %v5799_v30 }
 0x195   :  { %v6206_v45 = vpop.f32.mrf.mxu1  ;;  %v942_v44 = vadd.f32 %v941_v4, %v8829_v11  ;;  %v1448_v50 = vmax.f32 %v937_v58, 0.0  ;;  %v6263_v58 = vpop.permute.xlu0 %382 }
 0x196   :  { %v1435_v55 = vmax.f32 %v1263_v15, 0.0  ;;  %v8830_v15 = vld [vmem:[#allocation15_spill] sm:$0xff] }
 0x198   :  { %v6245_v10 = vpop.permute.xlu1 %472 }
 0x199   :  { %8834 = vst [vmem:[#allocation17_spill] sm:$0xff] %v6245_v10 }
 0x19a   :  { %2552 = vmatmul.bf16.gmra.mxu3 %v6210_v37 }
 0x19b   :  { %v1264_v59 = vpop.f32.mrf.mxu2 }
 0x19c   :  { %v1265_v48 = vadd.f32 %v1264_v59, %v8817_v24  ;;  %v944_v38 = vpop.f32.mrf.mxu0 }
 0x19d   :  { %v6217_v43 = vpop.f32.mrf.mxu1  ;;  %v945_v63 = vadd.f32 %v944_v38, %v8828_v20 }
 0x19e   :  { %v1438_v52 = vmax.f32 %v1265_v48, 0.0 }
 0x19f   :  { %983 = vmatmul.bf16.gmra.mxu0 %v6214_v17 }
 0x1a0   :  { %1152 = vmatmul.bf16.gmra.mxu1 %v6214_v17  ;;  %1306 = vmatmul.bf16.gmra.mxu2 %v6128_v0  ;;  %v6226_v30 = vpack.c.bf16 %v1438_v52, %v1435_v55  ;;  %v6239_v0 = vor.u32 %v5134_v33, %v4766_v53  ;;  %v8832_v55 = vld [vmem:[#allocation16_spill] sm:$0xff]  ;;  %v1457_v52 = vmax.f32 %v945_v63, 0.0  ;;  %v8837_v63 = vld [vmem:[#allocation25_spill] sm:$0xff] }
 0x1a1   :  { %v940_v38 = vadd.f32 %v939_v42, %v8832_v55  ;;  %v6251_v42 = vld [vmem:[#allocation6 + $0xc0] sm:$0xff] }
 0x1a2   :  { %8827 = vst [vmem:[#allocation46_spill] sm:$0xff] %v6226_v30  ;;  %v1454_v30 = vmax.f32 %v942_v44, 0.0 }
 0x1a3   :  { %v1267_v24 = vpop.f32.mrf.mxu2  ;;  %8831 = vst [vmem:[#allocation14_spill] sm:$0xff] %v6239_v0  ;;  %v1451_v33 = vmax.f32 %v940_v38, 0.0 }
 0x1a4   :  { %v946_v2 = vpop.f32.mrf.mxu0  ;;  %v1268_v4 = vadd.f32 %v1267_v24, %v8835_v19 }
 0x1a5   :  { %v947_v59 = vadd.f32 %v946_v2, %v8830_v15  ;;  %v6237_v48 = vpop.f32.mrf.mxu1  ;;  %v8836_v2 = vld [vmem:[#allocation18_spill] sm:$0xff] }
 0x1a6   :  { %v935_v53 = vadd.f32 %v6164_v34, %v8836_v2  ;;  %v1441_v24 = vmax.f32 %v1268_v4, 0.0 }
 0x1a7   :  { %v1460_v22 = vmax.f32 %v947_v59, 0.0 }
 0x1a8   :  { %v1445_v34 = vmax.f32 %v935_v53, 0.0  ;;  %v5138_v53 = vld [vmem:[%s8530_s3 + $0xec] sm:$0xf0] }
 0x1a9   :  { %v1604_v37 = vpack.c.bf16 %v1460_v22, %v1457_v52  ;;  %v932_v22 = vadd.f32 %v6149_v8, %v8837_v63  ;;  %v1601_v52 = vpack.c.bf16 %v1454_v30, %v1451_v33 }
 0x1aa   :  { %2557 = vmatmul.bf16.gmra.mxu3 %v6239_v0  ;;  %v930_v0 = vadd.f32 %v6131_v61, %v8835_v19  ;;  %v1598_v8 = vpack.c.bf16 %v1448_v50, %v1445_v34  ;;  %v4782_v61 = vld [vmem:[%s8530_s3 + $0xe0] sm:$0xf] }
 0x1ab   :  { %v1269_v18 = vpop.f32.mrf.mxu2  ;;  %2648 = vmatpush.bf16.msra.mxu3 %v1604_v37  ;;  %v1442_v37 = vmax.f32 %v932_v22, 0.0  ;;  %v6277_v50 = vor.u32 %v5138_v53, %v4782_v61  ;;  %v1116_v53 = vadd.f32 %v6237_v48, %v8830_v15 }
 0x1ac   :  { %v1270_v59 = vadd.f32 %v1269_v18, %v8837_v63  ;;  %v949_v41 = vpop.f32.mrf.mxu0  ;;  %v1439_v30 = vmax.f32 %v930_v0, 0.0 }
 0x1ad   :  { %v1118_v44 = vpop.f32.mrf.mxu1  ;;  %v950_v38 = vadd.f32 %v949_v41, %v6263_v58  ;;  %8839 = vst [vmem:[#allocation16_spill] sm:$0xff] %v6277_v50 }
 0x1ae   :  { %v1444_v12 = vmax.f32 %v1270_v59, 0.0  ;;  %v1595_v22 = vpack.c.bf16 %v1442_v37, %v1439_v30  ;;  %v6286_v37 = vld [vmem:[#allocation6 + $0xc8] sm:$0xff] }
 0x1af   :  { %988 = vmatmul.bf16.gmra.mxu0 %v6251_v42  ;;  %2649 = vmatpush.bf16.msra.mxu3 %v1601_v52  ;;  %v1463_v52 = vmax.f32 %v950_v38, 0.0 }
 0x1b0   :  { %1157 = vmatmul.bf16.gmra.mxu1 %v6251_v42  ;;  %1311 = vmatmul.bf16.gmra.mxu2 %v6161_v1  ;;  %v6261_v18 = vpack.c.bf16 %v1444_v12, %v1441_v24  ;;  %v6272_v1 = vpop.permute.xlu1 %387  ;;  %v1119_v12 = vadd.f32 %v1118_v44, %v6263_v58 }
 0x1b2   :  { %8838 = vst [vmem:[#allocation15_spill] sm:$0xff] %v6261_v18  ;;  %v1464_v34 = vmax.f32 %v1119_v12, 0.0 }
 0x1b3   :  { %v1272_v4 = vpop.f32.mrf.mxu2  ;;  %2650 = vmatpush.bf16.msra.mxu3 %v1598_v8 }
 0x1b4   :  { %v951_v33 = vpop.f32.mrf.mxu0  ;;  %v1273_v36 = vadd.f32 %v1272_v4, %v8836_v2 }
 0x1b5   :  { %v952_v59 = vadd.f32 %v951_v33, %v6272_v1  ;;  %v1120_v0 = vpop.f32.mrf.mxu1 }
 0x1b6   :  { %v1121_v41 = vadd.f32 %v1120_v0, %v6272_v1  ;;  %v1447_v12 = vmax.f32 %v1273_v36, 0.0  ;;  %v1111_v0 = vadd.f32 %v6206_v45, %v8829_v11  ;;  %v5142_v36 = vld [vmem:[%s8530_s3 + $0x10c] sm:$0xf0] }
 0x1b7   :  { %v1466_v24 = vmax.f32 %v952_v59, 0.0  ;;  %2651 = vmatpush.bf16.msra.mxu3 %v1595_v22  ;;  %v1461_v22 = vmax.f32 %v1116_v53, 0.0  ;;  %v1101_v53 = vadd.f32 %v6151_v23, %v8837_v63 }
 0x1b8   :  { %v1467_v8 = vmax.f32 %v1121_v41, 0.0  ;;  %v1455_v45 = vmax.f32 %v1111_v0, 0.0 }
 0x1b9   :  { %v6279_v18 = vpack.c.bf16 %v1466_v24, %v1463_v52  ;;  %v1443_v23 = vmax.f32 %v1101_v53, 0.0 }
 0x1ba   :  { %2562 = vmatmul.bf16.gmra.mxu3 %v6277_v50  ;;  %v6283_v44 = vpack.c.bf16 %v1467_v8, %v1464_v34 }
 0x1bb   :  { %v1274_v33 = vpop.f32.mrf.mxu2  ;;  %2652 = vmatpush.bf16.msra.mxu3 %v6122_v62  ;;  %v1114_v62 = vadd.f32 %v6217_v43, %v8828_v20 }
 0x1bc   :  { %v1275_v30 = vadd.f32 %v1274_v33, %v8833_v60  ;;  %v6289_v38 = vpop.f32.mrf.mxu0  ;;  %v1104_v33 = vadd.f32 %v6166_v7, %v8836_v2  ;;  %v1099_v7 = vadd.f32 %v6133_v6, %v8835_v19  ;;  %v4814_v6 = vld [vmem:[%s8530_s3 + $0x120] sm:$0xf] }
 0x1bd   :  { %v6291_v61 = vpop.f32.mrf.mxu1  ;;  %v1458_v43 = vmax.f32 %v1114_v62, 0.0  ;;  %v6329_v62 = vld [vmem:[#allocation6 + $0xd0] sm:$0xff] }
 0x1be   :  { %v1450_v4 = vmax.f32 %v1275_v30, 0.0 }
 0x1bf   :  { %993 = vmatmul.bf16.gmra.mxu0 %v6286_v37  ;;  %2653 = vmatpush.bf16.msra.mxu3 %v6088_v35  ;;  %v4798_v35 = vld [vmem:[%s8530_s3 + $0x100] sm:$0xf]  ;;  %v1605_v24 = vpack.c.bf16 %v1461_v22, %v1458_v43 }
 0x1c0   :  { %1162 = vmatmul.bf16.gmra.mxu1 %v6286_v37  ;;  %1316 = vmatmul.bf16.gmra.mxu2 %v6188_v39  ;;  %v6301_v59 = vpack.c.bf16 %v1450_v4, %v1447_v12  ;;  %v1109_v39 = vadd.f32 %v6193_v47, %v8832_v55  ;;  %v6318_v34 = vor.u32 %v5142_v36, %v4798_v35  ;;  %v5146_v35 = vld [vmem:[%s8530_s3 + $0x12c] sm:$0xf0] }
 0x1c2   :  { %8840 = vst [vmem:[#allocation19_spill] sm:$0xff] %v6301_v59  ;;  %v1452_v8 = vmax.f32 %v1109_v39, 0.0 }
 0x1c3   :  { %v1277_v48 = vpop.f32.mrf.mxu2  ;;  %2654 = vmatpush.bf16.msra.mxu3 %v6065_v28  ;;  %8841 = vst [vmem:[#allocation24_spill] sm:$0xff] %v6318_v34  ;;  %v1106_v28 = vadd.f32 %v6182_v25, %v8833_v60  ;;  %v1446_v60 = vmax.f32 %v1104_v33, 0.0 }
 0x1c4   :  { %v6314_v41 = vpop.f32.mrf.mxu0  ;;  %v1278_v47 = vadd.f32 %v1277_v48, %v8832_v55  ;;  %v1602_v30 = vpack.c.bf16 %v1455_v45, %v1452_v8  ;;  %v1440_v48 = vmax.f32 %v1099_v7, 0.0  ;;  %v6362_v8 = vld [vmem:[#allocation6 + $0xd8] sm:$0xff] }
 0x1c5   :  { %v6316_v52 = vpop.f32.mrf.mxu1  ;;  %v1449_v12 = vmax.f32 %v1106_v28, 0.0 }
 0x1c6   :  { %v1453_v0 = vmax.f32 %v1278_v47, 0.0  ;;  %v1596_v36 = vpack.c.bf16 %v1443_v23, %v1440_v48 }
 0x1c7   :  { %2655 = vmatpush.bf16.msra.mxu3 %v6035_v5  ;;  %v1599_v63 = vpack.c.bf16 %v1449_v12, %v1446_v60 }
 0x1ca   :  { %2567 = vmatmul.bf16.gmra.mxu3 %v6318_v34 }
 0x1cb   :  { %3164 = vmatpush.bf16.msrb.mxu3 %v1605_v24  ;;  %v1279_v4 = vpop.f32.mrf.mxu2 }
 0x1cc   :  { %v1280_v25 = vadd.f32 %v1279_v4, %v8829_v11  ;;  %v6332_v5 = vpop.f32.mrf.mxu0 }
 0x1cd   :  { %v6336_v55 = vpop.f32.mrf.mxu1  ;;  %v6338_v2 = vpop.f32.mrf.mxu3 }
 0x1ce   :  { %8842 = vst [vmem:[#allocation18_spill] sm:$0xff] %v6338_v2  ;;  %v1456_v22 = vmax.f32 %v1280_v25, 0.0 }
 0x1cf   :  { %3165 = vmatpush.bf16.msrb.mxu3 %v1602_v30  ;;  %998 = vmatmul.bf16.gmra.mxu0 %v6329_v62 }
 0x1d0   :  { %1167 = vmatmul.bf16.gmra.mxu1 %v6329_v62  ;;  %1321 = vmatmul.bf16.gmra.mxu2 %v6214_v17  ;;  %v6343_v11 = vpack.c.bf16 %v1456_v22, %v1453_v0  ;;  %v6357_v17 = vor.u32 %v5146_v35, %v4814_v6  ;;  %v6395_v22 = vld [vmem:[#allocation6 + $0xe0] sm:$0xff] }
 0x1d2   :  { %8843 = vst [vmem:[#allocation25_spill] sm:$0xff] %v6343_v11 }
 0x1d3   :  { %3166 = vmatpush.bf16.msrb.mxu3 %v1599_v63  ;;  %v1282_v19 = vpop.f32.mrf.mxu2  ;;  %8845 = vst [vmem:[#allocation48_spill] sm:$0xff] %v6357_v17 }
 0x1d4   :  { %v6351_v39 = vpop.f32.mrf.mxu0  ;;  %v1283_v24 = vadd.f32 %v1282_v19, %v8828_v20 }
 0x1d5   :  { %v6353_v43 = vpop.f32.mrf.mxu1  ;;  %v6355_v45 = vpop.f32.mrf.mxu3 }
 0x1d6   :  { %8844 = vst [vmem:[#allocation47_spill] sm:$0xff] %v6355_v45  ;;  %v1459_v12 = vmax.f32 %v1283_v24, 0.0  ;;  %v5154_v24 = vld [vmem:[%s8530_s3 + $0x16c] sm:$0xf0] }
 0x1d7   :  { %3167 = vmatpush.bf16.msrb.mxu3 %v1596_v36 }
 0x1da   :  { %2572 = vmatmul.bf16.gmra.mxu3 %v6357_v17 }
 0x1db   :  { %3168 = vmatpush.bf16.msrb.mxu3 %v6126_v9  ;;  %v1284_v28 = vpop.f32.mrf.mxu2 }
 0x1dc   :  { %v1285_v33 = vadd.f32 %v1284_v28, %v8830_v15  ;;  %v6365_v47 = vpop.f32.mrf.mxu0  ;;  %v4830_v15 = vld [vmem:[%s8530_s3 + $0x140] sm:$0xf] }
 0x1dd   :  { %v6367_v30 = vpop.f32.mrf.mxu1  ;;  %v6369_v53 = vpop.f32.mrf.mxu3 }
 0x1de   :  { %8846 = vst [vmem:[#allocation49_spill] sm:$0xff] %v6369_v53  ;;  %v1462_v4 = vmax.f32 %v1285_v33, 0.0 }
 0x1df   :  { %3169 = vmatpush.bf16.msrb.mxu3 %v6092_v46  ;;  %1003 = vmatmul.bf16.gmra.mxu0 %v6362_v8  ;;  %v5150_v46 = vld [vmem:[%s8530_s3 + $0x14c] sm:$0xf0] }
 0x1e0   :  { %v6373_v9 = vpack.c.bf16 %v1462_v4, %v1459_v12  ;;  %1172 = vmatmul.bf16.gmra.mxu1 %v6362_v8  ;;  %1326 = vmatmul.bf16.gmra.mxu2 %v6251_v42  ;;  %v6391_v42 = vor.u32 %v5150_v46, %v4830_v15 }
 0x1e2   :  { %8847 = vst [vmem:[#allocation50_spill] sm:$0xff] %v6373_v9 }
 0x1e3   :  { %3170 = vmatpush.bf16.msrb.mxu3 %v6069_v29  ;;  %v1287_v20 = vpop.f32.mrf.mxu2  ;;  %8849 = vst [vmem:[#allocation52_spill] sm:$0xff] %v6391_v42 }
 0x1e4   :  { %v6384_v25 = vpop.f32.mrf.mxu0  ;;  %v1288_v29 = vadd.f32 %v1287_v20, %v6263_v58 }
 0x1e5   :  { %v6386_v7 = vpop.f32.mrf.mxu1  ;;  %v6388_v60 = vpop.f32.mrf.mxu3 }
 0x1e6   :  { %8848 = vst [vmem:[#allocation51_spill] sm:$0xff] %v6388_v60  ;;  %v1465_v6 = vmax.f32 %v1288_v29, 0.0 }
 0x1e7   :  { %3171 = vmatpush.bf16.msrb.mxu3 %v6037_v26  ;;  %v6404_v26 = vpop.permute.xlu2 %407 }
 0x1ea   :  { %2577 = vmatmul.bf16.gmra.mxu3 %v6391_v42 }
 0x1eb   :  { %v1289_v0 = vpop.f32.mrf.mxu2 }
 0x1ec   :  { %v1290_v23 = vadd.f32 %v1289_v0, %v6272_v1  ;;  %v6398_v63 = vpop.f32.mrf.mxu0  ;;  %v4846_v1 = vld [vmem:[%s8530_s3 + $0x160] sm:$0xf] }
 0x1ed   :  { %v6400_v48 = vpop.f32.mrf.mxu1  ;;  %v6402_v19 = vpop.f32.mrf.mxu3  ;;  %v6423_v4 = vor.u32 %v5154_v24, %v4846_v1 }
 0x1ee   :  { %8850 = vst [vmem:[#allocation53_spill] sm:$0xff] %v6402_v19  ;;  %v1468_v35 = vmax.f32 %v1290_v23, 0.0 }
 0x1ef   :  { %1008 = vmatmul.bf16.gmra.mxu0 %v6395_v22  ;;  %8853 = vst [vmem:[#allocation56_spill] sm:$0xff] %v6423_v4 }
 0x1f0   :  { %1177 = vmatmul.bf16.gmra.mxu1 %v6395_v22  ;;  %1331 = vmatmul.bf16.gmra.mxu2 %v6286_v37  ;;  %v6409_v58 = vpack.c.bf16 %v1468_v35, %v1465_v6  ;;  %v6425_v37 = vpop.permute.xlu2 %392 }
 0x1f2   :  { %8851 = vst [vmem:[#allocation54_spill] sm:$0xff] %v6409_v58 }
 0x1f3   :  { %v1292_v36 = vpop.f32.mrf.mxu2 }
 0x1f4   :  { %v6417_v28 = vpop.f32.mrf.mxu0  ;;  %v1293_v20 = vadd.f32 %v1292_v36, %v6425_v37  ;;  %v4862_v36 = vld [vmem:[%s8530_s3 + $0x180] sm:$0xf] }
 0x1f5   :  { %v6419_v33 = vpop.f32.mrf.mxu1  ;;  %v6421_v12 = vpop.f32.mrf.mxu3 }
 0x1f6   :  { %8852 = vst [vmem:[#allocation55_spill] sm:$0xff] %v6421_v12  ;;  %v1471_v6 = vmax.f32 %v1293_v20, 0.0 }
 0x1fa   :  { %2582 = vmatmul.bf16.gmra.mxu3 %v6423_v4 }
 0x1fb   :  { %v1294_v15 = vpop.f32.mrf.mxu2 }
 0x1fc   :  { %v1295_v46 = vadd.f32 %v1294_v15, %v6242_v13  ;;  %v974_v29 = vpop.f32.mrf.mxu0  ;;  %v5158_v15 = vld [vmem:[%s8530_s3 + $0x18c] sm:$0xf0] }
 0x1fd   :  { %v6430_v0 = vpop.f32.mrf.mxu1  ;;  %v6432_v23 = vpop.f32.mrf.mxu3  ;;  %v6447_v20 = vor.u32 %v5158_v15, %v4862_v36  ;;  %v5162_v15 = vld [vmem:[%s8530_s3 + $0x1ac] sm:$0xf0]  ;;  %v975_v56 = vadd.f32 %v974_v29, %v8870_v49  ;;  %v967_v29 = vadd.f32 %v6384_v25, %v5974_v57 }
 0x1fe   :  { %8854 = vst [vmem:[#allocation57_spill] sm:$0xff] %v6432_v23  ;;  %v1474_v35 = vmax.f32 %v1295_v46, 0.0 }
 0x1ff   :  { %8857 = vst [vmem:[#allocation60_spill] sm:$0xff] %v6447_v20 }
 0x200   :  { %1336 = vmatmul.bf16.gmra.mxu2 %v6329_v62  ;;  %v6435_v1 = vpack.c.bf16 %v1474_v35, %v1471_v6 }
 0x202   :  { %8855 = vst [vmem:[#allocation58_spill] sm:$0xff] %v6435_v1  ;;  %v8869_v1 = vld [vmem:[#allocation33_spill] sm:$0xff] }
 0x203   :  { %v1297_v24 = vpop.f32.mrf.mxu2 }
 0x204   :  { %v976_v12 = vpop.f32.mrf.mxu0  ;;  %v1298_v62 = vadd.f32 %v1297_v24, %v6208_v54  ;;  %v4878_v24 = vld [vmem:[%s8530_s3 + $0x1a0] sm:$0xf] }
 0x205   :  { %v6443_v19 = vpop.f32.mrf.mxu1  ;;  %v6445_v60 = vpop.f32.mrf.mxu3  ;;  %v977_v14 = vadd.f32 %v976_v12, %v8869_v1  ;;  %v5231_v12 = vld [vmem:[#allocation6 + $0xe8] sm:$0xff] }
 0x206   :  { %8856 = vst [vmem:[#allocation59_spill] sm:$0xff] %v6445_v60  ;;  %v1477_v45 = vmax.f32 %v1298_v62, 0.0  ;;  %v6469_v62 = vor.u32 %v5162_v15, %v4878_v24  ;;  %v8864_v24 = vld [vmem:[#allocation20_spill] sm:$0xff] }
 0x208   :  { %8861 = vst [vmem:[#allocation64_spill] sm:$0xff] %v6469_v62 }
 0x20a   :  { %2587 = vmatmul.bf16.gmra.mxu3 %v6447_v20 }
 0x20b   :  { %v1299_v46 = vpop.f32.mrf.mxu2 }
 0x20c   :  { %v1300_v6 = vadd.f32 %v1299_v46, %v6404_v26  ;;  %v979_v35 = vpop.f32.mrf.mxu0 }
 0x20d   :  { %v6452_v23 = vpop.f32.mrf.mxu1  ;;  %v6454_v53 = vpop.f32.mrf.mxu3 }
 0x20e   :  { %8858 = vst [vmem:[#allocation61_spill] sm:$0xff] %v6454_v53  ;;  %v1480_v2 = vmax.f32 %v1300_v6, 0.0 }
 0x210   :  { %1341 = vmatmul.bf16.gmra.mxu2 %v6362_v8  ;;  %v6457_v4 = vpack.c.bf16 %v1480_v2, %v1477_v45 }
 0x212   :  { %8859 = vst [vmem:[#allocation62_spill] sm:$0xff] %v6457_v4 }
 0x213   :  { %v1302_v36 = vpop.f32.mrf.mxu2 }
 0x214   :  { %v981_v46 = vpop.f32.mrf.mxu0  ;;  %v1303_v8 = vadd.f32 %v1302_v36, %v6174_v40  ;;  %v4894_v36 = vld [vmem:[%s8530_s3 + $0x1c0] sm:$0xf] }
 0x215   :  { %v6465_v60 = vpop.f32.mrf.mxu1  ;;  %v6467_v20 = vpop.f32.mrf.mxu3 }
 0x216   :  { %8860 = vst [vmem:[#allocation63_spill] sm:$0xff] %v6467_v20  ;;  %v1483_v17 = vmax.f32 %v1303_v8, 0.0 }
 0x21a   :  { %2592 = vmatmul.bf16.gmra.mxu3 %v6469_v62 }
 0x21b   :  { %v1304_v2 = vpop.f32.mrf.mxu2 }
 0x21c   :  { %v1305_v45 = vadd.f32 %v1304_v2, %v5974_v57  ;;  %v984_v6 = vpop.f32.mrf.mxu0  ;;  %v5166_v2 = vld [vmem:[%s8530_s3 + $0x1cc] sm:$0xf0] }
 0x21d   :  { %v6474_v53 = vpop.f32.mrf.mxu1  ;;  %v6476_v42 = vpop.f32.mrf.mxu3  ;;  %v985_v15 = vadd.f32 %v984_v6, %v8864_v24 }
 0x21e   :  { %8862 = vst [vmem:[#allocation65_spill] sm:$0xff] %v6476_v42  ;;  %v1486_v34 = vmax.f32 %v1305_v45, 0.0  ;;  %v8865_v42 = vld [vmem:[#allocation27_spill] sm:$0xff]  ;;  %v8866_v45 = vld [vmem:[#allocation21_spill] sm:$0xff] }
 0x21f   :  { %v982_v8 = vadd.f32 %v981_v46, %v8865_v42  ;;  %v1505_v11 = vmax.f32 %v985_v15, 0.0  ;;  %v1496_v15 = vmax.f32 %v977_v14, 0.0  ;;  %v965_v14 = vadd.f32 %v6365_v47, %v6174_v40 }
 0x220   :  { %1346 = vmatmul.bf16.gmra.mxu2 %v6395_v22  ;;  %v6479_v59 = vpack.c.bf16 %v1486_v34, %v1483_v17  ;;  %v6494_v34 = vor.u32 %v5166_v2, %v4894_v36  ;;  %v8868_v17 = vld [vmem:[#allocation26_spill] sm:$0xff] }
 0x221   :  { %v980_v6 = vadd.f32 %v979_v35, %v8868_v17  ;;  %v1502_v10 = vmax.f32 %v982_v8, 0.0  ;;  %v972_v35 = vadd.f32 %v6417_v28, %v5926_v27 }
 0x222   :  { %8863 = vst [vmem:[#allocation66_spill] sm:$0xff] %v6479_v59 }
 0x223   :  { %v6482_v20 = vpop.f32.mrf.mxu2  ;;  %8867 = vst [vmem:[#allocation20_spill] sm:$0xff] %v6494_v34  ;;  %v1499_v46 = vmax.f32 %v980_v6, 0.0 }
 0x224   :  { %v986_v62 = vpop.f32.mrf.mxu0 }
 0x225   :  { %v987_v50 = vadd.f32 %v986_v62, %v8866_v45  ;;  %v6492_v22 = vpop.f32.mrf.mxu3  ;;  %v1155_v58 = vpop.f32.mrf.mxu1  ;;  %v1625_v36 = vpack.c.bf16 %v1502_v10, %v1499_v46  ;;  %v5170_v10 = vld [vmem:[%s8530_s3 + $0x1ec] sm:$0xf0]  ;;  %v1484_v46 = vmax.f32 %v967_v29, 0.0 }
 0x227   :  { %v1508_v9 = vmax.f32 %v987_v50, 0.0 }
 0x229   :  { %v1628_v4 = vpack.c.bf16 %v1508_v9, %v1505_v11  ;;  %v970_v11 = vadd.f32 %v6398_v63, %v6135_v3  ;;  %v1493_v9 = vmax.f32 %v975_v56, 0.0  ;;  %v4910_v56 = vld [vmem:[%s8530_s3 + $0x1e0] sm:$0xf]  ;;  %v962_v63 = vadd.f32 %v6351_v39, %v6404_v26 }
 0x22a   :  { %2597 = vmatmul.bf16.gmra.mxu3 %v6494_v34  ;;  %v955_v39 = vadd.f32 %v6289_v38, %v6425_v37  ;;  %v5232_v38 = vld [vmem:[#allocation6 + $0xf0] sm:$0xff] }
 0x22b   :  { %v6500_v59 = vpop.f32.mrf.mxu2  ;;  %2777 = vmatpush.bf16.msrb.mxu0 %v1628_v4  ;;  %v1490_v4 = vmax.f32 %v972_v35, 0.0  ;;  %v1622_v8 = vpack.c.bf16 %v1496_v15, %v1493_v9  ;;  %v1487_v28 = vmax.f32 %v970_v11, 0.0  ;;  %v6530_v15 = vor.u32 %v5170_v10, %v4910_v56 }
 0x22c   :  { %v6502_v62 = vpop.f32.mrf.mxu0  ;;  %v1481_v11 = vmax.f32 %v965_v14, 0.0  ;;  %v957_v9 = vadd.f32 %v6314_v41, %v6242_v13  ;;  %v1156_v41 = vadd.f32 %v1155_v58, %v8866_v45  ;;  %v1469_v10 = vmax.f32 %v955_v39, 0.0  ;;  %v5174_v58 = vld [vmem:[%s8530_s3 + $0x20c] sm:$0xf0] }
 0x22d   :  { %v6506_v50 = vpop.f32.mrf.mxu3  ;;  %v6512_v2 = vpop.f32.mrf.mxu1  ;;  %v1619_v47 = vpack.c.bf16 %v1490_v4, %v1487_v28  ;;  %8872 = vst [vmem:[#allocation21_spill] sm:$0xff] %v6530_v15 }
 0x22f   :  { %2778 = vmatpush.bf16.msrb.mxu0 %v1625_v36  ;;  %v960_v36 = vadd.f32 %v6332_v5, %v6208_v54  ;;  %v1472_v5 = vmax.f32 %v957_v9, 0.0  ;;  %v4926_v9 = vld [vmem:[%s8530_s3 + $0x200] sm:$0xf] }
 0x230   :  { %1351 = vmatmul.bf16.gmra.mxu2 %v5231_v12  ;;  %v1478_v12 = vmax.f32 %v962_v63, 0.0  ;;  %v1154_v63 = vadd.f32 %v6474_v53, %v8864_v24  ;;  %v1149_v53 = vadd.f32 %v6452_v23, %v8868_v17 }
 0x231   :  { %v1475_v29 = vmax.f32 %v960_v36, 0.0  ;;  %v1509_v36 = vmax.f32 %v1156_v41, 0.0  ;;  %v6570_v41 = vor.u32 %v5174_v58, %v4926_v9 }
 0x232   :  { %v1500_v23 = vmax.f32 %v1149_v53, 0.0 }
 0x233   :  { %v6516_v6 = vpop.f32.mrf.mxu2  ;;  %2779 = vmatpush.bf16.msrb.mxu0 %v1622_v8  ;;  %v1616_v8 = vpack.c.bf16 %v1484_v46, %v1481_v11  ;;  %v1613_v56 = vpack.c.bf16 %v1478_v12, %v1475_v29  ;;  %v1610_v46 = vpack.c.bf16 %v1472_v5, %v1469_v10  ;;  %v1506_v12 = vmax.f32 %v1154_v63, 0.0  ;;  %8873 = vst [vmem:[#allocation26_spill] sm:$0xff] %v6570_v41  ;;  %v4678_v63 = vld [vmem:[%s8530_s3 + $0x8] sm:$0xf] }
 0x234   :  { %v6524_v25 = vpop.f32.mrf.mxu0  ;;  %v1146_v29 = vadd.f32 %v6443_v19, %v8869_v1  ;;  %v1144_v10 = vadd.f32 %v6430_v0, %v8870_v49 }
 0x235   :  { %v6528_v35 = vpop.f32.mrf.mxu3 }
 0x236   :  { %8871 = vst [vmem:[#allocation27_spill] sm:$0xff] %v6528_v35  ;;  %v6539_v35 = vpop.f32.mrf.mxu1  ;;  %v1494_v9 = vmax.f32 %v1144_v10, 0.0 }
 0x237   :  { %2780 = vmatpush.bf16.msrb.mxu0 %v1619_v47  ;;  %v1151_v47 = vadd.f32 %v6465_v60, %v8865_v42 }
 0x239   :  { %v1503_v5 = vmax.f32 %v1151_v47, 0.0  ;;  %v1497_v47 = vmax.f32 %v1146_v29, 0.0 }
 0x23a   :  { %2602 = vmatmul.bf16.gmra.mxu3 %v6530_v15 }
 0x23b   :  { %v6541_v4 = vpop.f32.mrf.mxu2  ;;  %2781 = vmatpush.bf16.msrb.mxu0 %v1616_v8  ;;  %v1623_v29 = vpack.c.bf16 %v1497_v47, %v1494_v9 }
 0x23c   :  { %v6543_v28 = vpop.f32.mrf.mxu0 }
 0x23d   :  { %v6545_v14 = vpop.f32.mrf.mxu3 }
 0x23e   :  { %v6564_v39 = vpop.f32.mrf.mxu1 }
 0x23f   :  { %2782 = vmatpush.bf16.msrb.mxu0 %v1613_v56  ;;  %v1629_v56 = vpack.c.bf16 %v1509_v36, %v1506_v12  ;;  %v1139_v36 = vadd.f32 %v6400_v48, %v6135_v3  ;;  %v1136_v12 = vadd.f32 %v6386_v7, %v5974_v57  ;;  %v1131_v48 = vadd.f32 %v6353_v43, %v6404_v26  ;;  %v4942_v57 = vld [vmem:[%s8530_s3 + $0x220] sm:$0xf]  ;;  %v5178_v7 = vld [vmem:[%s8530_s3 + $0x22c] sm:$0xf0] }
 0x240   :  { %1356 = vmatmul.bf16.gmra.mxu2 %v5232_v38  ;;  %v5111_v38 = vld [vmem:[%s8530_s3 + $0x14] sm:$0xf0]  ;;  %v1126_v43 = vadd.f32 %v6316_v52, %v6242_v13  ;;  %v6615_v9 = vor.u32 %v5178_v7, %v4942_v57 }
 0x241   :  { %v6581_v19 = vor.u32 %v5111_v38, %v4678_v63  ;;  %v5233_v63 = vld [vmem:[#allocation6 + $0xf8] sm:$0xff]  ;;  %v1485_v10 = vmax.f32 %v1136_v12, 0.0  ;;  %v1479_v26 = vmax.f32 %v1131_v48, 0.0  ;;  %v1124_v12 = vadd.f32 %v6291_v61, %v6425_v37  ;;  %v6626_v61 = vpop.permute.xlu2 %477 }
 0x242   :  { %8875 = vst [vmem:[#allocation32_spill] sm:$0xff] %v6615_v9 }
 0x243   :  { %v6552_v11 = vpop.f32.mrf.mxu2  ;;  %2783 = vmatpush.bf16.msrb.mxu0 %v1610_v46  ;;  %8874 = vst [vmem:[#allocation33_spill] sm:$0xff] %v6581_v19  ;;  %v1141_v46 = vadd.f32 %v6419_v33, %v5926_v27 }
 0x244   :  { %v6562_v8 = vpop.f32.mrf.mxu0  ;;  %v1318_v57 = vadd.f32 %v6552_v11, %v8868_v17  ;;  %v1313_v17 = vadd.f32 %v6516_v6, %v8870_v49  ;;  %v6657_v6 = vpop.permute.xlu0 %467 }
 0x245   :  { %v6566_v60 = vpop.f32.mrf.mxu3  ;;  %v1491_v33 = vmax.f32 %v1141_v46, 0.0 }
 0x247   :  { %2784 = vmatpush.bf16.msrb.mxu0 %v6279_v18  ;;  %v1626_v18 = vpack.c.bf16 %v1503_v5, %v1500_v23  ;;  %v1134_v5 = vadd.f32 %v6367_v30, %v6174_v40  ;;  %v1488_v23 = vmax.f32 %v1139_v36, 0.0  ;;  %v1129_v40 = vadd.f32 %v6336_v55, %v6208_v54 }
 0x248   :  { %v1473_v54 = vmax.f32 %v1126_v43, 0.0 }
 0x249   :  { %v1620_v38 = vpack.c.bf16 %v1491_v33, %v1488_v23  ;;  %v1482_v30 = vmax.f32 %v1134_v5, 0.0  ;;  %v1476_v33 = vmax.f32 %v1129_v40, 0.0  ;;  %v1470_v23 = vmax.f32 %v1124_v12, 0.0 }
 0x24a   :  { %2607 = vmatmul.bf16.gmra.mxu3 %v6570_v41  ;;  %2785 = vmatmul.bf16.vlgmr.msrb.gmra.mxu0 %v6581_v19 }
 0x24b   :  { %3293 = vmatpush.bf16.msra.mxu0 %v1629_v56  ;;  %v1319_v0 = vpop.f32.mrf.mxu2  ;;  %v6595_v56 = vpop.f32.mrf.mxu1  ;;  %v1617_v36 = vpack.c.bf16 %v1485_v10, %v1482_v30  ;;  %v1614_v55 = vpack.c.bf16 %v1479_v26, %v1476_v33  ;;  %v1611_v10 = vpack.c.bf16 %v1473_v54, %v1470_v23  ;;  %v1310_v26 = vadd.f32 %v6500_v59, %v5926_v27 }
 0x24c   :  { %v6589_v58 = vpop.f32.mrf.mxu0  ;;  %v1320_v37 = vadd.f32 %v1319_v0, %v8865_v42  ;;  %v4958_v42 = vld [vmem:[%s8530_s3 + $0x240] sm:$0xf]  ;;  %v5182_v0 = vld [vmem:[%s8530_s3 + $0x24c] sm:$0xf0]  ;;  %v6651_v33 = vpop.permute.xlu2 %462  ;;  %v1308_v54 = vadd.f32 %v6482_v20, %v6135_v3 }
 0x24d   :  { %v6591_v53 = vpop.f32.mrf.mxu3  ;;  %v6647_v11 = vor.u32 %v5182_v0, %v4958_v42 }
 0x24e   :  { %v1504_v40 = vmax.f32 %v1320_v37, 0.0 }
 0x24f   :  { %3294 = vmatpush.bf16.msra.mxu0 %v1626_v18  ;;  %8876 = vst [vmem:[#allocation67_spill] sm:$0xff] %v6647_v11 }
 0x250   :  { %1361 = vmatmul.bf16.gmra.mxu2 %v5233_v63 }
 0x253   :  { %3295 = vmatpush.bf16.msra.mxu0 %v1623_v29  ;;  %v1322_v18 = vpop.f32.mrf.mxu2  ;;  %v6619_v29 = vpop.f32.mrf.mxu1 }
 0x254   :  { %v6609_v46 = vpop.f32.mrf.mxu0  ;;  %v1323_v52 = vadd.f32 %v1322_v18, %v8864_v24 }
 0x255   :  { %v6611_v47 = vpop.f32.mrf.mxu3 }
 0x256   :  { %v1507_v7 = vmax.f32 %v1323_v52, 0.0 }
 0x257   :  { %3296 = vmatpush.bf16.msra.mxu0 %v1620_v38 }
 0x25a   :  { %2612 = vmatmul.bf16.gmra.mxu3 %v6615_v9 }
 0x25b   :  { %3297 = vmatpush.bf16.msra.mxu0 %v1617_v36  ;;  %v1324_v5 = vpop.f32.mrf.mxu2  ;;  %v6634_v24 = vpop.f32.mrf.mxu1 }
 0x25c   :  { %v1325_v63 = vadd.f32 %v1324_v5, %v8866_v45  ;;  %v1004_v13 = vpop.f32.mrf.mxu0  ;;  %v1315_v45 = vadd.f32 %v6541_v4, %v8869_v1  ;;  %v1501_v1 = vmax.f32 %v1318_v57, 0.0 }
 0x25d   :  { %v6624_v48 = vpop.f32.mrf.mxu3 }
 0x25e   :  { %v1510_v38 = vmax.f32 %v1325_v63, 0.0  ;;  %v1498_v36 = vmax.f32 %v1315_v45, 0.0  ;;  %v1627_v12 = vpack.c.bf16 %v1504_v40, %v1501_v1  ;;  %v1489_v63 = vmax.f32 %v1308_v54, 0.0  ;;  %v4974_v45 = vld [vmem:[%s8530_s3 + $0x260] sm:$0xf] }
 0x25f   :  { %3298 = vmatpush.bf16.msra.mxu0 %v1614_v55  ;;  %v1492_v55 = vmax.f32 %v1310_v26, 0.0  ;;  %v5186_v40 = vld [vmem:[%s8530_s3 + $0x26c] sm:$0xf0]  ;;  %v8879_v26 = vld [vmem:[#allocation37_spill] sm:$0xff] }
 0x260   :  { %3043 = vmatmul.bf16.vlgmr.msra.gmra.mxu2 %v6062_v21  ;;  %v1630_v18 = vpack.c.bf16 %v1510_v38, %v1507_v7  ;;  %v6679_v1 = vor.u32 %v5186_v40, %v4974_v45  ;;  %v8884_v40 = vld [vmem:[#allocation58_spill] sm:$0xff] }
 0x261   :  { %v1621_v37 = vpack.c.bf16 %v1492_v55, %v1489_v63  ;;  %v8883_v63 = vld [vmem:[#allocation44_spill] sm:$0xff] }
 0x263   :  { %3299 = vmatpush.bf16.msra.mxu0 %v1611_v10  ;;  %v1327_v30 = vpop.f32.mrf.mxu2  ;;  %v6660_v52 = vpop.f32.mrf.mxu1 }
 0x264   :  { %v1006_v43 = vpop.f32.mrf.mxu0  ;;  %v1328_v49 = vadd.f32 %v1327_v30, %v6651_v33 }
 0x265   :  { %v6645_v4 = vpop.f32.mrf.mxu3  ;;  %v1007_v30 = vadd.f32 %v1006_v43, %v6190_v31 }
 0x266   :  { %v1513_v3 = vmax.f32 %v1328_v49, 0.0  ;;  %v8880_v49 = vld [vmem:[#allocation45_spill] sm:$0xff] }
 0x267   :  { %3300 = vmatpush.bf16.msra.mxu0 %v6283_v44  ;;  %v1495_v44 = vmax.f32 %v1313_v17, 0.0  ;;  %v8877_v17 = vld [vmem:[#allocation66_spill] sm:$0xff]  ;;  %v1002_v55 = vadd.f32 %v6609_v46, %v8880_v49 }
 0x268   :  { %8878 = vst [vmem:[#allocation66_spill] sm:$0xff] %v6679_v1 }
 0x269   :  { %v1624_v23 = vpack.c.bf16 %v1498_v36, %v1495_v44  ;;  %v1005_v36 = vadd.f32 %v1004_v13, %v8879_v26  ;;  %v1526_v46 = vmax.f32 %v1002_v55, 0.0  ;;  %v8886_v55 = vld [vmem:[#allocation54_spill] sm:$0xff] }
 0x26a   :  { %2617 = vmatmul.bf16.gmra.mxu3 %v6647_v11 }
 0x26b   :  { %3809 = vmatpush.bf16.msrb.mxu0 %v1630_v18  ;;  %v1329_v5 = vpop.f32.mrf.mxu2 }
 0x26c   :  { %v1330_v27 = vadd.f32 %v1329_v5, %v6657_v6  ;;  %v1009_v59 = vpop.f32.mrf.mxu0  ;;  %v1532_v5 = vmax.f32 %v1007_v30, 0.0 }
 0x26d   :  { %v6662_v10 = vpop.f32.mrf.mxu3  ;;  %v1010_v57 = vadd.f32 %v1009_v59, %v5928_v51 }
 0x26e   :  { %v1516_v20 = vmax.f32 %v1330_v27, 0.0  ;;  %v8882_v27 = vld [vmem:[#allocation17_spill] sm:$0xff] }
 0x26f   :  { %3810 = vmatpush.bf16.msrb.mxu0 %v1627_v12  ;;  %v6682_v12 = vpop.f32.mrf.mxu1  ;;  %v1535_v54 = vmax.f32 %v1010_v57, 0.0  ;;  %v997_v57 = vadd.f32 %v6562_v8, %v6626_v61  ;;  %v992_v8 = vadd.f32 %v6524_v25, %v6657_v6 }
 0x270   :  { %3048 = vmatmul.bf16.gmra.mxu2 %v6086_v16  ;;  %v6665_v38 = vpack.c.bf16 %v1516_v20, %v1513_v3  ;;  %v1000_v3 = vadd.f32 %v6589_v58, %v8883_v63  ;;  %v1529_v20 = vmax.f32 %v1005_v36, 0.0 }
 0x271   :  { %v1514_v25 = vmax.f32 %v992_v8, 0.0 }
 0x272   :  { %v1523_v58 = vmax.f32 %v1000_v3, 0.0  ;;  %v5190_v3 = vld [vmem:[%s8530_s3 + $0x28c] sm:$0xf0] }
 0x273   :  { %3811 = vmatpush.bf16.msrb.mxu0 %v1624_v23  ;;  %v1332_v7 = vpop.f32.mrf.mxu2  ;;  %v8881_v23 = vld [vmem:[#allocation62_spill] sm:$0xff] }
 0x274   :  { %v1011_v18 = vpop.f32.mrf.mxu0  ;;  %v1333_v59 = vadd.f32 %v1332_v7, %v8882_v27 }
 0x275   :  { %v1012_v42 = vadd.f32 %v1011_v18, %v6156_v32  ;;  %v6676_v0 = vpop.f32.mrf.mxu3  ;;  %v1640_v18 = vpack.c.bf16 %v1532_v5, %v1529_v20  ;;  %v990_v5 = vadd.f32 %v6502_v62, %v6651_v33  ;;  %v8888_v62 = vld [vmem:[#allocation34_spill] sm:$0xff] }
 0x276   :  { %v1519_v7 = vmax.f32 %v1333_v59, 0.0 }
 0x277   :  { %3812 = vmatpush.bf16.msrb.mxu0 %v1621_v37  ;;  %v1538_v44 = vmax.f32 %v1012_v42, 0.0  ;;  %v995_v42 = vadd.f32 %v6543_v28, %v8882_v27  ;;  %v4990_v28 = vld [vmem:[%s8530_s3 + $0x280] sm:$0xf] }
 0x279   :  { %v1643_v43 = vpack.c.bf16 %v1538_v44, %v1535_v54  ;;  %v1520_v54 = vmax.f32 %v997_v57, 0.0  ;;  %v1178_v44 = vpop.f32.mrf.mxu1  ;;  %v1511_v57 = vmax.f32 %v990_v5, 0.0 }
 0x27a   :  { %2622 = vmatmul.bf16.gmra.mxu3 %v6679_v1 }
 0x27b   :  { %3813 = vmatpush.bf16.msrb.mxu0 %v8877_v17  ;;  %v1334_v13 = vpop.f32.mrf.mxu2  ;;  %2909 = vmatpush.bf16.msrb.mxu1 %v1643_v43  ;;  %v8885_v17 = vld [vmem:[#allocation31_spill] sm:$0xff]  ;;  %v1517_v43 = vmax.f32 %v995_v42, 0.0 }
 0x27c   :  { %v1335_v37 = vadd.f32 %v1334_v13, %v6626_v61 }
 0x27d   :  { %v6694_v45 = vpop.f32.mrf.mxu3  ;;  %v1634_v13 = vpack.c.bf16 %v1520_v54, %v1517_v43 }
 0x27e   :  { %v1522_v30 = vmax.f32 %v1335_v37, 0.0  ;;  %v6715_v37 = vor.u32 %v5190_v3, %v4990_v28 }
 0x27f   :  { %3814 = vmatpush.bf16.msrb.mxu0 %v8881_v23  ;;  %2910 = vmatpush.bf16.msrb.mxu1 %v1640_v18  ;;  %v1637_v23 = vpack.c.bf16 %v1526_v46, %v1523_v58  ;;  %v8889_v46 = vld [vmem:[#allocation12_spill] sm:$0xff]  ;;  %v1631_v18 = vpack.c.bf16 %v1514_v25, %v1511_v57  ;;  %v1179_v57 = vadd.f32 %v1178_v44, %v5928_v51 }
 0x280   :  { %3053 = vmatmul.bf16.gmra.mxu2 %v8885_v17  ;;  %v6700_v36 = vpack.c.bf16 %v1522_v30, %v1519_v7  ;;  %8887 = vst [vmem:[#allocation37_spill] sm:$0xff] %v6715_v37  ;;  %v8890_v7 = vld [vmem:[#allocation35_spill] sm:$0xff]  ;;  %v8891_v30 = vld [vmem:[#allocation13_spill] sm:$0xff]  ;;  %v5194_v44 = vld [vmem:[%s8530_s3 + $0x2ac] sm:$0xf0] }
 0x281   :  { %v1186_v42 = vadd.f32 %v8891_v30, %v8890_v7 }
 0x283   :  { %3815 = vmatpush.bf16.msrb.mxu0 %v8884_v40  ;;  %v1337_v59 = vpop.f32.mrf.mxu2  ;;  %2911 = vmatpush.bf16.msrb.mxu1 %v1637_v23  ;;  %v1184_v40 = vadd.f32 %v8889_v46, %v8888_v62  ;;  %v8892_v23 = vld [vmem:[#allocation28_spill] sm:$0xff]  ;;  %v1545_v28 = vmax.f32 %v1186_v42, 0.0  ;;  %v5006_v42 = vld [vmem:[%s8530_s3 + $0x2a0] sm:$0xf] }
 0x284   :  { %v1338_v58 = vadd.f32 %v1337_v59, %v8883_v63  ;;  %v8893_v59 = vld [vmem:[#allocation39_spill] sm:$0xff]  ;;  %v8894_v46 = vld [vmem:[#allocation36_spill] sm:$0xff] }
 0x285   :  { %v6713_v20 = vpop.f32.mrf.mxu3  ;;  %v1542_v5 = vmax.f32 %v1184_v40, 0.0 }
 0x286   :  { %v1525_v25 = vmax.f32 %v1338_v58, 0.0  ;;  %v1174_v58 = vadd.f32 %v6660_v52, %v8879_v26 }
 0x287   :  { %3816 = vmatpush.bf16.msrb.mxu0 %v8886_v55  ;;  %2912 = vmatpush.bf16.msrb.mxu1 %v1634_v13  ;;  %v1180_v55 = vpop.f32.mrf.mxu1  ;;  %v1647_v40 = vpack.c.bf16 %v1545_v28, %v1542_v5 }
 0x288   :  { %v1181_v3 = vadd.f32 %v1180_v55, %v6156_v32  ;;  %v1536_v55 = vmax.f32 %v1179_v57, 0.0 }
 0x28a   :  { %2627 = vmatmul.bf16.gmra.mxu3 %v6715_v37 }
 0x28b   :  { %v1339_v8 = vpop.f32.mrf.mxu2  ;;  %2913 = vmatpush.bf16.msrb.mxu1 %v1631_v18  ;;  %v1176_v18 = vadd.f32 %v6682_v12, %v6190_v31  ;;  %v1171_v12 = vadd.f32 %v6634_v24, %v8880_v49  ;;  %v1164_v24 = vadd.f32 %v6564_v39, %v8882_v27 }
 0x28c   :  { %v1340_v54 = vadd.f32 %v1339_v8, %v8880_v49  ;;  %v1539_v8 = vmax.f32 %v1181_v3, 0.0  ;;  %v6747_v3 = vor.u32 %v5194_v44, %v5006_v42  ;;  %v8897_v44 = vld [vmem:[#allocation41_spill] sm:$0xff] }
 0x28d   :  { %v6725_v43 = vpop.f32.mrf.mxu3  ;;  %v1533_v5 = vmax.f32 %v1176_v18, 0.0  ;;  %v1527_v52 = vmax.f32 %v1171_v12, 0.0  ;;  %v1518_v42 = vmax.f32 %v1164_v24, 0.0  ;;  %v4680_v24 = vld [vmem:[%s8530_s3 + $0x18] sm:$0xf0] }
 0x28e   :  { %v1528_v13 = vmax.f32 %v1340_v54, 0.0  ;;  %v1644_v28 = vpack.c.bf16 %v1539_v8, %v1536_v55  ;;  %8895 = vst [vmem:[#allocation45_spill] sm:$0xff] %v6747_v3 }
 0x28f   :  { %3422 = vmatpush.bf16.msra.mxu1 %v8892_v23 }
 0x290   :  { %3058 = vmatmul.bf16.gmra.mxu2 %v8893_v59  ;;  %v6731_v30 = vpack.c.bf16 %v1528_v13, %v1525_v25  ;;  %v1169_v25 = vadd.f32 %v6619_v29, %v8883_v63  ;;  %v1530_v13 = vmax.f32 %v1174_v58, 0.0  ;;  %v1161_v29 = vadd.f32 %v6539_v35, %v6657_v6  ;;  %v5022_v35 = vld [vmem:[%s8530_s3 + $0x2c0] sm:$0xf]  ;;  %v5198_v6 = vld [vmem:[%s8530_s3 + $0x2cc] sm:$0xf0] }
 0x291   :  { %v6777_v55 = vor.u32 %v5198_v6, %v5022_v35  ;;  %v4696_v35 = vld [vmem:[%s8530_s3 + $0x38] sm:$0xf0] }
 0x292   :  { %v1524_v49 = vmax.f32 %v1169_v25, 0.0 }
 0x293   :  { %3423 = vmatpush.bf16.msra.mxu1 %v8894_v46  ;;  %v1342_v23 = vpop.f32.mrf.mxu2  ;;  %v1166_v46 = vadd.f32 %v6595_v56, %v6626_v61  ;;  %8899 = vst [vmem:[#allocation44_spill] sm:$0xff] %v6777_v55 }
 0x294   :  { %v1343_v57 = vadd.f32 %v1342_v23, %v8879_v26  ;;  %v1638_v26 = vpack.c.bf16 %v1527_v52, %v1524_v49  ;;  %v1159_v23 = vadd.f32 %v6512_v2, %v6651_v33 }
 0x295   :  { %v6743_v54 = vpop.f32.mrf.mxu3  ;;  %v1521_v56 = vmax.f32 %v1166_v46, 0.0  ;;  %v5202_v46 = vld [vmem:[%s8530_s3 + $0x2ec] sm:$0xf0] }
 0x296   :  { %v1531_v61 = vmax.f32 %v1343_v57, 0.0  ;;  %v1512_v58 = vmax.f32 %v1159_v23, 0.0  ;;  %v5108_v23 = vld [vmem:[%s8530_s3 + $0x4] sm:$0xf] }
 0x297   :  { %3424 = vmatpush.bf16.msra.mxu1 %v1647_v40  ;;  %v1641_v40 = vpack.c.bf16 %v1533_v5, %v1530_v13  ;;  %v5038_v13 = vld [vmem:[%s8530_s3 + $0x2e0] sm:$0xf] }
 0x298   :  { %v6795_v57 = vor.u32 %v5202_v46, %v5038_v13  ;;  %v8910_v46 = vld [vmem:[#allocation50_spill] sm:$0xff] }
 0x29a   :  { %2632 = vmatmul.bf16.gmra.mxu3 %v6747_v3 }
 0x29b   :  { %3425 = vmatpush.bf16.msra.mxu1 %v1644_v28  ;;  %v1344_v19 = vpop.f32.mrf.mxu2  ;;  %v8901_v28 = vld [vmem:[#allocation43_spill] sm:$0xff] }
 0x29c   :  { %v1345_v18 = vadd.f32 %v1344_v19, %v6190_v31  ;;  %v1515_v31 = vmax.f32 %v1161_v29, 0.0  ;;  %v1635_v19 = vpack.c.bf16 %v1521_v56, %v1518_v42  ;;  %v8905_v56 = vld [vmem:[#allocation14_spill] sm:$0xff]  ;;  %v4672_v42 = vld [vmem:[%s8530_s3 + $0x10] sm:$0xf0] }
 0x29d   :  { %v6760_v63 = vpop.f32.mrf.mxu3 }
 0x29e   :  { %8896 = vst [vmem:[#allocation62_spill] sm:$0xff] %v6760_v63  ;;  %v1534_v8 = vmax.f32 %v1345_v18, 0.0  ;;  %v1632_v33 = vpack.c.bf16 %v1515_v31, %v1512_v58 }
 0x29f   :  { %3426 = vmatpush.bf16.msra.mxu1 %v1641_v40  ;;  %v5109_v40 = vld [vmem:[%s8530_s3 + $0xc] sm:$0xf] }
 0x2a0   :  { %3063 = vmatmul.bf16.gmra.mxu2 %v8897_v44  ;;  %v6765_v39 = vpack.c.bf16 %v1534_v8, %v1531_v61  ;;  %v6803_v49 = vor.u32 %v5109_v40, %v4680_v24  ;;  %v4694_v61 = vld [vmem:[%s8530_s3 + $0x28] sm:$0xf]  ;;  %v5115_v8 = vld [vmem:[%s8530_s3 + $0x34] sm:$0xf0] }
 0x2a1   :  { %v6822_v31 = vor.u32 %v5115_v8, %v4694_v61  ;;  %v8912_v24 = vld [vmem:[#allocation25_spill] sm:$0xff]  ;;  %v8913_v61 = vld [vmem:[#allocation16_spill] sm:$0xff]  ;;  %v4710_v8 = vld [vmem:[%s8530_s3 + $0x48] sm:$0xf] }
 0x2a2   :  { %8903 = vst [vmem:[#allocation54_spill] sm:$0xff] %v6803_v49  ;;  %2914 = vmatmul.bf16.vlgmr.msrb.gmra.mxu1 %v6803_v49 }
 0x2a3   :  { %3427 = vmatpush.bf16.msra.mxu1 %v1638_v26  ;;  %v6767_v27 = vpop.f32.mrf.mxu2  ;;  %8906 = vst [vmem:[#allocation12_spill] sm:$0xff] %v6822_v31  ;;  %2790 = vmatmul.bf16.gmra.mxu0 %v6822_v31  ;;  %v8919_v31 = vld [vmem:[#allocation15_spill] sm:$0xff] }
 0x2a5   :  { %v6775_v2 = vpop.f32.mrf.mxu3 }
 0x2a6   :  { %8898 = vst [vmem:[#allocation17_spill] sm:$0xff] %v6775_v2 }
 0x2a7   :  { %3428 = vmatpush.bf16.msra.mxu1 %v1635_v19  ;;  %v5113_v19 = vld [vmem:[%s8530_s3 + $0x2c] sm:$0xf] }
 0x2a8   :  { %v6833_v58 = vor.u32 %v5113_v19, %v4696_v35  ;;  %v8914_v19 = vld [vmem:[#allocation19_spill] sm:$0xff] }
 0x2a9   :  { %v5112_v35 = vld [vmem:[%s8530_s3 + $0x24] sm:$0xf] }
 0x2aa   :  { %2637 = vmatmul.bf16.gmra.mxu3 %v6777_v55  ;;  %8908 = vst [vmem:[#allocation13_spill] sm:$0xff] %v6833_v58 }
 0x2ab   :  { %3429 = vmatpush.bf16.msra.mxu1 %v1632_v33  ;;  %v6780_v12 = vpop.f32.mrf.mxu2  ;;  %v6835_v33 = vor.u32 %v5108_v23, %v4672_v42  ;;  %v5119_v23 = vld [vmem:[%s8530_s3 + $0x54] sm:$0xf0] }
 0x2ad   :  { %v6782_v5 = vpop.f32.mrf.mxu3  ;;  %8909 = vst [vmem:[#allocation28_spill] sm:$0xff] %v6835_v33 }
 0x2ae   :  { %8900 = vst [vmem:[#allocation58_spill] sm:$0xff] %v6782_v5 }
 0x2b0   :  { %3068 = vmatmul.bf16.gmra.mxu2 %v8901_v28 }
 0x2b2   :  { %2919 = vmatmul.bf16.gmra.mxu1 %v6833_v58 }
 0x2b3   :  { %v6785_v25 = vpop.f32.mrf.mxu2 }
 0x2b5   :  { %v6793_v52 = vpop.f32.mrf.mxu3 }
 0x2b6   :  { %8902 = vst [vmem:[#allocation31_spill] sm:$0xff] %v6793_v52 }
 0x2ba   :  { %2642 = vmatmul.bf16.gmra.mxu3 %v6795_v57 }
 0x2bb   :  { %v1354_v18 = vpop.f32.mrf.mxu2 }
 0x2bd   :  { %v6807_v29 = vpop.f32.mrf.mxu3 }
 0x2be   :  { %8904 = vst [vmem:[#allocation34_spill] sm:$0xff] %v6807_v29  ;;  %v8922_v29 = vld [vmem:[#allocation30_spill] sm:$0xff] }
 0x2c0   :  { %3073 = vmatmul.bf16.gmra.mxu2 %v8905_v56  ;;  %v8921_v56 = vld [vmem:[#allocation46_spill] sm:$0xff] }
 0x2c3   :  { %v1357_v26 = vpop.f32.mrf.mxu2 }
 0x2c5   :  { %v6830_v6 = vpop.f32.mrf.mxu3 }
 0x2c6   :  { %8907 = vst [vmem:[#allocation35_spill] sm:$0xff] %v6830_v6 }
 0x2ca   :  { %2656 = vmatmul.bf16.vlgmr.msra.gmra.mxu3 %v6835_v33 }
 0x2cb   :  { %v1359_v13 = vpop.f32.mrf.mxu2  ;;  %3680 = vmatpush.bf16.msra.mxu3 %v8910_v46  ;;  %v4688_v46 = vld [vmem:[%s8530_s3 + $0x30] sm:$0xf0] }
 0x2cc   :  { %v6870_v58 = vor.u32 %v5112_v35, %v4688_v46  ;;  %v1360_v49 = vadd.f32 %v1359_v13, %v8922_v29  ;;  %v4726_v29 = vld [vmem:[%s8530_s3 + $0x68] sm:$0xf]  ;;  %v1350_v13 = vadd.f32 %v6780_v12, %v6156_v32 }
 0x2cd   :  { %v6840_v40 = vpop.f32.mrf.mxu3 }
 0x2ce   :  { %8911 = vst [vmem:[#allocation39_spill] sm:$0xff] %v6840_v40  ;;  %v4712_v40 = vld [vmem:[%s8530_s3 + $0x58] sm:$0xf0] }
 0x2cf   :  { %3681 = vmatpush.bf16.msra.mxu3 %v8912_v24  ;;  %v6857_v24 = vor.u32 %v5119_v23, %v4710_v8  ;;  %8918 = vst [vmem:[#allocation19_spill] sm:$0xff] %v6870_v58  ;;  %v8920_v8 = vld [vmem:[#allocation22_spill] sm:$0xff] }
 0x2d0   :  { %3078 = vmatmul.bf16.gmra.mxu2 %v8913_v61  ;;  %v5117_v61 = vld [vmem:[%s8530_s3 + $0x4c] sm:$0xf] }
 0x2d1   :  { %8915 = vst [vmem:[#allocation36_spill] sm:$0xff] %v6857_v24  ;;  %2795 = vmatmul.bf16.gmra.mxu0 %v6857_v24 }
 0x2d3   :  { %v1362_v42 = vpop.f32.mrf.mxu2  ;;  %3682 = vmatpush.bf16.msra.mxu3 %v8914_v19  ;;  %v6868_v19 = vor.u32 %v5117_v61, %v4712_v40  ;;  %v8925_v40 = vld [vmem:[#allocation29_spill] sm:$0xff] }
 0x2d4   :  { %v1363_v23 = vadd.f32 %v1362_v42, %v8920_v8  ;;  %v1358_v61 = vadd.f32 %v1357_v26, %v8925_v40  ;;  %v1552_v42 = vmax.f32 %v1360_v49, 0.0  ;;  %v8930_v49 = vld [vmem:[#allocation40_spill] sm:$0xff] }
 0x2d5   :  { %v6865_v33 = vpop.f32.mrf.mxu3  ;;  %8917 = vst [vmem:[#allocation25_spill] sm:$0xff] %v6868_v19  ;;  %2924 = vmatmul.bf16.gmra.mxu1 %v6868_v19  ;;  %v1355_v19 = vadd.f32 %v1354_v18, %v8890_v7  ;;  %v5116_v18 = vld [vmem:[%s8530_s3 + $0x44] sm:$0xf] }
 0x2d6   :  { %8916 = vst [vmem:[#allocation50_spill] sm:$0xff] %v6865_v33  ;;  %v8923_v33 = vld [vmem:[#allocation23_spill] sm:$0xff]  ;;  %v1555_v35 = vmax.f32 %v1363_v23, 0.0  ;;  %v1549_v26 = vmax.f32 %v1358_v61, 0.0 }
 0x2d7   :  { %3683 = vmatpush.bf16.msra.mxu3 %v8919_v31  ;;  %v8926_v31 = vld [vmem:[#allocation42_spill] sm:$0xff]  ;;  %v1546_v23 = vmax.f32 %v1355_v19, 0.0 }
 0x2d8   :  { %v1651_v40 = vpack.c.bf16 %v1552_v42, %v1549_v26  ;;  %v8934_v19 = vld [vmem:[#allocation38_spill] sm:$0xff] }
 0x2da   :  { %2661 = vmatmul.bf16.gmra.mxu3 %v6870_v58  ;;  %v8927_v58 = vld [vmem:[#allocation24_spill] sm:$0xff] }
 0x2db   :  { %v1364_v6 = vpop.f32.mrf.mxu2  ;;  %3684 = vmatpush.bf16.msra.mxu3 %v8921_v56  ;;  %v5123_v56 = vld [vmem:[%s8530_s3 + $0x74] sm:$0xf0] }
 0x2dc   :  { %v1365_v52 = vadd.f32 %v1364_v6, %v8923_v33  ;;  %v6891_v6 = vor.u32 %v5123_v56, %v4726_v29  ;;  %v4704_v33 = vld [vmem:[%s8530_s3 + $0x50] sm:$0xf0] }
 0x2dd   :  { %v6879_v24 = vpop.f32.mrf.mxu3  ;;  %v6919_v12 = vor.u32 %v5116_v18, %v4704_v33  ;;  %v5120_v33 = vld [vmem:[%s8530_s3 + $0x64] sm:$0xf] }
 0x2de   :  { %8924 = vst [vmem:[#allocation15_spill] sm:$0xff] %v6879_v24  ;;  %v1558_v46 = vmax.f32 %v1365_v52, 0.0  ;;  %v1353_v52 = vadd.f32 %v6785_v25, %v8888_v62  ;;  %v5121_v62 = vld [vmem:[%s8530_s3 + $0x6c] sm:$0xf]  ;;  %v4728_v25 = vld [vmem:[%s8530_s3 + $0x78] sm:$0xf0] }
 0x2df   :  { %3685 = vmatpush.bf16.msra.mxu3 %v8926_v31  ;;  %8928 = vst [vmem:[#allocation22_spill] sm:$0xff] %v6891_v6  ;;  %v1540_v31 = vmax.f32 %v1350_v13, 0.0  ;;  %v4720_v13 = vld [vmem:[%s8530_s3 + $0x70] sm:$0xf0] }
 0x2e0   :  { %v1654_v8 = vpack.c.bf16 %v1558_v46, %v1555_v35  ;;  %3083 = vmatmul.bf16.gmra.mxu2 %v8927_v58  ;;  %v6915_v35 = vor.u32 %v5121_v62, %v4728_v25  ;;  %v1348_v46 = vadd.f32 %v6767_v27, %v5928_v51  ;;  %v1543_v32 = vmax.f32 %v1353_v52, 0.0  ;;  %8933 = vst [vmem:[#allocation29_spill] sm:$0xff] %v6919_v12  ;;  %v8937_v51 = vld [vmem:[#allocation48_spill] sm:$0xff]  ;;  %v4742_v27 = vld [vmem:[%s8530_s3 + $0x88] sm:$0xf] }
 0x2e1   :  { %2800 = vmatmul.bf16.gmra.mxu0 %v6891_v6  ;;  %v5127_v52 = vld [vmem:[%s8530_s3 + $0x94] sm:$0xf0]  ;;  %v6958_v25 = vor.u32 %v5120_v33, %v4720_v13 }
 0x2e2   :  { %3938 = vmatpush.bf16.msrb.mxu1 %v1654_v8  ;;  %8932 = vst [vmem:[#allocation23_spill] sm:$0xff] %v6915_v35  ;;  %v1648_v42 = vpack.c.bf16 %v1546_v23, %v1543_v32  ;;  %v1537_v8 = vmax.f32 %v1348_v46, 0.0  ;;  %v5125_v23 = vld [vmem:[%s8530_s3 + $0x8c] sm:$0xf] }
 0x2e3   :  { %v6895_v7 = vpop.f32.mrf.mxu2  ;;  %3686 = vmatpush.bf16.msra.mxu3 %v8930_v49  ;;  %v6935_v49 = vor.u32 %v5127_v52, %v4742_v27  ;;  %8942 = vst [vmem:[#allocation71_spill] sm:$0xff] %v6958_v25  ;;  %v4760_v27 = vld [vmem:[%s8530_s3 + $0xb8] sm:$0xf0] }
 0x2e4   :  { %8929 = vst [vmem:[#allocation46_spill] sm:$0xff] %v6895_v7  ;;  %v1645_v56 = vpack.c.bf16 %v1540_v31, %v1537_v8  ;;  %v5131_v31 = vld [vmem:[%s8530_s3 + $0xb4] sm:$0xf0]  ;;  %v5124_v8 = vld [vmem:[%s8530_s3 + $0x84] sm:$0xf] }
 0x2e5   :  { %v6912_v61 = vpop.f32.mrf.mxu3  ;;  %2929 = vmatmul.bf16.gmra.mxu1 %v6915_v35  ;;  %8938 = vst [vmem:[#allocation38_spill] sm:$0xff] %v6935_v49  ;;  %v4824_v35 = vld [vmem:[%s8530_s3 + $0x138] sm:$0xf0] }
 0x2e6   :  { %8931 = vst [vmem:[#allocation30_spill] sm:$0xff] %v6912_v61  ;;  %3939 = vmatpush.bf16.msrb.mxu1 %v1651_v40  ;;  %v4744_v40 = vld [vmem:[%s8530_s3 + $0x98] sm:$0xf0] }
 0x2e7   :  { %3687 = vmatpush.bf16.msra.mxu3 %v8934_v19  ;;  %v8945_v19 = vld [vmem:[#allocation52_spill] sm:$0xff] }
 0x2ea   :  { %3940 = vmatpush.bf16.msrb.mxu1 %v1648_v42  ;;  %2666 = vmatmul.bf16.gmra.mxu3 %v6919_v12 }
 0x2eb   :  { %v6924_v29 = vpop.f32.mrf.mxu2 }
 0x2ec   :  { %8935 = vst [vmem:[#allocation42_spill] sm:$0xff] %v6924_v29  ;;  %v4776_v29 = vld [vmem:[%s8530_s3 + $0xd8] sm:$0xf0] }
 0x2ed   :  { %v6926_v26 = vpop.f32.mrf.mxu3 }
 0x2ee   :  { %8936 = vst [vmem:[#allocation40_spill] sm:$0xff] %v6926_v26  ;;  %3941 = vmatpush.bf16.msrb.mxu1 %v1645_v56  ;;  %v5129_v56 = vld [vmem:[%s8530_s3 + $0xac] sm:$0xf] }
 0x2ef   :  { %v6994_v33 = vor.u32 %v5129_v56, %v4760_v27  ;;  %v4774_v56 = vld [vmem:[%s8530_s3 + $0xc8] sm:$0xf] }
 0x2f0   :  { %3088 = vmatmul.bf16.gmra.mxu2 %v8937_v51 }
 0x2f1   :  { %2805 = vmatmul.bf16.gmra.mxu0 %v6935_v49  ;;  %8949 = vst [vmem:[#allocation77_spill] sm:$0xff] %v6994_v33 }
 0x2f2   :  { %3942 = vmatpush.bf16.msrb.mxu1 %v6765_v39  ;;  %v6955_v39 = vor.u32 %v5125_v23, %v4744_v40  ;;  %v7002_v40 = vpop.permute.xlu1 %1871 }
 0x2f3   :  { %v6938_v18 = vpop.f32.mrf.mxu2  ;;  %8952 = vst [vmem:[#allocation80_spill] sm:$0xff] %v7002_v40 }
 0x2f4   :  { %8939 = vst [vmem:[#allocation68_spill] sm:$0xff] %v6938_v18  ;;  %v5133_v18 = vld [vmem:[%s8530_s3 + $0xcc] sm:$0xf] }
 0x2f5   :  { %v6952_v62 = vpop.f32.mrf.mxu3  ;;  %8941 = vst [vmem:[#allocation70_spill] sm:$0xff] %v6955_v39  ;;  %2934 = vmatmul.bf16.gmra.mxu1 %v6955_v39 }
 0x2f6   :  { %8940 = vst [vmem:[#allocation69_spill] sm:$0xff] %v6952_v62  ;;  %3943 = vmatpush.bf16.msrb.mxu1 %v6731_v30  ;;  %v4758_v30 = vld [vmem:[%s8530_s3 + $0xa8] sm:$0xf] }
 0x2f7   :  { %v6975_v42 = vor.u32 %v5131_v31, %v4758_v30  ;;  %v7006_v31 = vpop.permute.xlu0 %1861 }
 0x2f8   :  { %8954 = vst [vmem:[#allocation82_spill] sm:$0xff] %v7006_v31 }
 0x2f9   :  { %8946 = vst [vmem:[#allocation74_spill] sm:$0xff] %v6975_v42 }
 0x2fa   :  { %3944 = vmatpush.bf16.msrb.mxu1 %v6700_v36  ;;  %2671 = vmatmul.bf16.gmra.mxu3 %v6958_v25  ;;  %v7038_v7 = vpop.permute.xlu1 %1866  ;;  %v4808_v25 = vld [vmem:[%s8530_s3 + $0x118] sm:$0xf0] }
 0x2fb   :  { %v6963_v46 = vpop.f32.mrf.mxu2  ;;  %8961 = vst [vmem:[#allocation88_spill] sm:$0xff] %v7038_v7 }
 0x2fc   :  { %8943 = vst [vmem:[#allocation72_spill] sm:$0xff] %v6963_v46  ;;  %v4752_v46 = vld [vmem:[%s8530_s3 + $0xb0] sm:$0xf0] }
 0x2fd   :  { %v6965_v32 = vpop.f32.mrf.mxu3 }
 0x2fe   :  { %8944 = vst [vmem:[#allocation73_spill] sm:$0xff] %v6965_v32  ;;  %3945 = vmatpush.bf16.msrb.mxu1 %v6665_v38  ;;  %v4736_v38 = vld [vmem:[%s8530_s3 + $0x90] sm:$0xf0] }
 0x2ff   :  { %v6996_v13 = vor.u32 %v5124_v8, %v4736_v38  ;;  %v5135_v8 = vld [vmem:[%s8530_s3 + $0xd4] sm:$0xf0] }
 0x300   :  { %3093 = vmatmul.bf16.gmra.mxu2 %v8945_v19  ;;  %v7015_v38 = vor.u32 %v5135_v8, %v4774_v56  ;;  %v7034_v8 = vor.u32 %v5133_v18, %v4776_v29  ;;  %v4790_v29 = vld [vmem:[%s8530_s3 + $0xe8] sm:$0xf]  ;;  %v5139_v18 = vld [vmem:[%s8530_s3 + $0xf4] sm:$0xf0] }
 0x301   :  { %2810 = vmatmul.bf16.gmra.mxu0 %v6975_v42  ;;  %8950 = vst [vmem:[#allocation78_spill] sm:$0xff] %v6996_v13 }
 0x302   :  { %8956 = vst [vmem:[#allocation83_spill] sm:$0xff] %v7015_v38 }
 0x303   :  { %v6977_v36 = vpop.f32.mrf.mxu2  ;;  %8959 = vst [vmem:[#allocation86_spill] sm:$0xff] %v7034_v8 }
 0x304   :  { %8947 = vst [vmem:[#allocation75_spill] sm:$0xff] %v6977_v36  ;;  %v8955_v36 = vld [vmem:[#allocation56_spill] sm:$0xff] }
 0x305   :  { %v6991_v52 = vpop.f32.mrf.mxu3  ;;  %2939 = vmatmul.bf16.gmra.mxu1 %v6994_v33  ;;  %v8965_v33 = vld [vmem:[#allocation60_spill] sm:$0xff] }
 0x306   :  { %8948 = vst [vmem:[#allocation76_spill] sm:$0xff] %v6991_v52 }
 0x30a   :  { %2676 = vmatmul.bf16.gmra.mxu3 %v6996_v13 }
 0x30b   :  { %v7000_v23 = vpop.f32.mrf.mxu2 }
 0x30c   :  { %8951 = vst [vmem:[#allocation79_spill] sm:$0xff] %v7000_v23  ;;  %v5128_v23 = vld [vmem:[%s8530_s3 + $0xa4] sm:$0xf] }
 0x30d   :  { %v7004_v30 = vpop.f32.mrf.mxu3 }
 0x30e   :  { %8953 = vst [vmem:[#allocation81_spill] sm:$0xff] %v7004_v30 }
 0x310   :  { %3098 = vmatmul.bf16.gmra.mxu2 %v8955_v36  ;;  %v7040_v36 = vpop.permute.xlu0 %1856 }
 0x311   :  { %2815 = vmatmul.bf16.gmra.mxu0 %v7015_v38  ;;  %8962 = vst [vmem:[#allocation89_spill] sm:$0xff] %v7040_v36 }
 0x313   :  { %v7017_v27 = vpop.f32.mrf.mxu2 }
 0x314   :  { %8957 = vst [vmem:[#allocation84_spill] sm:$0xff] %v7017_v27  ;;  %v7036_v27 = vor.u32 %v5128_v23, %v4752_v46  ;;  %v7055_v46 = vpop.permute.xlu1 %1841  ;;  %v7057_v23 = vor.u32 %v5139_v18, %v4790_v29  ;;  %v4792_v29 = vld [vmem:[%s8530_s3 + $0xf8] sm:$0xf0] }
 0x315   :  { %v7031_v56 = vpop.f32.mrf.mxu3  ;;  %2944 = vmatmul.bf16.gmra.mxu1 %v7034_v8  ;;  %8966 = vst [vmem:[#allocation92_spill] sm:$0xff] %v7055_v46 }
 0x316   :  { %8958 = vst [vmem:[#allocation85_spill] sm:$0xff] %v7031_v56  ;;  %v7082_v56 = vpop.permute.xlu2 %1876 }
 0x317   :  { %8960 = vst [vmem:[#allocation87_spill] sm:$0xff] %v7036_v27 }
 0x318   :  { %8967 = vst [vmem:[#allocation93_spill] sm:$0xff] %v7057_v23  ;;  %v7059_v8 = vpop.permute.xlu0 %1831 }
 0x319   :  { %8968 = vst [vmem:[#allocation94_spill] sm:$0xff] %v7059_v8 }
 0x31a   :  { %2681 = vmatmul.bf16.gmra.mxu3 %v7036_v27  ;;  %8973 = vst [vmem:[#allocation99_spill] sm:$0xff] %v7082_v56 }
 0x31b   :  { %v7044_v30 = vpop.f32.mrf.mxu2 }
 0x31c   :  { %8963 = vst [vmem:[#allocation90_spill] sm:$0xff] %v7044_v30  ;;  %v5132_v30 = vld [vmem:[%s8530_s3 + $0xc4] sm:$0xf]  ;;  %v7086_v42 = vpop.permute.xlu1 %1836 }
 0x31d   :  { %v7046_v13 = vpop.f32.mrf.mxu3  ;;  %8974 = vst [vmem:[#allocation100_spill] sm:$0xff] %v7086_v42 }
 0x31e   :  { %8964 = vst [vmem:[#allocation91_spill] sm:$0xff] %v7046_v13  ;;  %v5137_v13 = vld [vmem:[%s8530_s3 + $0xec] sm:$0xf] }
 0x31f   :  { %v2915_v49 = vpop.f32.mrf.mxu1 }
 0x320   :  { %3103 = vmatmul.bf16.gmra.mxu2 %v8965_v33  ;;  %v4768_v33 = vld [vmem:[%s8530_s3 + $0xd0] sm:$0xf0]  ;;  %v7090_v19 = vpop.permute.xlu0 %1956 }
 0x321   :  { %2820 = vmatmul.bf16.gmra.mxu0 %v7057_v23  ;;  %v7080_v38 = vor.u32 %v5132_v30, %v4768_v33  ;;  %8976 = vst [vmem:[#allocation102_spill] sm:$0xff] %v7090_v19  ;;  %v8978_v23 = vld [vmem:[#allocation64_spill] sm:$0xff]  ;;  %v5136_v30 = vld [vmem:[%s8530_s3 + $0xe4] sm:$0xf] }
 0x323   :  { %v7061_v27 = vpop.f32.mrf.mxu2  ;;  %8972 = vst [vmem:[#allocation98_spill] sm:$0xff] %v7080_v38 }
 0x324   :  { %8969 = vst [vmem:[#allocation95_spill] sm:$0xff] %v7061_v27  ;;  %v7078_v27 = vor.u32 %v5137_v13, %v4792_v29  ;;  %v7095_v13 = vpop.permute.xlu2 %1851  ;;  %v4784_v29 = vld [vmem:[%s8530_s3 + $0xf0] sm:$0xf0] }
 0x325   :  { %v7075_v18 = vpop.f32.mrf.mxu3  ;;  %8979 = vst [vmem:[#allocation104_spill] sm:$0xff] %v7095_v13  ;;  %v7123_v39 = vor.u32 %v5136_v30, %v4784_v29 }
 0x326   :  { %8970 = vst [vmem:[#allocation96_spill] sm:$0xff] %v7075_v18  ;;  %2949 = vmatmul.bf16.gmra.mxu1 %v7078_v27  ;;  %v2786_v18 = vpop.f32.mrf.mxu0 }
 0x327   :  { %8971 = vst [vmem:[#allocation97_spill] sm:$0xff] %v7078_v27  ;;  %v2917_v30 = vpop.f32.mrf.mxu1 }
 0x328   :  { %8984 = vst [vmem:[#allocation109_spill] sm:$0xff] %v7123_v39  ;;  %v7127_v51 = vpop.permute.xlu0 %1941 }
 0x329   :  { %8986 = vst [vmem:[#allocation111_spill] sm:$0xff] %v7127_v51 }
 0x32a   :  { %2686 = vmatmul.bf16.gmra.mxu3 %v7080_v38 }
 0x32b   :  { %v7088_v52 = vpop.f32.mrf.mxu2 }
 0x32c   :  { %8975 = vst [vmem:[#allocation101_spill] sm:$0xff] %v7088_v52  ;;  %v4806_v52 = vld [vmem:[%s8530_s3 + $0x108] sm:$0xf] }
 0x32d   :  { %v7092_v32 = vpop.f32.mrf.mxu3 }
 0x32e   :  { %8977 = vst [vmem:[#allocation103_spill] sm:$0xff] %v7092_v32  ;;  %v7114_v32 = vpop.permute.xlu1 %1821  ;;  %v2788_v26 = vpop.f32.mrf.mxu0 }
 0x32f   :  { %8981 = vst [vmem:[#allocation106_spill] sm:$0xff] %v7114_v32  ;;  %v2920_v61 = vpop.f32.mrf.mxu1 }
 0x330   :  { %3108 = vmatmul.bf16.gmra.mxu2 %v8978_v23  ;;  %v5143_v23 = vld [vmem:[%s8530_s3 + $0x114] sm:$0xf0] }
 0x331   :  { %v7118_v27 = vor.u32 %v5143_v23, %v4806_v52  ;;  %v7134_v23 = vpop.permute.xlu2 %1846 }
 0x332   :  { %8988 = vst [vmem:[#allocation113_spill] sm:$0xff] %v7134_v23 }
 0x333   :  { %v7097_v33 = vpop.f32.mrf.mxu2  ;;  %8983 = vst [vmem:[#allocation108_spill] sm:$0xff] %v7118_v27  ;;  %2825 = vmatmul.bf16.gmra.mxu0 %v7118_v27 }
 0x334   :  { %8980 = vst [vmem:[#allocation105_spill] sm:$0xff] %v7097_v33  ;;  %v5141_v33 = vld [vmem:[%s8530_s3 + $0x10c] sm:$0xf] }
 0x335   :  { %v7116_v38 = vpop.f32.mrf.mxu3  ;;  %v7125_v62 = vor.u32 %v5141_v33, %v4808_v25  ;;  %v7141_v25 = vpop.permute.xlu0 %1816 }
 0x336   :  { %8982 = vst [vmem:[#allocation107_spill] sm:$0xff] %v7116_v38  ;;  %v7138_v29 = vpop.permute.xlu1 %1946  ;;  %v2791_v33 = vpop.f32.mrf.mxu0 }
 0x337   :  { %8985 = vst [vmem:[#allocation110_spill] sm:$0xff] %v7125_v62  ;;  %2954 = vmatmul.bf16.gmra.mxu1 %v7125_v62 }
 0x338   :  { %8990 = vst [vmem:[#allocation115_spill] sm:$0xff] %v7138_v29  ;;  %v2922_v29 = vpop.f32.mrf.mxu1 }
 0x339   :  { %8991 = vst [vmem:[#allocation116_spill] sm:$0xff] %v7141_v25  ;;  %v7171_v24 = vpop.permute.xlu2 %1951 }
 0x33a   :  { %2691 = vmatmul.bf16.gmra.mxu3 %v7123_v39  ;;  %v5140_v39 = vld [vmem:[%s8530_s3 + $0x104] sm:$0xf]  ;;  %8997 = vst [vmem:[#allocation122_spill] sm:$0xff] %v7171_v24 }
 0x33b   :  { %v7132_v52 = vpop.f32.mrf.mxu2 }
 0x33c   :  { %8987 = vst [vmem:[#allocation112_spill] sm:$0xff] %v7132_v52  ;;  %v4800_v52 = vld [vmem:[%s8530_s3 + $0x110] sm:$0xf0] }
 0x33d   :  { %v7136_v38 = vpop.f32.mrf.mxu3  ;;  %v7167_v6 = vor.u32 %v5140_v39, %v4800_v52  ;;  %v9001_v39 = vld [vmem:[#allocation18_spill] sm:$0xff] }
 0x33e   :  { %8989 = vst [vmem:[#allocation114_spill] sm:$0xff] %v7136_v38  ;;  %v4822_v38 = vld [vmem:[%s8530_s3 + $0x128] sm:$0xf]  ;;  %v7174_v19 = vpop.permute.xlu1 %1931 }
 0x33f   :  { %8995 = vst [vmem:[#allocation120_spill] sm:$0xff] %v7167_v6 }
 0x340   :  { %3113 = vmatmul.bf16.gmra.mxu2 %v6494_v34  ;;  %v5147_v34 = vld [vmem:[%s8530_s3 + $0x134] sm:$0xf0]  ;;  %8998 = vst [vmem:[#allocation123_spill] sm:$0xff] %v7174_v19 }
 0x341   :  { %v7162_v12 = vor.u32 %v5147_v34, %v4822_v38  ;;  %v2793_v34 = vpop.f32.mrf.mxu0  ;;  %v7178_v38 = vpop.permute.xlu0 %1801 }
 0x342   :  { %8999 = vst [vmem:[#allocation124_spill] sm:$0xff] %v7178_v38  ;;  %v2529_v52 = vadd.f32 %v9001_v39, %v7178_v38  ;;  %v4816_v39 = vld [vmem:[%s8530_s3 + $0x130] sm:$0xf0] }
 0x343   :  { %v7143_v27 = vpop.f32.mrf.mxu2  ;;  %8994 = vst [vmem:[#allocation119_spill] sm:$0xff] %v7162_v12  ;;  %2830 = vmatmul.bf16.gmra.mxu0 %v7162_v12  ;;  %v7185_v12 = vpop.permute.xlu2 %1826 }
 0x344   :  { %8992 = vst [vmem:[#allocation117_spill] sm:$0xff] %v7143_v27  ;;  %v5145_v27 = vld [vmem:[%s8530_s3 + $0x12c] sm:$0xf] }
 0x345   :  { %v7160_v62 = vpop.f32.mrf.mxu3  ;;  %v7169_v58 = vor.u32 %v5145_v27, %v4824_v35  ;;  %9002 = vst [vmem:[#allocation18_spill] sm:$0xff] %v7185_v12 }
 0x346   :  { %8993 = vst [vmem:[#allocation118_spill] sm:$0xff] %v7160_v62 }
 0x347   :  { %8996 = vst [vmem:[#allocation121_spill] sm:$0xff] %v7169_v58  ;;  %2959 = vmatmul.bf16.gmra.mxu1 %v7169_v58 }
 0x34a   :  { %2696 = vmatmul.bf16.gmra.mxu3 %v7167_v6  ;;  %v7189_v6 = vpop.permute.xlu1 %1806 }
 0x34b   :  { %v7180_v62 = vpop.f32.mrf.mxu2  ;;  %9003 = vst [vmem:[#allocation126_spill] sm:$0xff] %v7189_v6  ;;  %v7222_v44 = vpop.permute.xlu2 %1811 }
 0x34c   :  { %9000 = vst [vmem:[#allocation125_spill] sm:$0xff] %v7180_v62  ;;  %v5144_v62 = vld [vmem:[%s8530_s3 + $0x124] sm:$0xf] }
 0x34d   :  { %v2657_v35 = vpop.f32.mrf.mxu3  ;;  %9009 = vst [vmem:[#allocation130_spill] sm:$0xff] %v7222_v44 }
 0x34e   :  { %v2658_v27 = vadd.f32 %v2657_v35, %v2529_v52  ;;  %v7187_v58 = vpop.f32.mrf.mxu0 }
 0x350   :  { %v2787_v24 = vadd.f32 %v2786_v18, %v2658_v27  ;;  %3118 = vmatmul.bf16.gmra.mxu2 %v6530_v15  ;;  %v9005_v18 = vld [vmem:[#allocation47_spill] sm:$0xff]  ;;  %v4840_v15 = vld [vmem:[%s8530_s3 + $0x158] sm:$0xf0] }
 0x351   :  { %v2531_v52 = vadd.f32 %v9005_v18, %v7189_v6  ;;  %v7215_v6 = vor.u32 %v5144_v62, %v4816_v39 }
 0x352   :  { %v2916_v28 = vadd.f32 %v2915_v49, %v2787_v24  ;;  %v4838_v24 = vld [vmem:[%s8530_s3 + $0x148] sm:$0xf]  ;;  %v5151_v49 = vld [vmem:[%s8530_s3 + $0x154] sm:$0xf0]  ;;  %v2925_v38 = vpop.f32.mrf.mxu1 }
 0x353   :  { %v7191_v5 = vpop.f32.mrf.mxu2  ;;  %v7207_v27 = vor.u32 %v5151_v49, %v4838_v24  ;;  %9007 = vst [vmem:[#allocation128_spill] sm:$0xff] %v7215_v6 }
 0x354   :  { %9004 = vst [vmem:[#allocation127_spill] sm:$0xff] %v7191_v5  ;;  %v5149_v5 = vld [vmem:[%s8530_s3 + $0x14c] sm:$0xf]  ;;  %v4067_v39 = vmax.f32 %v2916_v28, 0.0  ;;  %v4832_v28 = vld [vmem:[%s8530_s3 + $0x150] sm:$0xf0] }
 0x355   :  { %v2659_v35 = vpop.f32.mrf.mxu3  ;;  %9006 = vst [vmem:[#allocation47_spill] sm:$0xff] %v7207_v27  ;;  %v7217_v51 = vor.u32 %v5149_v5, %v4840_v15  ;;  %2835 = vmatmul.bf16.gmra.mxu0 %v7207_v27 }
 0x356   :  { %v2660_v18 = vadd.f32 %v2659_v35, %v2531_v52  ;;  %v2798_v49 = vpop.f32.mrf.mxu0  ;;  %v9011_v52 = vld [vmem:[#allocation49_spill] sm:$0xff] }
 0x357   :  { %9008 = vst [vmem:[#allocation129_spill] sm:$0xff] %v7217_v51  ;;  %2964 = vmatmul.bf16.gmra.mxu1 %v7217_v51  ;;  %v2534_v62 = vadd.f32 %v9011_v52, %v7222_v44  ;;  %v9018_v44 = vld [vmem:[#allocation53_spill] sm:$0xff] }
 0x358   :  { %v2789_v2 = vadd.f32 %v2788_v26, %v2660_v18 }
 0x35a   :  { %v2918_v24 = vadd.f32 %v2917_v30, %v2789_v2  ;;  %2701 = vmatmul.bf16.gmra.mxu3 %v7215_v6  ;;  %v2927_v19 = vpop.f32.mrf.mxu1  ;;  %v2539_v6 = vadd.f32 %v9018_v44, %v7114_v32  ;;  %v4848_v44 = vld [vmem:[%s8530_s3 + $0x170] sm:$0xf0] }
 0x35b   :  { %v7224_v63 = vpop.f32.mrf.mxu2  ;;  %v9025_v32 = vld [vmem:[#allocation57_spill] sm:$0xff] }
 0x35c   :  { %9010 = vst [vmem:[#allocation131_spill] sm:$0xff] %v7224_v63  ;;  %v4070_v35 = vmax.f32 %v2918_v24, 0.0  ;;  %v5148_v63 = vld [vmem:[%s8530_s3 + $0x144] sm:$0xf] }
 0x35d   :  { %v2662_v15 = vpop.f32.mrf.mxu3  ;;  %v9013_v24 = vld [vmem:[#allocation51_spill] sm:$0xff] }
 0x35e   :  { %v2663_v5 = vadd.f32 %v2662_v15, %v2534_v62  ;;  %v7228_v27 = vpack.c.bf16 %v4070_v35, %v4067_v39  ;;  %v2801_v30 = vpop.f32.mrf.mxu0  ;;  %v2536_v52 = vadd.f32 %v9013_v24, %v7141_v25  ;;  %v5153_v35 = vld [vmem:[%s8530_s3 + $0x16c] sm:$0xf]  ;;  %v4856_v15 = vld [vmem:[%s8530_s3 + $0x178] sm:$0xf0] }
 0x360   :  { %v2792_v26 = vadd.f32 %v2791_v33, %v2663_v5  ;;  %3123 = vmatmul.bf16.gmra.mxu2 %v6570_v41  ;;  %v4854_v33 = vld [vmem:[%s8530_s3 + $0x168] sm:$0xf] }
 0x362   :  { %v2921_v2 = vadd.f32 %v2920_v61, %v2792_v26  ;;  %v5155_v61 = vld [vmem:[%s8530_s3 + $0x174] sm:$0xf0]  ;;  %v7255_v26 = vor.u32 %v5148_v63, %v4832_v28  ;;  %v2930_v24 = vpop.f32.mrf.mxu1 }
 0x363   :  { %v7231_v18 = vpop.f32.mrf.mxu2  ;;  %v7247_v39 = vor.u32 %v5155_v61, %v4854_v33 }
 0x364   :  { %9012 = vst [vmem:[#allocation49_spill] sm:$0xff] %v7231_v18  ;;  %v7257_v18 = vor.u32 %v5153_v35, %v4856_v15 }
 0x365   :  { %v2664_v62 = vpop.f32.mrf.mxu3  ;;  %9014 = vst [vmem:[#allocation51_spill] sm:$0xff] %v7247_v39  ;;  %2840 = vmatmul.bf16.gmra.mxu0 %v7247_v39 }
 0x366   :  { %v2665_v5 = vadd.f32 %v2664_v62, %v2536_v52  ;;  %9015 = vst [vmem:[#allocation132_spill] sm:$0xff] %v7255_v26  ;;  %v2803_v61 = vpop.f32.mrf.mxu0  ;;  %v4073_v52 = vmax.f32 %v2921_v2, 0.0 }
 0x367   :  { %9016 = vst [vmem:[#allocation133_spill] sm:$0xff] %v7257_v18  ;;  %2969 = vmatmul.bf16.gmra.mxu1 %v7257_v18 }
 0x368   :  { %v2794_v25 = vadd.f32 %v2793_v34, %v2665_v5 }
 0x36a   :  { %v2923_v33 = vadd.f32 %v2922_v29, %v2794_v25  ;;  %2706 = vmatmul.bf16.gmra.mxu3 %v7255_v26  ;;  %v2932_v35 = vpop.f32.mrf.mxu1  ;;  %v2544_v26 = vadd.f32 %v9025_v32, %v7059_v8  ;;  %v4864_v32 = vld [vmem:[%s8530_s3 + $0x190] sm:$0xf0] }
 0x36b   :  { %v7262_v41 = vpop.f32.mrf.mxu2 }
 0x36c   :  { %9017 = vst [vmem:[#allocation134_spill] sm:$0xff] %v7262_v41  ;;  %v4076_v63 = vmax.f32 %v2923_v33, 0.0  ;;  %v5152_v41 = vld [vmem:[%s8530_s3 + $0x164] sm:$0xf] }
 0x36d   :  { %v2667_v28 = vpop.f32.mrf.mxu3 }
 0x36e   :  { %v2668_v62 = vadd.f32 %v2667_v28, %v2539_v6  ;;  %v7266_v15 = vpack.c.bf16 %v4076_v63, %v4073_v52  ;;  %v2806_v25 = vpop.f32.mrf.mxu0  ;;  %v9020_v6 = vld [vmem:[#allocation55_spill] sm:$0xff]  ;;  %v5157_v63 = vld [vmem:[%s8530_s3 + $0x18c] sm:$0xf]  ;;  %v4872_v28 = vld [vmem:[%s8530_s3 + $0x198] sm:$0xf0] }
 0x36f   :  { %v2541_v2 = vadd.f32 %v9020_v6, %v7185_v12 }
 0x370   :  { %v2797_v34 = vadd.f32 %v7187_v58, %v2668_v62  ;;  %3128 = vmatmul.bf16.gmra.mxu2 %v6615_v9  ;;  %v4870_v58 = vld [vmem:[%s8530_s3 + $0x188] sm:$0xf] }
 0x372   :  { %v2926_v29 = vadd.f32 %v2925_v38, %v2797_v34  ;;  %v5159_v38 = vld [vmem:[%s8530_s3 + $0x194] sm:$0xf0]  ;;  %v7294_v34 = vor.u32 %v5152_v41, %v4848_v44  ;;  %v2935_v6 = vpop.f32.mrf.mxu1 }
 0x373   :  { %v7270_v5 = vpop.f32.mrf.mxu2  ;;  %v7286_v52 = vor.u32 %v5159_v38, %v4870_v58 }
 0x374   :  { %9019 = vst [vmem:[#allocation53_spill] sm:$0xff] %v7270_v5  ;;  %v7296_v5 = vor.u32 %v5157_v63, %v4872_v28 }
 0x375   :  { %v2669_v33 = vpop.f32.mrf.mxu3  ;;  %9021 = vst [vmem:[#allocation55_spill] sm:$0xff] %v7286_v52  ;;  %2845 = vmatmul.bf16.gmra.mxu0 %v7286_v52 }
 0x376   :  { %v2670_v62 = vadd.f32 %v2669_v33, %v2541_v2  ;;  %9022 = vst [vmem:[#allocation135_spill] sm:$0xff] %v7294_v34  ;;  %v2808_v38 = vpop.f32.mrf.mxu0  ;;  %v4079_v2 = vmax.f32 %v2926_v29, 0.0 }
 0x377   :  { %9023 = vst [vmem:[#allocation136_spill] sm:$0xff] %v7296_v5  ;;  %2974 = vmatmul.bf16.gmra.mxu1 %v7296_v5 }
 0x378   :  { %v2799_v12 = vadd.f32 %v2798_v49, %v2670_v62  ;;  %v5156_v62 = vld [vmem:[%s8530_s3 + $0x184] sm:$0xf] }
 0x37a   :  { %v2928_v58 = vadd.f32 %v2927_v19, %v2799_v12  ;;  %2711 = vmatmul.bf16.gmra.mxu3 %v7294_v34  ;;  %v2937_v63 = vpop.f32.mrf.mxu1 }
 0x37b   :  { %v7301_v9 = vpop.f32.mrf.mxu2 }
 0x37c   :  { %9024 = vst [vmem:[#allocation137_spill] sm:$0xff] %v7301_v9  ;;  %v4082_v41 = vmax.f32 %v2928_v58, 0.0 }
 0x37d   :  { %v2672_v44 = vpop.f32.mrf.mxu3 }
 0x37e   :  { %v2673_v33 = vadd.f32 %v2672_v44, %v2544_v26  ;;  %v7305_v28 = vpack.c.bf16 %v4082_v41, %v4079_v2  ;;  %v7308_v12 = vpop.f32.mrf.mxu0  ;;  %v9027_v26 = vld [vmem:[#allocation59_spill] sm:$0xff]  ;;  %v5161_v2 = vld [vmem:[%s8530_s3 + $0x1ac] sm:$0xf]  ;;  %v4888_v41 = vld [vmem:[%s8530_s3 + $0x1b8] sm:$0xf0] }
 0x37f   :  { %v2546_v29 = vadd.f32 %v9027_v26, %v7086_v42 }
 0x380   :  { %v2802_v52 = vadd.f32 %v2801_v30, %v2673_v33  ;;  %3133 = vmatmul.bf16.gmra.mxu2 %v6647_v11  ;;  %v4886_v30 = vld [vmem:[%s8530_s3 + $0x1a8] sm:$0xf]  ;;  %v7334_v33 = vor.u32 %v5156_v62, %v4864_v32 }
 0x382   :  { %v2931_v49 = vadd.f32 %v2930_v24, %v2802_v52  ;;  %v5163_v24 = vld [vmem:[%s8530_s3 + $0x1b4] sm:$0xf0]  ;;  %9029 = vst [vmem:[#allocation138_spill] sm:$0xff] %v7334_v33  ;;  %v7336_v26 = vpop.f32.mrf.mxu1 }
 0x383   :  { %v7310_v19 = vpop.f32.mrf.mxu2  ;;  %v7326_v58 = vor.u32 %v5163_v24, %v4886_v30 }
 0x384   :  { %9026 = vst [vmem:[#allocation57_spill] sm:$0xff] %v7310_v19  ;;  %v7338_v19 = vor.u32 %v5161_v2, %v4888_v41  ;;  %v4085_v32 = vmax.f32 %v2931_v49, 0.0  ;;  %v4880_v49 = vld [vmem:[%s8530_s3 + $0x1b0] sm:$0xf0] }
 0x385   :  { %v2674_v52 = vpop.f32.mrf.mxu3  ;;  %9028 = vst [vmem:[#allocation59_spill] sm:$0xff] %v7326_v58  ;;  %2850 = vmatmul.bf16.gmra.mxu0 %v7326_v58 }
 0x386   :  { %v2675_v44 = vadd.f32 %v2674_v52, %v2546_v29  ;;  %9030 = vst [vmem:[#allocation139_spill] sm:$0xff] %v7338_v19  ;;  %v7343_v24 = vpop.f32.mrf.mxu0  ;;  %v9032_v29 = vld [vmem:[#allocation61_spill] sm:$0xff] }
 0x387   :  { %2979 = vmatmul.bf16.gmra.mxu1 %v7338_v19  ;;  %v2549_v62 = vadd.f32 %v9032_v29, %v7055_v46 }
 0x388   :  { %v2804_v9 = vadd.f32 %v2803_v61, %v2675_v44 }
 0x38a   :  { %v2933_v30 = vadd.f32 %v2932_v35, %v2804_v9  ;;  %2716 = vmatmul.bf16.gmra.mxu3 %v7334_v33  ;;  %v2942_v41 = vpop.f32.mrf.mxu1 }
 0x38b   :  { %v7345_v42 = vpop.f32.mrf.mxu2 }
 0x38c   :  { %9031 = vst [vmem:[#allocation140_spill] sm:$0xff] %v7345_v42  ;;  %v4088_v52 = vmax.f32 %v2933_v30, 0.0  ;;  %v5160_v42 = vld [vmem:[%s8530_s3 + $0x1a4] sm:$0xf] }
 0x38d   :  { %v2677_v11 = vpop.f32.mrf.mxu3 }
 0x38e   :  { %v2678_v2 = vadd.f32 %v2677_v11, %v2549_v62  ;;  %v7349_v8 = vpack.c.bf16 %v4088_v52, %v4085_v32  ;;  %v7352_v35 = vpop.f32.mrf.mxu0  ;;  %v9034_v11 = vld [vmem:[#allocation63_spill] sm:$0xff]  ;;  %v5165_v32 = vld [vmem:[%s8530_s3 + $0x1cc] sm:$0xf]  ;;  %v4904_v52 = vld [vmem:[%s8530_s3 + $0x1d8] sm:$0xf0] }
 0x38f   :  { %v2551_v30 = vadd.f32 %v9034_v11, %v7134_v23  ;;  %v7384_v23 = vpop.permute.xlu2 %1936 }
 0x390   :  { %v2807_v61 = vadd.f32 %v2806_v25, %v2678_v2  ;;  %3138 = vmatmul.bf16.gmra.mxu2 %v6679_v1  ;;  %v4902_v25 = vld [vmem:[%s8530_s3 + $0x1c8] sm:$0xf]  ;;  %9038 = vst [vmem:[#allocation143_spill] sm:$0xff] %v7384_v23 }
 0x392   :  { %v2936_v9 = vadd.f32 %v2935_v6, %v2807_v61  ;;  %v5167_v6 = vld [vmem:[%s8530_s3 + $0x1d4] sm:$0xf0]  ;;  %v7378_v61 = vor.u32 %v5160_v42, %v4880_v49  ;;  %v7380_v11 = vpop.f32.mrf.mxu1 }
 0x393   :  { %v7354_v44 = vpop.f32.mrf.mxu2  ;;  %v7370_v62 = vor.u32 %v5167_v6, %v4902_v25 }
 0x394   :  { %9033 = vst [vmem:[#allocation61_spill] sm:$0xff] %v7354_v44  ;;  %v7382_v44 = vor.u32 %v5165_v32, %v4904_v52  ;;  %v4091_v42 = vmax.f32 %v2936_v9, 0.0  ;;  %v5164_v9 = vld [vmem:[%s8530_s3 + $0x1c4] sm:$0xf] }
 0x395   :  { %v2679_v29 = vpop.f32.mrf.mxu3  ;;  %9035 = vst [vmem:[#allocation63_spill] sm:$0xff] %v7370_v62  ;;  %2855 = vmatmul.bf16.gmra.mxu0 %v7370_v62 }
 0x396   :  { %v2680_v2 = vadd.f32 %v2679_v29, %v2551_v30  ;;  %9036 = vst [vmem:[#allocation141_spill] sm:$0xff] %v7378_v61  ;;  %v7389_v1 = vpop.f32.mrf.mxu0  ;;  %v9040_v29 = vld [vmem:[#allocation65_spill] sm:$0xff] }
 0x397   :  { %9037 = vst [vmem:[#allocation142_spill] sm:$0xff] %v7382_v44  ;;  %2984 = vmatmul.bf16.gmra.mxu1 %v7382_v44  ;;  %v2554_v32 = vadd.f32 %v9040_v29, %v7095_v13  ;;  %v5171_v29 = vld [vmem:[%s8530_s3 + $0x1f4] sm:$0xf0] }
 0x398   :  { %v2809_v25 = vadd.f32 %v2808_v38, %v2680_v2  ;;  %v7398_v38 = vpop.permute.xlu2 %1921  ;;  %v7402_v2 = vpop.permute.xlu1 %1911 }
 0x399   :  { %9041 = vst [vmem:[#allocation65_spill] sm:$0xff] %v7398_v38 }
 0x39a   :  { %v2938_v6 = vadd.f32 %v2937_v63, %v2809_v25  ;;  %2721 = vmatmul.bf16.gmra.mxu3 %v7378_v61  ;;  %v2947_v52 = vpop.f32.mrf.mxu1  ;;  %9042 = vst [vmem:[#allocation145_spill] sm:$0xff] %v7402_v2 }
 0x39b   :  { %v7391_v46 = vpop.f32.mrf.mxu2 }
 0x39c   :  { %9039 = vst [vmem:[#allocation144_spill] sm:$0xff] %v7391_v46  ;;  %v4094_v49 = vmax.f32 %v2938_v6, 0.0  ;;  %v4896_v6 = vld [vmem:[%s8530_s3 + $0x1d0] sm:$0xf0]  ;;  %v5169_v46 = vld [vmem:[%s8530_s3 + $0x1ec] sm:$0xf] }
 0x39d   :  { %v2682_v30 = vpop.f32.mrf.mxu3 }
 0x39e   :  { %v7395_v33 = vpack.c.bf16 %v4094_v49, %v4091_v42  ;;  %v2683_v62 = vadd.f32 %v2682_v30, %v2554_v32  ;;  %v7400_v63 = vpop.f32.mrf.mxu0  ;;  %v2556_v42 = vadd.f32 %v6492_v22, %v7040_v36  ;;  %v4918_v30 = vld [vmem:[%s8530_s3 + $0x1e8] sm:$0xf]  ;;  %v4920_v22 = vld [vmem:[%s8530_s3 + $0x1f8] sm:$0xf0] }
 0x3a0   :  { %3143 = vmatmul.bf16.gmra.mxu2 %v6715_v37  ;;  %v2812_v49 = vadd.f32 %v7308_v12, %v2683_v62  ;;  %v7429_v62 = vor.u32 %v5164_v9, %v4896_v6  ;;  %v7433_v37 = vor.u32 %v5169_v46, %v4920_v22 }
 0x3a2   :  { %9045 = vst [vmem:[#allocation148_spill] sm:$0xff] %v7429_v62 }
 0x3a3   :  { %v7404_v25 = vpop.f32.mrf.mxu2  ;;  %v7431_v36 = vpop.f32.mrf.mxu1  ;;  %9046 = vst [vmem:[#allocation149_spill] sm:$0xff] %v7433_v37 }
 0x3a4   :  { %9043 = vst [vmem:[#allocation146_spill] sm:$0xff] %v7404_v25  ;;  %v7421_v25 = vor.u32 %v5171_v29, %v4918_v30  ;;  %v2941_v30 = vadd.f32 %v7336_v26, %v2812_v49  ;;  %v2559_v26 = vadd.f32 %v6506_v50, %v7006_v31 }
 0x3a5   :  { %v2684_v32 = vpop.f32.mrf.mxu3 }
 0x3a6   :  { %9044 = vst [vmem:[#allocation147_spill] sm:$0xff] %v7421_v25  ;;  %v2685_v12 = vadd.f32 %v2684_v32, %v2556_v42  ;;  %2860 = vmatmul.bf16.gmra.mxu0 %v7421_v25  ;;  %v7440_v61 = vpop.f32.mrf.mxu0  ;;  %v7442_v42 = vpop.permute.xlu2 %1916  ;;  %v4097_v6 = vmax.f32 %v2941_v30, 0.0  ;;  %v5168_v30 = vld [vmem:[%s8530_s3 + $0x1e4] sm:$0xf] }
 0x3a7   :  { %2989 = vmatmul.bf16.gmra.mxu1 %v7433_v37  ;;  %9047 = vst [vmem:[#allocation150_spill] sm:$0xff] %v7442_v42  ;;  %v7446_v32 = vpop.permute.xlu1 %2036 }
 0x3a8   :  { %v2814_v29 = vadd.f32 %v7343_v24, %v2685_v12  ;;  %9049 = vst [vmem:[#allocation152_spill] sm:$0xff] %v7446_v32 }
 0x3aa   :  { %v2943_v13 = vadd.f32 %v2942_v41, %v2814_v29  ;;  %2726 = vmatmul.bf16.gmra.mxu3 %v7429_v62  ;;  %v9051_v29 = vld [vmem:[#allocation27_spill] sm:$0xff] }
 0x3ab   :  { %v7444_v9 = vpop.f32.mrf.mxu2  ;;  %v7450_v24 = vpop.f32.mrf.mxu1  ;;  %v2561_v50 = vadd.f32 %v9051_v29, %v7038_v7  ;;  %v5173_v29 = vld [vmem:[%s8530_s3 + $0x20c] sm:$0xf] }
 0x3ac   :  { %9048 = vst [vmem:[#allocation151_spill] sm:$0xff] %v7444_v9  ;;  %v4100_v46 = vmax.f32 %v2943_v13, 0.0  ;;  %v4912_v13 = vld [vmem:[%s8530_s3 + $0x1f0] sm:$0xf0] }
 0x3ad   :  { %v2687_v22 = vpop.f32.mrf.mxu3  ;;  %v7484_v7 = vor.u32 %v5168_v30, %v4912_v13 }
 0x3ae   :  { %v7452_v49 = vpack.c.bf16 %v4100_v46, %v4097_v6  ;;  %v2688_v41 = vadd.f32 %v2687_v22, %v2559_v26  ;;  %v4934_v46 = vld [vmem:[%s8530_s3 + $0x208] sm:$0xf]  ;;  %v5175_v22 = vld [vmem:[%s8530_s3 + $0x214] sm:$0xf0]  ;;  %v7474_v26 = vpop.permute.xlu2 %1901 }
 0x3af   :  { %9053 = vst [vmem:[#allocation154_spill] sm:$0xff] %v7484_v7  ;;  %v7488_v37 = vpop.permute.xlu1 %2021 }
 0x3b0   :  { %3148 = vmatmul.bf16.gmra.mxu2 %v6747_v3  ;;  %v2817_v9 = vadd.f32 %v7352_v35, %v2688_v41  ;;  %v7466_v6 = vpop.f32.mrf.mxu0  ;;  %v7476_v3 = vor.u32 %v5175_v22, %v4934_v46  ;;  %v4936_v35 = vld [vmem:[%s8530_s3 + $0x218] sm:$0xf0]  ;;  %9055 = vst [vmem:[#allocation156_spill] sm:$0xff] %v7488_v37 }
 0x3b1   :  { %v7486_v62 = vor.u32 %v5173_v29, %v4936_v35  ;;  %v2564_v35 = vadd.f32 %v6545_v14, %v7002_v40  ;;  %v4928_v14 = vld [vmem:[%s8530_s3 + $0x210] sm:$0xf0] }
 0x3b2   :  { %9052 = vst [vmem:[#allocation27_spill] sm:$0xff] %v7476_v3  ;;  %v2946_v46 = vadd.f32 %v7380_v11, %v2817_v9 }
 0x3b3   :  { %v7455_v12 = vpop.f32.mrf.mxu2  ;;  %9054 = vst [vmem:[#allocation155_spill] sm:$0xff] %v7486_v62 }
 0x3b4   :  { %9050 = vst [vmem:[#allocation153_spill] sm:$0xff] %v7455_v12  ;;  %v2955_v31 = vpop.f32.mrf.mxu1 }
 0x3b5   :  { %v2689_v12 = vpop.f32.mrf.mxu3 }
 0x3b6   :  { %v2690_v41 = vadd.f32 %v2689_v12, %v2561_v50  ;;  %2865 = vmatmul.bf16.gmra.mxu0 %v7476_v3  ;;  %v4103_v12 = vmax.f32 %v2946_v46, 0.0  ;;  %v7499_v50 = vpop.permute.xlu0 %1926 }
 0x3b7   :  { %2994 = vmatmul.bf16.gmra.mxu1 %v7486_v62  ;;  %9057 = vst [vmem:[#allocation158_spill] sm:$0xff] %v7499_v50 }
 0x3b8   :  { %v2819_v22 = vadd.f32 %v7389_v1, %v2690_v41  ;;  %v7497_v13 = vpop.f32.mrf.mxu0  ;;  %v7505_v1 = vpop.permute.xlu2 %2026 }
 0x3b9   :  { %9058 = vst [vmem:[#allocation159_spill] sm:$0xff] %v7505_v1  ;;  %v7508_v41 = vpop.permute.xlu1 %1896 }
 0x3ba   :  { %v2948_v25 = vadd.f32 %v2947_v52, %v2819_v22  ;;  %2731 = vmatmul.bf16.gmra.mxu3 %v7484_v7  ;;  %v2566_v22 = vadd.f32 %v6566_v60, %v7082_v56  ;;  %v4952_v60 = vld [vmem:[%s8530_s3 + $0x238] sm:$0xf0] }
 0x3bb   :  { %v7495_v44 = vpop.f32.mrf.mxu2 }
 0x3bc   :  { %9056 = vst [vmem:[#allocation157_spill] sm:$0xff] %v7495_v44  ;;  %v4106_v30 = vmax.f32 %v2948_v25, 0.0  ;;  %v7503_v9 = vpop.f32.mrf.mxu1  ;;  %v5172_v25 = vld [vmem:[%s8530_s3 + $0x204] sm:$0xf] }
 0x3bd   :  { %v2692_v29 = vpop.f32.mrf.mxu3 }
 0x3be   :  { %v4229_v11 = vpack.c.bf16 %v4106_v30, %v4103_v12  ;;  %v2693_v52 = vadd.f32 %v2692_v29, %v2564_v35  ;;  %v4950_v29 = vld [vmem:[%s8530_s3 + $0x228] sm:$0xf]  ;;  %v5179_v35 = vld [vmem:[%s8530_s3 + $0x234] sm:$0xf0]  ;;  %v7541_v7 = vpop.permute.xlu0 %2031 }
 0x3bf   :  { %v7529_v44 = vor.u32 %v5179_v35, %v4950_v29  ;;  %9062 = vst [vmem:[#allocation163_spill] sm:$0xff] %v7541_v7 }
 0x3c0   :  { %3153 = vmatmul.bf16.gmra.mxu2 %v6777_v55  ;;  %v2822_v12 = vadd.f32 %v7400_v63, %v2693_v52  ;;  %v7521_v30 = vpop.f32.mrf.mxu0  ;;  %v5177_v55 = vld [vmem:[%s8530_s3 + $0x22c] sm:$0xf]  ;;  %v7537_v52 = vor.u32 %v5172_v25, %v4928_v14  ;;  %v7546_v62 = vpop.permute.xlu2 %2011 }
 0x3c1   :  { %9060 = vst [vmem:[#allocation161_spill] sm:$0xff] %v7529_v44  ;;  %v7539_v40 = vor.u32 %v5177_v55, %v4952_v60 }
 0x3c2   :  { %9061 = vst [vmem:[#allocation162_spill] sm:$0xff] %v7537_v52  ;;  %v2951_v29 = vadd.f32 %v7431_v36, %v2822_v12 }
 0x3c3   :  { %v7510_v46 = vpop.f32.mrf.mxu2  ;;  %9063 = vst [vmem:[#allocation164_spill] sm:$0xff] %v7546_v62 }
 0x3c4   :  { %9059 = vst [vmem:[#allocation160_spill] sm:$0xff] %v7510_v46  ;;  %v2960_v56 = vpop.f32.mrf.mxu1  ;;  %v4109_v14 = vmax.f32 %v2951_v29, 0.0  ;;  %v4944_v29 = vld [vmem:[%s8530_s3 + $0x230] sm:$0xf0] }
 0x3c5   :  { %v2694_v46 = vpop.f32.mrf.mxu3 }
 0x3c6   :  { %v2695_v63 = vadd.f32 %v2694_v46, %v2566_v22  ;;  %2870 = vmatmul.bf16.gmra.mxu0 %v7529_v44  ;;  %v7551_v46 = vpop.permute.xlu1 %1881 }
 0x3c7   :  { %2999 = vmatmul.bf16.gmra.mxu1 %v7539_v40  ;;  %v2569_v25 = vadd.f32 %v6591_v53, %v7551_v46 }
 0x3c8   :  { %v2824_v35 = vadd.f32 %v7440_v61, %v2695_v63  ;;  %v7557_v36 = vpop.f32.mrf.mxu0 }
 0x3ca   :  { %v2953_v3 = vadd.f32 %v7450_v24, %v2824_v35  ;;  %2736 = vmatmul.bf16.gmra.mxu3 %v7537_v52  ;;  %v7563_v35 = vpop.permute.xlu0 %1906  ;;  %v7565_v52 = vpop.permute.xlu2 %1886 }
 0x3cb   :  { %v7553_v55 = vpop.f32.mrf.mxu2  ;;  %9065 = vst [vmem:[#allocation166_spill] sm:$0xff] %v7565_v52 }
 0x3cc   :  { %9064 = vst [vmem:[#allocation165_spill] sm:$0xff] %v7553_v55  ;;  %v4112_v22 = vmax.f32 %v2953_v3, 0.0  ;;  %v7559_v63 = vpop.f32.mrf.mxu1  ;;  %v5176_v3 = vld [vmem:[%s8530_s3 + $0x224] sm:$0xf] }
 0x3cd   :  { %v2697_v61 = vpop.f32.mrf.mxu3 }
 0x3ce   :  { %v4232_v12 = vpack.c.bf16 %v4112_v22, %v4109_v14  ;;  %v2698_v60 = vadd.f32 %v2697_v61, %v2569_v25  ;;  %v5183_v14 = vld [vmem:[%s8530_s3 + $0x254] sm:$0xf0] }
 0x3d0   :  { %v2827_v24 = vadd.f32 %v7466_v6, %v2698_v60  ;;  %3158 = vmatmul.bf16.gmra.mxu2 %v6795_v57  ;;  %v2571_v6 = vadd.f32 %v6611_v47, %v7565_v52  ;;  %v4968_v47 = vld [vmem:[%s8530_s3 + $0x258] sm:$0xf0] }
 0x3d1   :  { %4294 = vmatpush.bf16.msra.mxu2 %v4232_v12  ;;  %v5181_v12 = vld [vmem:[%s8530_s3 + $0x24c] sm:$0xf] }
 0x3d2   :  { %v2956_v55 = vadd.f32 %v2955_v31, %v2827_v24  ;;  %v7577_v25 = vpop.f32.mrf.mxu0  ;;  %v4966_v31 = vld [vmem:[%s8530_s3 + $0x248] sm:$0xf]  ;;  %v7593_v24 = vor.u32 %v5176_v3, %v4944_v29  ;;  %v7595_v52 = vor.u32 %v5181_v12, %v4968_v47 }
 0x3d3   :  { %v7567_v53 = vpop.f32.mrf.mxu2  ;;  %v7585_v61 = vor.u32 %v5183_v14, %v4966_v31  ;;  %v7603_v14 = vpop.permute.xlu0 %1891 }
 0x3d4   :  { %9066 = vst [vmem:[#allocation167_spill] sm:$0xff] %v7567_v53  ;;  %v2965_v53 = vpop.f32.mrf.mxu1  ;;  %v2574_v3 = vadd.f32 %v6624_v48, %v7603_v14  ;;  %v4115_v29 = vmax.f32 %v2956_v55, 0.0  ;;  %v5180_v48 = vld [vmem:[%s8530_s3 + $0x244] sm:$0xf]  ;;  %v2576_v55 = vadd.f32 %v6645_v4, %v7508_v41  ;;  %v4984_v4 = vld [vmem:[%s8530_s3 + $0x278] sm:$0xf0] }
 0x3d5   :  { %4295 = vmatpush.bf16.msra.mxu2 %v4229_v11  ;;  %v2699_v22 = vpop.f32.mrf.mxu3 }
 0x3d6   :  { %v2700_v60 = vadd.f32 %v2699_v22, %v2571_v6  ;;  %2875 = vmatmul.bf16.gmra.mxu0 %v7585_v61 }
 0x3d7   :  { %3004 = vmatmul.bf16.gmra.mxu1 %v7595_v52 }
 0x3d8   :  { %v2829_v11 = vadd.f32 %v7497_v13, %v2700_v60 }
 0x3d9   :  { %4296 = vmatpush.bf16.msra.mxu2 %v7452_v49 }
 0x3da   :  { %v2958_v31 = vadd.f32 %v7503_v9, %v2829_v11  ;;  %2741 = vmatmul.bf16.gmra.mxu3 %v7593_v24  ;;  %v2838_v12 = vpop.f32.mrf.mxu0 }
 0x3db   :  { %v7605_v6 = vpop.f32.mrf.mxu2 }
 0x3dc   :  { %9067 = vst [vmem:[#allocation168_spill] sm:$0xff] %v7605_v6  ;;  %v4118_v22 = vmax.f32 %v2958_v31, 0.0  ;;  %v2967_v47 = vpop.f32.mrf.mxu1 }
 0x3dd   :  { %4297 = vmatpush.bf16.msra.mxu2 %v7395_v33  ;;  %v2702_v13 = vpop.f32.mrf.mxu3  ;;  %v4960_v33 = vld [vmem:[%s8530_s3 + $0x250] sm:$0xf0] }
 0x3de   :  { %v2703_v49 = vadd.f32 %v2702_v13, %v2574_v3  ;;  %v7610_v60 = vpack.c.bf16 %v4118_v22, %v4115_v29  ;;  %v5185_v3 = vld [vmem:[%s8530_s3 + $0x26c] sm:$0xf]  ;;  %v7640_v22 = vor.u32 %v5180_v48, %v4960_v33  ;;  %v2579_v48 = vadd.f32 %v6662_v10, %v7474_v26  ;;  %v5184_v10 = vld [vmem:[%s8530_s3 + $0x264] sm:$0xf] }
 0x3e0   :  { %v2832_v9 = vadd.f32 %v7521_v30, %v2703_v49  ;;  %3559 = vmatmul.bf16.vlgmr.msrb.gmra.mxu2 %v6062_v21  ;;  %v4982_v21 = vld [vmem:[%s8530_s3 + $0x268] sm:$0xf]  ;;  %v7642_v49 = vor.u32 %v5185_v3, %v4984_v4 }
 0x3e1   :  { %4298 = vmatpush.bf16.msra.mxu2 %v7349_v8 }
 0x3e2   :  { %v2961_v11 = vadd.f32 %v2960_v56, %v2832_v9  ;;  %v2841_v31 = vpop.f32.mrf.mxu0  ;;  %v5187_v56 = vld [vmem:[%s8530_s3 + $0x274] sm:$0xf0] }
 0x3e3   :  { %v7615_v6 = vpop.f32.mrf.mxu2  ;;  %v7632_v30 = vor.u32 %v5187_v56, %v4982_v21 }
 0x3e4   :  { %9068 = vst [vmem:[#allocation169_spill] sm:$0xff] %v7615_v6  ;;  %v2970_v13 = vpop.f32.mrf.mxu1  ;;  %v4121_v33 = vmax.f32 %v2961_v11, 0.0  ;;  %v2581_v11 = vadd.f32 %v6676_v0, %v7563_v35  ;;  %v5000_v0 = vld [vmem:[%s8530_s3 + $0x298] sm:$0xf0] }
 0x3e5   :  { %4299 = vmatpush.bf16.msra.mxu2 %v7305_v28  ;;  %v2704_v8 = vpop.f32.mrf.mxu3 }
 0x3e6   :  { %v2705_v29 = vadd.f32 %v2704_v8, %v2576_v55  ;;  %2880 = vmatmul.bf16.gmra.mxu0 %v7632_v30 }
 0x3e7   :  { %3009 = vmatmul.bf16.gmra.mxu1 %v7642_v49 }
 0x3e8   :  { %v2834_v28 = vadd.f32 %v7557_v36, %v2705_v29 }
 0x3e9   :  { %4300 = vmatpush.bf16.msra.mxu2 %v7266_v15 }
 0x3ea   :  { %v2963_v9 = vadd.f32 %v7559_v63, %v2834_v28  ;;  %2746 = vmatmul.bf16.gmra.mxu3 %v7640_v22  ;;  %v2843_v56 = vpop.f32.mrf.mxu0 }
 0x3eb   :  { %v7650_v21 = vpop.f32.mrf.mxu2 }
 0x3ec   :  { %9069 = vst [vmem:[#allocation170_spill] sm:$0xff] %v7650_v21  ;;  %v4124_v55 = vmax.f32 %v2963_v9, 0.0  ;;  %v2972_v3 = vpop.f32.mrf.mxu1 }
 0x3ed   :  { %4301 = vmatpush.bf16.msra.mxu2 %v7228_v27  ;;  %v2707_v8 = vpop.f32.mrf.mxu3  ;;  %v4976_v27 = vld [vmem:[%s8530_s3 + $0x270] sm:$0xf0] }
 0x3ee   :  { %v2708_v36 = vadd.f32 %v2707_v8, %v2579_v48  ;;  %v7655_v15 = vpack.c.bf16 %v4124_v55, %v4121_v33  ;;  %v5189_v48 = vld [vmem:[%s8530_s3 + $0x28c] sm:$0xf]  ;;  %v7683_v55 = vor.u32 %v5184_v10, %v4976_v27 }
 0x3f0   :  { %v2837_v4 = vadd.f32 %v7577_v25, %v2708_v36  ;;  %3564 = vmatmul.bf16.gmra.mxu2 %v6086_v16  ;;  %v4998_v25 = vld [vmem:[%s8530_s3 + $0x288] sm:$0xf]  ;;  %v5191_v16 = vld [vmem:[%s8530_s3 + $0x294] sm:$0xf0]  ;;  %9072 = vst [vmem:[#allocation173_spill] sm:$0xff] %v7683_v55  ;;  %v7685_v36 = vor.u32 %v5189_v48, %v5000_v0 }
 0x3f1   :  { %v7675_v9 = vor.u32 %v5191_v16, %v4998_v25 }
 0x3f2   :  { %v2966_v63 = vadd.f32 %v2965_v53, %v2837_v4  ;;  %v2846_v28 = vpop.f32.mrf.mxu0  ;;  %9073 = vst [vmem:[#allocation174_spill] sm:$0xff] %v7685_v36 }
 0x3f3   :  { %v7659_v29 = vpop.f32.mrf.mxu2  ;;  %9071 = vst [vmem:[#allocation172_spill] sm:$0xff] %v7675_v9 }
 0x3f4   :  { %9070 = vst [vmem:[#allocation171_spill] sm:$0xff] %v7659_v29  ;;  %v2975_v8 = vpop.f32.mrf.mxu1  ;;  %v2584_v29 = vadd.f32 %v6694_v45, %v7402_v2  ;;  %v4127_v21 = vmax.f32 %v2966_v63, 0.0  ;;  %v4992_v45 = vld [vmem:[%s8530_s3 + $0x290] sm:$0xf0]  ;;  %v2586_v63 = vadd.f32 %v6713_v20, %v7442_v42  ;;  %v5016_v20 = vld [vmem:[%s8530_s3 + $0x2b8] sm:$0xf0] }
 0x3f5   :  { %v2709_v53 = vpop.f32.mrf.mxu3 }
 0x3f6   :  { %v2710_v33 = vadd.f32 %v2709_v53, %v2581_v11  ;;  %2885 = vmatmul.bf16.gmra.mxu0 %v7675_v9 }
 0x3f7   :  { %3014 = vmatmul.bf16.gmra.mxu1 %v7685_v36 }
 0x3f8   :  { %v2839_v4 = vadd.f32 %v2838_v12, %v2710_v33  ;;  %v5188_v33 = vld [vmem:[%s8530_s3 + $0x284] sm:$0xf] }
 0x3fa   :  { %v2968_v25 = vadd.f32 %v2967_v47, %v2839_v4  ;;  %2751 = vmatmul.bf16.gmra.mxu3 %v7683_v55  ;;  %v2848_v10 = vpop.f32.mrf.mxu0 }
 0x3fb   :  { %v7690_v16 = vpop.f32.mrf.mxu2 }
 0x3fc   :  { %9074 = vst [vmem:[#allocation175_spill] sm:$0xff] %v7690_v16  ;;  %v4130_v11 = vmax.f32 %v2968_v25, 0.0  ;;  %v2977_v48 = vpop.f32.mrf.mxu1  ;;  %v7721_v25 = vor.u32 %v5188_v33, %v4992_v45 }
 0x3fd   :  { %v2712_v27 = vpop.f32.mrf.mxu3 }
 0x3fe   :  { %v2713_v53 = vadd.f32 %v2712_v27, %v2584_v29  ;;  %v7694_v0 = vpack.c.bf16 %v4130_v11, %v4127_v21  ;;  %v5193_v21 = vld [vmem:[%s8530_s3 + $0x2ac] sm:$0xf]  ;;  %9077 = vst [vmem:[#allocation178_spill] sm:$0xff] %v7721_v25 }
 0x3ff   :  { %v7725_v27 = vor.u32 %v5193_v21, %v5016_v20 }
 0x400   :  { %v2842_v6 = vadd.f32 %v2841_v31, %v2713_v53  ;;  %3569 = vmatmul.bf16.gmra.mxu2 %v8885_v17  ;;  %v5014_v31 = vld [vmem:[%s8530_s3 + $0x2a8] sm:$0xf]  ;;  %v5195_v17 = vld [vmem:[%s8530_s3 + $0x2b4] sm:$0xf0] }
 0x401   :  { %9078 = vst [vmem:[#allocation179_spill] sm:$0xff] %v7725_v27 }
 0x402   :  { %v2971_v12 = vadd.f32 %v2970_v13, %v2842_v6  ;;  %v2851_v29 = vpop.f32.mrf.mxu0  ;;  %v7713_v13 = vor.u32 %v5195_v17, %v5014_v31 }
 0x403   :  { %v7697_v47 = vpop.f32.mrf.mxu2 }
 0x404   :  { %9075 = vst [vmem:[#allocation176_spill] sm:$0xff] %v7697_v47  ;;  %v7723_v11 = vpop.f32.mrf.mxu1  ;;  %v2589_v47 = vadd.f32 %v6725_v43, %v7398_v38  ;;  %v5008_v43 = vld [vmem:[%s8530_s3 + $0x2b0] sm:$0xf0] }
 0x405   :  { %v2714_v6 = vpop.f32.mrf.mxu3  ;;  %9076 = vst [vmem:[#allocation177_spill] sm:$0xff] %v7713_v13 }
 0x406   :  { %v2715_v4 = vadd.f32 %v2714_v6, %v2586_v63  ;;  %2890 = vmatmul.bf16.gmra.mxu0 %v7713_v13  ;;  %v4133_v63 = vmax.f32 %v2971_v12, 0.0  ;;  %v2591_v12 = vadd.f32 %v6743_v54, %v7499_v50  ;;  %v5032_v54 = vld [vmem:[%s8530_s3 + $0x2d8] sm:$0xf0] }
 0x407   :  { %3019 = vmatmul.bf16.gmra.mxu1 %v7725_v27  ;;  %v9105_v27 = vld [vmem:[#allocation54_spill] sm:$0xff] }
 0x408   :  { %v2844_v53 = vadd.f32 %v2843_v56, %v2715_v4  ;;  %v5192_v4 = vld [vmem:[%s8530_s3 + $0x2a4] sm:$0xf] }
 0x40a   :  { %v2973_v31 = vadd.f32 %v2972_v3, %v2844_v53  ;;  %2756 = vmatmul.bf16.gmra.mxu3 %v7721_v25  ;;  %v2853_v45 = vpop.f32.mrf.mxu0 }
 0x40b   :  { %v7730_v17 = vpop.f32.mrf.mxu2 }
 0x40c   :  { %9079 = vst [vmem:[#allocation180_spill] sm:$0xff] %v7730_v17  ;;  %v4136_v33 = vmax.f32 %v2973_v31, 0.0  ;;  %v2982_v21 = vpop.f32.mrf.mxu1  ;;  %v7763_v31 = vor.u32 %v5192_v4, %v5008_v43  ;;  %v9085_v4 = vld [vmem:[#allocation123_spill] sm:$0xff]  ;;  %v9086_v43 = vld [vmem:[#allocation62_spill] sm:$0xff] }
 0x40d   :  { %v2717_v6 = vpop.f32.mrf.mxu3 }
 0x40e   :  { %v2718_v16 = vadd.f32 %v2717_v6, %v2589_v47  ;;  %v7734_v20 = vpack.c.bf16 %v4136_v33, %v4133_v63  ;;  %9082 = vst [vmem:[#allocation183_spill] sm:$0xff] %v7763_v31 }
 0x410   :  { %v2847_v13 = vadd.f32 %v2846_v28, %v2718_v16  ;;  %3574 = vmatmul.bf16.gmra.mxu2 %v8893_v59  ;;  %v5030_v59 = vld [vmem:[%s8530_s3 + $0x2c8] sm:$0xf]  ;;  %v5199_v28 = vld [vmem:[%s8530_s3 + $0x2d4] sm:$0xf0] }
 0x411   :  { %v7755_v16 = vor.u32 %v5199_v28, %v5030_v59 }
 0x412   :  { %v2976_v56 = vadd.f32 %v2975_v8, %v2847_v13  ;;  %v7747_v47 = vpop.f32.mrf.mxu0  ;;  %v5197_v13 = vld [vmem:[%s8530_s3 + $0x2cc] sm:$0xf] }
 0x413   :  { %v7737_v3 = vpop.f32.mrf.mxu2  ;;  %9081 = vst [vmem:[#allocation182_spill] sm:$0xff] %v7755_v16  ;;  %v7767_v33 = vor.u32 %v5197_v13, %v5032_v54 }
 0x414   :  { %9080 = vst [vmem:[#allocation181_spill] sm:$0xff] %v7737_v3  ;;  %v7765_v63 = vpop.f32.mrf.mxu1  ;;  %v4139_v3 = vmax.f32 %v2976_v56, 0.0  ;;  %v5024_v56 = vld [vmem:[%s8530_s3 + $0x2d0] sm:$0xf0] }
 0x415   :  { %v2719_v8 = vpop.f32.mrf.mxu3  ;;  %9083 = vst [vmem:[#allocation184_spill] sm:$0xff] %v7767_v33 }
 0x416   :  { %v2720_v53 = vadd.f32 %v2719_v8, %v2591_v12  ;;  %2895 = vmatmul.bf16.gmra.mxu0 %v7755_v16  ;;  %v2594_v8 = vadd.f32 %v9086_v43, %v9085_v4  ;;  %v9087_v16 = vld [vmem:[#allocation41_spill] sm:$0xff]  ;;  %v7811_v4 = vpop.permute.xlu0 %2016 }
 0x417   :  { %3024 = vmatmul.bf16.gmra.mxu1 %v7767_v33  ;;  %9093 = vst [vmem:[#allocation187_spill] sm:$0xff] %v7811_v4 }
 0x418   :  { %v2849_v6 = vadd.f32 %v2848_v10, %v2720_v53  ;;  %v9089_v53 = vld [vmem:[#allocation17_spill] sm:$0xff] }
 0x41a   :  { %v2978_v59 = vadd.f32 %v2977_v48, %v2849_v6  ;;  %2761 = vmatmul.bf16.gmra.mxu3 %v7763_v31  ;;  %v2858_v50 = vpop.f32.mrf.mxu0  ;;  %v5196_v48 = vld [vmem:[%s8530_s3 + $0x2c4] sm:$0xf]  ;;  %v2596_v6 = vadd.f32 %v9089_v53, %v7384_v23 }
 0x41b   :  { %v7772_v28 = vpop.f32.mrf.mxu2  ;;  %v7803_v53 = vor.u32 %v5196_v48, %v5024_v56 }
 0x41c   :  { %9084 = vst [vmem:[#allocation185_spill] sm:$0xff] %v7772_v28  ;;  %v4142_v17 = vmax.f32 %v2978_v59, 0.0  ;;  %v2987_v38 = vpop.f32.mrf.mxu1 }
 0x41d   :  { %v2722_v12 = vpop.f32.mrf.mxu3  ;;  %9091 = vst [vmem:[#allocation17_spill] sm:$0xff] %v7803_v53 }
 0x41e   :  { %v7776_v13 = vpack.c.bf16 %v4142_v17, %v4139_v3  ;;  %v2723_v54 = vadd.f32 %v2722_v12, %v2594_v8  ;;  %v5046_v17 = vld [vmem:[%s8530_s3 + $0x2e8] sm:$0xf]  ;;  %v5203_v3 = vld [vmem:[%s8530_s3 + $0x2f4] sm:$0xf0]  ;;  %v5201_v8 = vld [vmem:[%s8530_s3 + $0x2ec] sm:$0xf] }
 0x41f   :  { %v7795_v12 = vor.u32 %v5203_v3, %v5046_v17 }
 0x420   :  { %3579 = vmatmul.bf16.gmra.mxu2 %v9087_v16  ;;  %v2852_v59 = vadd.f32 %v2851_v29, %v2723_v54  ;;  %v5048_v29 = vld [vmem:[%s8530_s3 + $0x2f8] sm:$0xf0] }
 0x421   :  { %9090 = vst [vmem:[#allocation41_spill] sm:$0xff] %v7795_v12  ;;  %v7805_v28 = vor.u32 %v5201_v8, %v5048_v29  ;;  %v9095_v8 = vld [vmem:[#allocation111_spill] sm:$0xff]  ;;  %v9096_v29 = vld [vmem:[#allocation58_spill] sm:$0xff] }
 0x422   :  { %v2981_v23 = vadd.f32 %v7723_v11, %v2852_v59  ;;  %v2599_v33 = vadd.f32 %v9096_v29, %v9095_v8  ;;  %v5200_v59 = vld [vmem:[%s8530_s3 + $0x2e4] sm:$0xf]  ;;  %v9104_v8 = vld [vmem:[#allocation33_spill] sm:$0xff] }
 0x423   :  { %v7779_v10 = vpop.f32.mrf.mxu2  ;;  %v2861_v43 = vpop.f32.mrf.mxu0  ;;  %9092 = vst [vmem:[#allocation186_spill] sm:$0xff] %v7805_v28 }
 0x424   :  { %9088 = vst [vmem:[#allocation62_spill] sm:$0xff] %v7779_v10  ;;  %v2990_v10 = vpop.f32.mrf.mxu1 }
 0x425   :  { %v2724_v16 = vpop.f32.mrf.mxu3 }
 0x426   :  { %v2725_v54 = vadd.f32 %v2724_v16, %v2596_v6  ;;  %2900 = vmatmul.bf16.gmra.mxu0 %v7795_v12  ;;  %v4145_v6 = vmax.f32 %v2981_v23, 0.0  ;;  %v5040_v23 = vld [vmem:[%s8530_s3 + $0x2f0] sm:$0xf0] }
 0x427   :  { %3029 = vmatmul.bf16.gmra.mxu1 %v7805_v28 }
 0x428   :  { %v2854_v17 = vadd.f32 %v2853_v45, %v2725_v54  ;;  %v9097_v45 = vld [vmem:[#allocation43_spill] sm:$0xff] }
 0x429   :  { %v9099_v54 = vld [vmem:[#allocation115_spill] sm:$0xff] }
 0x42a   :  { %v2983_v3 = vadd.f32 %v2982_v21, %v2854_v17  ;;  %2766 = vmatmul.bf16.gmra.mxu3 %v7803_v53  ;;  %v9100_v17 = vld [vmem:[#allocation31_spill] sm:$0xff] }
 0x42b   :  { %v7813_v31 = vpop.f32.mrf.mxu2  ;;  %v2863_v56 = vpop.f32.mrf.mxu0 }
 0x42c   :  { %9094 = vst [vmem:[#allocation188_spill] sm:$0xff] %v7813_v31  ;;  %v4148_v48 = vmax.f32 %v2983_v3, 0.0  ;;  %v2992_v12 = vpop.f32.mrf.mxu1  ;;  %v2601_v3 = vadd.f32 %v9100_v17, %v9099_v54  ;;  %v7835_v31 = vpop.permute.xlu2 %1991 }
 0x42d   :  { %v2727_v16 = vpop.f32.mrf.mxu3  ;;  %9103 = vst [vmem:[#allocation189_spill] sm:$0xff] %v7835_v31 }
 0x42e   :  { %v7817_v25 = vpack.c.bf16 %v4148_v48, %v4145_v6  ;;  %v2728_v11 = vadd.f32 %v2727_v16, %v2599_v33  ;;  %v7831_v48 = vpop.permute.xlu0 %2001 }
 0x42f   :  { %9101 = vst [vmem:[#allocation43_spill] sm:$0xff] %v7831_v48 }
 0x430   :  { %3584 = vmatmul.bf16.gmra.mxu2 %v9097_v45  ;;  %v2857_v29 = vadd.f32 %v7747_v47, %v2728_v11  ;;  %v7833_v45 = vor.u32 %v5200_v59, %v5040_v23  ;;  %v9107_v23 = vld [vmem:[#allocation122_spill] sm:$0xff] }
 0x432   :  { %9102 = vst [vmem:[#allocation31_spill] sm:$0xff] %v7833_v45  ;;  %v2986_v53 = vadd.f32 %v7765_v63, %v2857_v29 }
 0x433   :  { %v7820_v21 = vpop.f32.mrf.mxu2  ;;  %v2866_v6 = vpop.f32.mrf.mxu0 }
 0x434   :  { %9098 = vst [vmem:[#allocation58_spill] sm:$0xff] %v7820_v21  ;;  %v2995_v21 = vpop.f32.mrf.mxu1  ;;  %v4151_v11 = vmax.f32 %v2986_v53, 0.0  ;;  %v7848_v29 = vpop.permute.xlu2 %1986 }
 0x435   :  { %v2729_v33 = vpop.f32.mrf.mxu3 }
 0x436   :  { %v2730_v16 = vadd.f32 %v2729_v33, %v2601_v3  ;;  %3301 = vmatmul.bf16.vlgmr.msra.gmra.mxu0 %v9104_v8  ;;  %v9108_v33 = vld [vmem:[#allocation34_spill] sm:$0xff]  ;;  %v7845_v8 = vpop.permute.xlu0 %1996 }
 0x437   :  { %3430 = vmatmul.bf16.vlgmr.msra.gmra.mxu1 %v9105_v27  ;;  %v2604_v42 = vadd.f32 %v9108_v33, %v9107_v23  ;;  %9109 = vst [vmem:[#allocation34_spill] sm:$0xff] %v7845_v8  ;;  %v9115_v33 = vld [vmem:[#allocation12_spill] sm:$0xff] }
 0x438   :  { %v2859_v28 = vadd.f32 %v2858_v50, %v2730_v16  ;;  %v9110_v50 = vld [vmem:[#allocation14_spill] sm:$0xff]  ;;  %v9114_v16 = vld [vmem:[#allocation35_spill] sm:$0xff] }
 0x439   :  { %9111 = vst [vmem:[#allocation14_spill] sm:$0xff] %v7848_v29 }
 0x43a   :  { %v2988_v17 = vadd.f32 %v2987_v38, %v2859_v28  ;;  %2771 = vmatmul.bf16.gmra.mxu3 %v7833_v45  ;;  %v9113_v28 = vld [vmem:[#allocation102_spill] sm:$0xff] }
 0x43b   :  { %v7841_v47 = vpop.f32.mrf.mxu2  ;;  %v2868_v3 = vpop.f32.mrf.mxu0  ;;  %v2606_v53 = vadd.f32 %v9114_v16, %v9113_v28 }
 0x43c   :  { %9106 = vst [vmem:[#allocation190_spill] sm:$0xff] %v7841_v47  ;;  %v4154_v54 = vmax.f32 %v2988_v17, 0.0  ;;  %v2997_v55 = vpop.f32.mrf.mxu1 }
 0x43d   :  { %v2732_v59 = vpop.f32.mrf.mxu3 }
 0x43e   :  { %v4253_v2 = vpack.c.bf16 %v4154_v54, %v4151_v11  ;;  %v2733_v63 = vadd.f32 %v2732_v59, %v2604_v42  ;;  %v7855_v23 = vpop.permute.xlu0 %1971  ;;  %v9116_v42 = vld [vmem:[#allocation13_spill] sm:$0xff] }
 0x440   :  { %3589 = vmatmul.bf16.gmra.mxu2 %v9110_v50  ;;  %v2862_v17 = vadd.f32 %v2861_v43, %v2733_v63  ;;  %v9117_v50 = vld [vmem:[#allocation28_spill] sm:$0xff]  ;;  %v9120_v43 = vld [vmem:[#allocation39_spill] sm:$0xff] }
 0x442   :  { %v2991_v54 = vadd.f32 %v2990_v10, %v2862_v17  ;;  %v7865_v17 = vpop.permute.xlu1 %2006 }
 0x443   :  { %v7850_v38 = vpop.f32.mrf.mxu2  ;;  %v2871_v47 = vpop.f32.mrf.mxu0  ;;  %9121 = vst [vmem:[#allocation39_spill] sm:$0xff] %v7865_v17 }
 0x444   :  { %9112 = vst [vmem:[#allocation191_spill] sm:$0xff] %v7850_v38  ;;  %v3000_v36 = vpop.f32.mrf.mxu1  ;;  %v7859_v38 = vpop.permute.xlu2 %1961 }
 0x445   :  { %v2734_v45 = vpop.f32.mrf.mxu3  ;;  %9118 = vst [vmem:[#allocation35_spill] sm:$0xff] %v7859_v38  ;;  %v2609_v63 = vadd.f32 %v9120_v43, %v7859_v38  ;;  %v9124_v43 = vld [vmem:[#allocation50_spill] sm:$0xff] }
 0x446   :  { %v2735_v27 = vadd.f32 %v2734_v45, %v2606_v53  ;;  %3306 = vmatmul.bf16.gmra.mxu0 %v9115_v33  ;;  %v4157_v45 = vmax.f32 %v2991_v54, 0.0 }
 0x447   :  { %3435 = vmatmul.bf16.gmra.mxu1 %v9116_v42 }
 0x448   :  { %v2864_v11 = vadd.f32 %v2863_v56, %v2735_v27 }
 0x44a   :  { %v2993_v59 = vadd.f32 %v2992_v12, %v2864_v11  ;;  %3172 = vmatmul.bf16.vlgmr.msrb.gmra.mxu3 %v9117_v50  ;;  %v9122_v12 = vld [vmem:[#allocation16_spill] sm:$0xff]  ;;  %v7868_v50 = vpop.permute.xlu0 %1966 }
 0x44b   :  { %v7861_v9 = vpop.f32.mrf.mxu2  ;;  %v2873_v53 = vpop.f32.mrf.mxu0  ;;  %v2611_v54 = vadd.f32 %v9124_v43, %v7868_v50 }
 0x44c   :  { %9119 = vst [vmem:[#allocation192_spill] sm:$0xff] %v7861_v9  ;;  %v4160_v16 = vmax.f32 %v2993_v59, 0.0  ;;  %v3002_v56 = vpop.f32.mrf.mxu1 }
 0x44d   :  { %v2737_v33 = vpop.f32.mrf.mxu3 }
 0x44e   :  { %v4256_v10 = vpack.c.bf16 %v4160_v16, %v4157_v45  ;;  %v2738_v27 = vadd.f32 %v2737_v33, %v2609_v63  ;;  %v9125_v63 = vld [vmem:[#allocation36_spill] sm:$0xff] }
 0x450   :  { %v2867_v42 = vadd.f32 %v2866_v6, %v2738_v27  ;;  %3594 = vmatmul.bf16.gmra.mxu2 %v9122_v12  ;;  %v7875_v6 = vpop.permute.xlu1 %1981  ;;  %v9130_v12 = vld [vmem:[#allocation15_spill] sm:$0xff] }
 0x451   :  { %4307 = vmatpush.bf16.msrb.mxu2 %v4256_v10  ;;  %9126 = vst [vmem:[#allocation50_spill] sm:$0xff] %v7875_v6  ;;  %v9128_v10 = vld [vmem:[#allocation19_spill] sm:$0xff] }
 0x452   :  { %v2996_v11 = vadd.f32 %v2995_v21, %v2867_v42  ;;  %v9127_v21 = vld [vmem:[#allocation25_spill] sm:$0xff] }
 0x453   :  { %v7870_v9 = vpop.f32.mrf.mxu2  ;;  %v2876_v59 = vpop.f32.mrf.mxu0 }
 0x454   :  { %9123 = vst [vmem:[#allocation16_spill] sm:$0xff] %v7870_v9  ;;  %v3005_v33 = vpop.f32.mrf.mxu1  ;;  %v4163_v43 = vmax.f32 %v2996_v11, 0.0  ;;  %v9133_v11 = vld [vmem:[#allocation30_spill] sm:$0xff] }
 0x455   :  { %4308 = vmatpush.bf16.msrb.mxu2 %v4253_v2  ;;  %v2739_v38 = vpop.f32.mrf.mxu3  ;;  %v2614_v2 = vadd.f32 %v9130_v12, %v7855_v23 }
 0x456   :  { %v2740_v45 = vadd.f32 %v2739_v38, %v2611_v54  ;;  %3311 = vmatmul.bf16.gmra.mxu0 %v9125_v63 }
 0x457   :  { %3440 = vmatmul.bf16.gmra.mxu1 %v9127_v21  ;;  %v9131_v21 = vld [vmem:[#allocation24_spill] sm:$0xff] }
 0x458   :  { %v2869_v16 = vadd.f32 %v2868_v3, %v2740_v45 }
 0x459   :  { %4309 = vmatpush.bf16.msrb.mxu2 %v7817_v25 }
 0x45a   :  { %v2998_v42 = vadd.f32 %v2997_v55, %v2869_v16  ;;  %3177 = vmatmul.bf16.gmra.mxu3 %v9128_v10  ;;  %v7889_v16 = vpop.permute.xlu1 %1976 }
 0x45b   :  { %v7880_v27 = vpop.f32.mrf.mxu2  ;;  %v2878_v54 = vpop.f32.mrf.mxu0 }
 0x45c   :  { %9129 = vst [vmem:[#allocation19_spill] sm:$0xff] %v7880_v27  ;;  %v4166_v38 = vmax.f32 %v2998_v42, 0.0  ;;  %v3007_v9 = vpop.f32.mrf.mxu1  ;;  %v2616_v42 = vadd.f32 %v9133_v11, %v7889_v16 }
 0x45d   :  { %4310 = vmatpush.bf16.msrb.mxu2 %v7776_v13  ;;  %v2742_v3 = vpop.f32.mrf.mxu3 }
 0x45e   :  { %v2743_v45 = vadd.f32 %v2742_v3, %v2614_v2  ;;  %v7885_v63 = vpack.c.bf16 %v4166_v38, %v4163_v43  ;;  %v9134_v38 = vld [vmem:[#allocation22_spill] sm:$0xff]  ;;  %v9137_v3 = vld [vmem:[#allocation40_spill] sm:$0xff] }
 0x460   :  { %v2872_v25 = vadd.f32 %v2871_v47, %v2743_v45  ;;  %3599 = vmatmul.bf16.gmra.mxu2 %v9131_v21  ;;  %v9136_v21 = vld [vmem:[#allocation29_spill] sm:$0xff]  ;;  %v2619_v45 = vadd.f32 %v9137_v3, %v7875_v6 }
 0x461   :  { %4311 = vmatpush.bf16.msrb.mxu2 %v7734_v20  ;;  %v9135_v20 = vld [vmem:[#allocation23_spill] sm:$0xff] }
 0x462   :  { %v3001_v55 = vadd.f32 %v3000_v36, %v2872_v25 }
 0x463   :  { %v7891_v27 = vpop.f32.mrf.mxu2  ;;  %v2881_v12 = vpop.f32.mrf.mxu0 }
 0x464   :  { %9132 = vst [vmem:[#allocation15_spill] sm:$0xff] %v7891_v27  ;;  %v3010_v43 = vpop.f32.mrf.mxu1  ;;  %v4169_v25 = vmax.f32 %v3001_v55, 0.0 }
 0x465   :  { %4312 = vmatpush.bf16.msrb.mxu2 %v7694_v0  ;;  %v2744_v13 = vpop.f32.mrf.mxu3 }
 0x466   :  { %v2745_v2 = vadd.f32 %v2744_v13, %v2616_v42  ;;  %3316 = vmatmul.bf16.gmra.mxu0 %v9134_v38  ;;  %v9142_v38 = vld [vmem:[#allocation38_spill] sm:$0xff] }
 0x467   :  { %3445 = vmatmul.bf16.gmra.mxu1 %v9135_v20  ;;  %v9139_v20 = vld [vmem:[#allocation48_spill] sm:$0xff] }
 0x468   :  { %v2874_v47 = vadd.f32 %v2873_v53, %v2745_v2 }
 0x469   :  { %4313 = vmatpush.bf16.msrb.mxu2 %v7655_v15 }
 0x46a   :  { %v3003_v36 = vadd.f32 %v3002_v56, %v2874_v47  ;;  %3182 = vmatmul.bf16.gmra.mxu3 %v9136_v21  ;;  %v9140_v47 = vld [vmem:[#allocation69_spill] sm:$0xff] }
 0x46b   :  { %v7902_v27 = vpop.f32.mrf.mxu2  ;;  %v2883_v0 = vpop.f32.mrf.mxu0  ;;  %v2621_v21 = vadd.f32 %v9140_v47, %v7848_v29 }
 0x46c   :  { %v4172_v11 = vmax.f32 %v3003_v36, 0.0  ;;  %9138 = vst [vmem:[#allocation24_spill] sm:$0xff] %v7902_v27  ;;  %v3012_v53 = vpop.f32.mrf.mxu1 }
 0x46d   :  { %4314 = vmatpush.bf16.msrb.mxu2 %v7610_v60  ;;  %v2747_v42 = vpop.f32.mrf.mxu3 }
 0x46e   :  { %v2748_v13 = vadd.f32 %v2747_v42, %v2619_v45  ;;  %v7905_v2 = vpack.c.bf16 %v4172_v11, %v4169_v25  ;;  %v9143_v45 = vld [vmem:[#allocation70_spill] sm:$0xff]  ;;  %v9144_v11 = vld [vmem:[#allocation71_spill] sm:$0xff] }
 0x470   :  { %v2877_v15 = vadd.f32 %v2876_v59, %v2748_v13  ;;  %3604 = vmatmul.bf16.gmra.mxu2 %v9139_v20  ;;  %v9145_v59 = vld [vmem:[#allocation73_spill] sm:$0xff] }
 0x472   :  { %v3006_v56 = vadd.f32 %v3005_v33, %v2877_v15  ;;  %v2624_v33 = vadd.f32 %v9145_v59, %v7835_v31 }
 0x473   :  { %v2886_v3 = vpop.f32.mrf.mxu0  ;;  %v7910_v36 = vpop.f32.mrf.mxu2 }
 0x474   :  { %9141 = vst [vmem:[#allocation30_spill] sm:$0xff] %v7910_v36  ;;  %v3015_v6 = vpop.f32.mrf.mxu1  ;;  %v4175_v20 = vmax.f32 %v3006_v56, 0.0 }
 0x475   :  { %v2749_v55 = vpop.f32.mrf.mxu3 }
 0x476   :  { %v2750_v27 = vadd.f32 %v2749_v55, %v2621_v21  ;;  %3321 = vmatmul.bf16.gmra.mxu0 %v9142_v38 }
 0x477   :  { %3450 = vmatmul.bf16.gmra.mxu1 %v9143_v45 }
 0x478   :  { %v2879_v60 = vadd.f32 %v2878_v54, %v2750_v27  ;;  %v9147_v27 = vld [vmem:[#allocation52_spill] sm:$0xff] }
 0x47a   :  { %v3008_v25 = vadd.f32 %v3007_v9, %v2879_v60  ;;  %3187 = vmatmul.bf16.gmra.mxu3 %v9144_v11  ;;  %v9148_v9 = vld [vmem:[#allocation76_spill] sm:$0xff] }
 0x47b   :  { %v2888_v13 = vpop.f32.mrf.mxu0  ;;  %v7919_v21 = vpop.f32.mrf.mxu2  ;;  %v2626_v60 = vadd.f32 %v9148_v9, %v7845_v8 }
 0x47c   :  { %v4178_v42 = vmax.f32 %v3008_v25, 0.0  ;;  %v3017_v29 = vpop.f32.mrf.mxu1  ;;  %9146 = vst [vmem:[#allocation40_spill] sm:$0xff] %v7919_v21  ;;  %v9149_v25 = vld [vmem:[#allocation74_spill] sm:$0xff] }
 0x47d   :  { %v2752_v15 = vpop.f32.mrf.mxu3 }
 0x47e   :  { %v2753_v47 = vadd.f32 %v2752_v15, %v2624_v33  ;;  %v7917_v36 = vpack.c.bf16 %v4178_v42, %v4175_v20  ;;  %v9150_v33 = vld [vmem:[#allocation77_spill] sm:$0xff]  ;;  %v9152_v15 = vld [vmem:[#allocation78_spill] sm:$0xff] }
 0x480   :  { %v2882_v55 = vadd.f32 %v2881_v12, %v2753_v47  ;;  %3609 = vmatmul.bf16.gmra.mxu2 %v9147_v27  ;;  %v9153_v12 = vld [vmem:[#allocation81_spill] sm:$0xff] }
 0x482   :  { %v3011_v54 = vadd.f32 %v3010_v43, %v2882_v55  ;;  %v2629_v43 = vadd.f32 %v9153_v12, %v7831_v48 }
 0x483   :  { %v2891_v11 = vpop.f32.mrf.mxu0  ;;  %v7926_v20 = vpop.f32.mrf.mxu2 }
 0x484   :  { %v3020_v56 = vpop.f32.mrf.mxu1  ;;  %9151 = vst [vmem:[#allocation48_spill] sm:$0xff] %v7926_v20  ;;  %v4181_v47 = vmax.f32 %v3011_v54, 0.0  ;;  %v9155_v20 = vld [vmem:[#allocation85_spill] sm:$0xff] }
 0x485   :  { %v2754_v45 = vpop.f32.mrf.mxu3 }
 0x486   :  { %v2755_v59 = vadd.f32 %v2754_v45, %v2626_v60  ;;  %3326 = vmatmul.bf16.gmra.mxu0 %v9149_v25 }
 0x487   :  { %3455 = vmatmul.bf16.gmra.mxu1 %v9150_v33 }
 0x488   :  { %v2884_v31 = vadd.f32 %v2883_v0, %v2755_v59  ;;  %v9154_v0 = vld [vmem:[#allocation56_spill] sm:$0xff] }
 0x48a   :  { %v3013_v42 = vadd.f32 %v3012_v53, %v2884_v31  ;;  %3192 = vmatmul.bf16.gmra.mxu3 %v9152_v15  ;;  %v2631_v31 = vadd.f32 %v9155_v20, %v7865_v17 }
 0x48b   :  { %v2893_v27 = vpop.f32.mrf.mxu0  ;;  %v7936_v53 = vpop.f32.mrf.mxu2 }
 0x48c   :  { %v4184_v55 = vmax.f32 %v3013_v42, 0.0  ;;  %v3022_v45 = vpop.f32.mrf.mxu1  ;;  %9156 = vst [vmem:[#allocation69_spill] sm:$0xff] %v7936_v53  ;;  %v9157_v42 = vld [vmem:[#allocation83_spill] sm:$0xff] }
 0x48d   :  { %v2757_v9 = vpop.f32.mrf.mxu3 }
 0x48e   :  { %v2758_v21 = vadd.f32 %v2757_v9, %v2629_v43  ;;  %v7931_v60 = vpack.c.bf16 %v4184_v55, %v4181_v47  ;;  %v9158_v43 = vld [vmem:[#allocation86_spill] sm:$0xff]  ;;  %v9159_v55 = vld [vmem:[#allocation87_spill] sm:$0xff] }
 0x490   :  { %v2887_v25 = vadd.f32 %v2886_v3, %v2758_v21  ;;  %3614 = vmatmul.bf16.gmra.mxu2 %v9154_v0  ;;  %v9160_v3 = vld [vmem:[#allocation91_spill] sm:$0xff] }
 0x492   :  { %v3016_v59 = vadd.f32 %v3015_v6, %v2887_v25  ;;  %v2634_v6 = vadd.f32 %v9160_v3, %v7546_v62 }
 0x493   :  { %v2896_v15 = vpop.f32.mrf.mxu0  ;;  %v7943_v0 = vpop.f32.mrf.mxu2 }
 0x494   :  { %v3025_v54 = vpop.f32.mrf.mxu1  ;;  %v4187_v21 = vmax.f32 %v3016_v59, 0.0  ;;  %9161 = vst [vmem:[#allocation38_spill] sm:$0xff] %v7943_v0 }
 0x495   :  { %v2759_v33 = vpop.f32.mrf.mxu3 }
 0x496   :  { %v2760_v12 = vadd.f32 %v2759_v33, %v2631_v31  ;;  %3331 = vmatmul.bf16.gmra.mxu0 %v9157_v42 }
 0x497   :  { %3460 = vmatmul.bf16.gmra.mxu1 %v9158_v43 }
 0x498   :  { %v2889_v48 = vadd.f32 %v2888_v13, %v2760_v12  ;;  %v9162_v13 = vld [vmem:[#allocation60_spill] sm:$0xff] }
 0x49a   :  { %v3018_v47 = vadd.f32 %v3017_v29, %v2889_v48  ;;  %3197 = vmatmul.bf16.gmra.mxu3 %v9159_v55  ;;  %v9163_v48 = vld [vmem:[#allocation96_spill] sm:$0xff] }
 0x49b   :  { %v2898_v20 = vpop.f32.mrf.mxu0  ;;  %v2636_v29 = vadd.f32 %v9163_v48, %v7811_v4  ;;  %v7951_v62 = vpop.f32.mrf.mxu2  ;;  %v9169_v4 = vld [vmem:[#allocation64_spill] sm:$0xff] }
 0x49c   :  { %v4190_v25 = vmax.f32 %v3018_v47, 0.0  ;;  %v3027_v33 = vpop.f32.mrf.mxu1  ;;  %v9164_v47 = vld [vmem:[#allocation93_spill] sm:$0xff]  ;;  %9165 = vst [vmem:[#allocation73_spill] sm:$0xff] %v7951_v62 }
 0x49d   :  { %v2762_v9 = vpop.f32.mrf.mxu3 }
 0x49e   :  { %v2763_v53 = vadd.f32 %v2762_v9, %v2634_v6  ;;  %v7945_v31 = vpack.c.bf16 %v4190_v25, %v4187_v21  ;;  %v9166_v6 = vld [vmem:[#allocation97_spill] sm:$0xff]  ;;  %v9167_v25 = vld [vmem:[#allocation98_spill] sm:$0xff] }
 0x4a0   :  { %v2892_v42 = vadd.f32 %v2891_v11, %v2763_v53  ;;  %3619 = vmatmul.bf16.gmra.mxu2 %v9162_v13  ;;  %v9168_v11 = vld [vmem:[#allocation103_spill] sm:$0xff] }
 0x4a2   :  { %v3021_v12 = vadd.f32 %v3020_v56, %v2892_v42  ;;  %v2639_v56 = vadd.f32 %v9168_v11, %v7488_v37 }
 0x4a3   :  { %v2901_v55 = vpop.f32.mrf.mxu0 }
 0x4a4   :  { %v3030_v59 = vpop.f32.mrf.mxu1  ;;  %v4193_v53 = vmax.f32 %v3021_v12, 0.0 }
 0x4a5   :  { %v2764_v43 = vpop.f32.mrf.mxu3 }
 0x4a6   :  { %v2765_v3 = vadd.f32 %v2764_v43, %v2636_v29  ;;  %3336 = vmatmul.bf16.gmra.mxu0 %v9164_v47 }
 0x4a7   :  { %3465 = vmatmul.bf16.gmra.mxu1 %v9166_v6 }
 0x4a8   :  { %v2894_v0 = vadd.f32 %v2893_v27, %v2765_v3  ;;  %v7960_v27 = vpop.f32.mrf.mxu2 }
 0x4a9   :  { %9170 = vst [vmem:[#allocation52_spill] sm:$0xff] %v7960_v27 }
 0x4aa   :  { %v3023_v21 = vadd.f32 %v3022_v45, %v2894_v0  ;;  %3202 = vmatmul.bf16.gmra.mxu3 %v9167_v25  ;;  %v9171_v45 = vld [vmem:[#allocation107_spill] sm:$0xff] }
 0x4ab   :  { %v2903_v9 = vpop.f32.mrf.mxu0  ;;  %v2641_v0 = vadd.f32 %v9171_v45, %v7505_v1 }
 0x4ac   :  { %v4196_v42 = vmax.f32 %v3023_v21, 0.0  ;;  %v3032_v43 = vpop.f32.mrf.mxu1  ;;  %v9172_v21 = vld [vmem:[#allocation108_spill] sm:$0xff] }
 0x4ad   :  { %v2767_v13 = vpop.f32.mrf.mxu3 }
 0x4ae   :  { %v2768_v48 = vadd.f32 %v2767_v13, %v2639_v56  ;;  %v7957_v29 = vpack.c.bf16 %v4196_v42, %v4193_v53  ;;  %v9173_v56 = vld [vmem:[#allocation110_spill] sm:$0xff]  ;;  %v9174_v42 = vld [vmem:[#allocation109_spill] sm:$0xff] }
 0x4b0   :  { %v2897_v47 = vadd.f32 %v2896_v15, %v2768_v48  ;;  %3624 = vmatmul.bf16.gmra.mxu2 %v9169_v4  ;;  %v9175_v4 = vld [vmem:[#allocation114_spill] sm:$0xff]  ;;  %v7969_v13 = vpop.f32.mrf.mxu2 }
 0x4b1   :  { %v2644_v15 = vadd.f32 %v9175_v4, %v7541_v7  ;;  %9176 = vst [vmem:[#allocation76_spill] sm:$0xff] %v7969_v13 }
 0x4b2   :  { %v3026_v3 = vadd.f32 %v3025_v54, %v2897_v47 }
 0x4b3   :  { %v3302_v62 = vpop.f32.mrf.mxu0 }
 0x4b4   :  { %v3431_v12 = vpop.f32.mrf.mxu1  ;;  %v4199_v54 = vmax.f32 %v3026_v3, 0.0 }
 0x4b5   :  { %v2769_v25 = vpop.f32.mrf.mxu3 }
 0x4b6   :  { %v2770_v11 = vadd.f32 %v2769_v25, %v2641_v0  ;;  %3341 = vmatmul.bf16.gmra.mxu0 %v9172_v21 }
 0x4b7   :  { %3470 = vmatmul.bf16.gmra.mxu1 %v9173_v56 }
 0x4b8   :  { %v2899_v37 = vadd.f32 %v2898_v20, %v2770_v11  ;;  %v9177_v20 = vld [vmem:[#allocation20_spill] sm:$0xff]  ;;  %v7976_v4 = vpop.f32.mrf.mxu2 }
 0x4b9   :  { %9179 = vst [vmem:[#allocation81_spill] sm:$0xff] %v7976_v4 }
 0x4ba   :  { %v3028_v53 = vadd.f32 %v3027_v33, %v2899_v37  ;;  %3207 = vmatmul.bf16.gmra.mxu3 %v9174_v42  ;;  %v9178_v37 = vld [vmem:[#allocation118_spill] sm:$0xff] }
 0x4bb   :  { %v3304_v48 = vpop.f32.mrf.mxu0  ;;  %v2646_v33 = vadd.f32 %v9178_v37, %v7446_v32 }
 0x4bc   :  { %v4202_v47 = vmax.f32 %v3028_v53, 0.0  ;;  %v3433_v25 = vpop.f32.mrf.mxu1  ;;  %v9180_v53 = vld [vmem:[#allocation119_spill] sm:$0xff] }
 0x4bd   :  { %v2772_v45 = vpop.f32.mrf.mxu3 }
 0x4be   :  { %v2773_v27 = vadd.f32 %v2772_v45, %v2644_v15  ;;  %v7971_v0 = vpack.c.bf16 %v4202_v47, %v4199_v54  ;;  %v9181_v15 = vld [vmem:[#allocation121_spill] sm:$0xff]  ;;  %v9182_v47 = vld [vmem:[#allocation120_spill] sm:$0xff] }
 0x4c0   :  { %v2902_v21 = vadd.f32 %v2901_v55, %v2773_v27  ;;  %3629 = vmatmul.bf16.gmra.mxu2 %v9177_v20  ;;  %v9183_v55 = vld [vmem:[#allocation124_spill] sm:$0xff]  ;;  %v9184_v27 = vld [vmem:[#allocation46_spill] sm:$0xff] }
 0x4c2   :  { %v3031_v11 = vadd.f32 %v3030_v59, %v2902_v21  ;;  %v3045_v59 = vadd.f32 %v9184_v27, %v9183_v55 }
 0x4c3   :  { %v3307_v42 = vpop.f32.mrf.mxu0 }
 0x4c4   :  { %v3436_v3 = vpop.f32.mrf.mxu1  ;;  %v4205_v21 = vmax.f32 %v3031_v11, 0.0 }
 0x4c5   :  { %v2774_v56 = vpop.f32.mrf.mxu3 }
 0x4c6   :  { %v2775_v13 = vadd.f32 %v2774_v56, %v2646_v33  ;;  %3346 = vmatmul.bf16.gmra.mxu0 %v9180_v53  ;;  %v7985_v33 = vpop.f32.mrf.mxu2 }
 0x4c7   :  { %3475 = vmatmul.bf16.gmra.mxu1 %v9181_v15  ;;  %9185 = vst [vmem:[#allocation56_spill] sm:$0xff] %v7985_v33 }
 0x4c8   :  { %v2904_v7 = vadd.f32 %v2903_v9, %v2775_v13  ;;  %v9186_v9 = vld [vmem:[#allocation21_spill] sm:$0xff] }
 0x4ca   :  { %v3033_v54 = vadd.f32 %v3032_v43, %v2904_v7  ;;  %3212 = vmatmul.bf16.gmra.mxu3 %v9182_v47  ;;  %v9187_v7 = vld [vmem:[#allocation126_spill] sm:$0xff] }
 0x4cb   :  { %v3309_v20 = vpop.f32.mrf.mxu0  ;;  %v9188_v43 = vld [vmem:[#allocation42_spill] sm:$0xff] }
 0x4cc   :  { %v4208_v45 = vmax.f32 %v3033_v54, 0.0  ;;  %v3438_v56 = vpop.f32.mrf.mxu1  ;;  %v3047_v47 = vadd.f32 %v9188_v43, %v9187_v7  ;;  %v9189_v54 = vld [vmem:[#allocation47_spill] sm:$0xff] }
 0x4cd   :  { %v3173_v37 = vpop.f32.mrf.mxu3 }
 0x4ce   :  { %v7983_v32 = vpack.c.bf16 %v4208_v45, %v4205_v21  ;;  %v3174_v4 = vadd.f32 %v3173_v37, %v3045_v59  ;;  %v7992_v59 = vpop.f32.mrf.mxu2  ;;  %v9191_v45 = vld [vmem:[#allocation128_spill] sm:$0xff] }
 0x4cf   :  { %9190 = vst [vmem:[#allocation85_spill] sm:$0xff] %v7992_v59  ;;  %v9196_v59 = vld [vmem:[#allocation72_spill] sm:$0xff] }
 0x4d0   :  { %v3303_v53 = vadd.f32 %v3302_v62, %v3174_v4  ;;  %3634 = vmatmul.bf16.gmra.mxu2 %v9186_v9  ;;  %v9192_v62 = vld [vmem:[#allocation130_spill] sm:$0xff]  ;;  %v9193_v4 = vld [vmem:[#allocation68_spill] sm:$0xff] }
 0x4d2   :  { %v3432_v13 = vadd.f32 %v3431_v12, %v3303_v53  ;;  %v3050_v12 = vadd.f32 %v9193_v4, %v9192_v62 }
 0x4d3   :  { %v3312_v15 = vpop.f32.mrf.mxu0 }
 0x4d4   :  { %v3441_v11 = vpop.f32.mrf.mxu1  ;;  %v4068_v53 = vmax.f32 %v3432_v13, 0.0 }
 0x4d5   :  { %v3175_v1 = vpop.f32.mrf.mxu3 }
 0x4d6   :  { %v3176_v27 = vadd.f32 %v3175_v1, %v3047_v47  ;;  %3351 = vmatmul.bf16.gmra.mxu0 %v9189_v54 }
 0x4d7   :  { %3480 = vmatmul.bf16.gmra.mxu1 %v7217_v51  ;;  %v9195_v51 = vld [vmem:[#allocation116_spill] sm:$0xff] }
 0x4d8   :  { %v3305_v55 = vadd.f32 %v3304_v48, %v3176_v27  ;;  %v9194_v48 = vld [vmem:[#allocation26_spill] sm:$0xff] }
 0x4da   :  { %v3434_v21 = vadd.f32 %v3433_v25, %v3305_v55  ;;  %3217 = vmatmul.bf16.gmra.mxu3 %v9191_v45  ;;  %v3052_v25 = vadd.f32 %v9196_v59, %v9195_v51  ;;  %v8002_v55 = vpop.f32.mrf.mxu2 }
 0x4db   :  { %v3314_v9 = vpop.f32.mrf.mxu0  ;;  %9197 = vst [vmem:[#allocation91_spill] sm:$0xff] %v8002_v55 }
 0x4dc   :  { %v4071_v37 = vmax.f32 %v3434_v21, 0.0  ;;  %v3443_v1 = vpop.f32.mrf.mxu1 }
 0x4dd   :  { %v3178_v43 = vpop.f32.mrf.mxu3 }
 0x4de   :  { %v3179_v33 = vadd.f32 %v3178_v43, %v3050_v12  ;;  %v7997_v47 = vpack.c.bf16 %v4071_v37, %v4068_v53  ;;  %v9198_v53 = vld [vmem:[#allocation132_spill] sm:$0xff] }
 0x4e0   :  { %v3308_v54 = vadd.f32 %v3307_v42, %v3179_v33  ;;  %3639 = vmatmul.bf16.gmra.mxu2 %v9194_v48  ;;  %v9199_v42 = vld [vmem:[#allocation106_spill] sm:$0xff]  ;;  %v9200_v33 = vld [vmem:[#allocation75_spill] sm:$0xff] }
 0x4e2   :  { %v3437_v27 = vadd.f32 %v3436_v3, %v3308_v54  ;;  %v3055_v3 = vadd.f32 %v9200_v33, %v9199_v42  ;;  %v8009_v48 = vpop.f32.mrf.mxu2 }
 0x4e3   :  { %v3317_v45 = vpop.f32.mrf.mxu0  ;;  %9201 = vst [vmem:[#allocation60_spill] sm:$0xff] %v8009_v48 }
 0x4e4   :  { %v3446_v13 = vpop.f32.mrf.mxu1  ;;  %v4074_v54 = vmax.f32 %v3437_v27, 0.0 }
 0x4e5   :  { %v3180_v7 = vpop.f32.mrf.mxu3 }
 0x4e6   :  { %v3181_v4 = vadd.f32 %v3180_v7, %v3052_v25  ;;  %3356 = vmatmul.bf16.gmra.mxu0 %v7247_v39 }
 0x4e7   :  { %3485 = vmatmul.bf16.gmra.mxu1 %v7257_v18 }
 0x4e8   :  { %v3310_v21 = vadd.f32 %v3309_v20, %v3181_v4  ;;  %v9202_v20 = vld [vmem:[#allocation32_spill] sm:$0xff] }
 0x4ea   :  { %v3439_v12 = vadd.f32 %v3438_v56, %v3310_v21  ;;  %3222 = vmatmul.bf16.gmra.mxu3 %v9198_v53  ;;  %v9203_v56 = vld [vmem:[#allocation18_spill] sm:$0xff]  ;;  %v9204_v21 = vld [vmem:[#allocation79_spill] sm:$0xff]  ;;  %v8017_v42 = vpop.f32.mrf.mxu2 }
 0x4eb   :  { %v3319_v59 = vpop.f32.mrf.mxu0  ;;  %v3057_v53 = vadd.f32 %v9204_v21, %v9203_v56  ;;  %9206 = vst [vmem:[#allocation96_spill] sm:$0xff] %v8017_v42 }
 0x4ec   :  { %v4077_v37 = vmax.f32 %v3439_v12, 0.0  ;;  %v3448_v7 = vpop.f32.mrf.mxu1  ;;  %v9205_v12 = vld [vmem:[#allocation55_spill] sm:$0xff] }
 0x4ed   :  { %v3183_v43 = vpop.f32.mrf.mxu3 }
 0x4ee   :  { %v3184_v55 = vadd.f32 %v3183_v43, %v3055_v3  ;;  %v8011_v25 = vpack.c.bf16 %v4077_v37, %v4074_v54 }
 0x4f0   :  { %v3313_v39 = vadd.f32 %v3312_v15, %v3184_v55  ;;  %3644 = vmatmul.bf16.gmra.mxu2 %v9202_v20  ;;  %v9207_v15 = vld [vmem:[#allocation94_spill] sm:$0xff]  ;;  %v9208_v55 = vld [vmem:[#allocation84_spill] sm:$0xff] }
 0x4f2   :  { %v3442_v4 = vadd.f32 %v3441_v11, %v3313_v39  ;;  %v3060_v39 = vadd.f32 %v9208_v55, %v9207_v15 }
 0x4f3   :  { %v3322_v18 = vpop.f32.mrf.mxu0 }
 0x4f4   :  { %v3451_v27 = vpop.f32.mrf.mxu1  ;;  %v4080_v11 = vmax.f32 %v3442_v4, 0.0 }
 0x4f5   :  { %v3185_v51 = vpop.f32.mrf.mxu3 }
 0x4f6   :  { %v3186_v33 = vadd.f32 %v3185_v51, %v3057_v53  ;;  %3361 = vmatmul.bf16.gmra.mxu0 %v9205_v12  ;;  %v9209_v12 = vld [vmem:[#allocation67_spill] sm:$0xff] }
 0x4f7   :  { %3490 = vmatmul.bf16.gmra.mxu1 %v7296_v5 }
 0x4f8   :  { %v3315_v48 = vadd.f32 %v3314_v9, %v3186_v33  ;;  %v8026_v9 = vpop.f32.mrf.mxu2 }
 0x4f9   :  { %9210 = vst [vmem:[#allocation97_spill] sm:$0xff] %v8026_v9 }
 0x4fa   :  { %v3444_v3 = vadd.f32 %v3443_v1, %v3315_v48  ;;  %3227 = vmatmul.bf16.gmra.mxu3 %v7294_v34  ;;  %v9211_v1 = vld [vmem:[#allocation100_spill] sm:$0xff]  ;;  %v9212_v48 = vld [vmem:[#allocation90_spill] sm:$0xff] }
 0x4fb   :  { %v3324_v37 = vpop.f32.mrf.mxu0  ;;  %v3062_v42 = vadd.f32 %v9212_v48, %v9211_v1 }
 0x4fc   :  { %v4083_v54 = vmax.f32 %v3444_v3, 0.0  ;;  %v3453_v51 = vpop.f32.mrf.mxu1 }
 0x4fd   :  { %v3188_v43 = vpop.f32.mrf.mxu3 }
 0x4fe   :  { %v3189_v20 = vadd.f32 %v3188_v43, %v3060_v39  ;;  %v8023_v53 = vpack.c.bf16 %v4083_v54, %v4080_v11  ;;  %v9213_v11 = vld [vmem:[#allocation138_spill] sm:$0xff] }
 0x500   :  { %v3318_v21 = vadd.f32 %v3317_v45, %v3189_v20  ;;  %3649 = vmatmul.bf16.gmra.mxu2 %v9209_v12  ;;  %v9214_v45 = vld [vmem:[#allocation92_spill] sm:$0xff]  ;;  %v9215_v12 = vld [vmem:[#allocation95_spill] sm:$0xff]  ;;  %v8035_v43 = vpop.f32.mrf.mxu2 }
 0x501   :  { %v3065_v54 = vadd.f32 %v9215_v12, %v9214_v45  ;;  %9216 = vst [vmem:[#allocation103_spill] sm:$0xff] %v8035_v43 }
 0x502   :  { %v3447_v33 = vadd.f32 %v3446_v13, %v3318_v21 }
 0x503   :  { %v3327_v34 = vpop.f32.mrf.mxu0 }
 0x504   :  { %v3456_v4 = vpop.f32.mrf.mxu1  ;;  %v4086_v13 = vmax.f32 %v3447_v33, 0.0 }
 0x505   :  { %v3190_v5 = vpop.f32.mrf.mxu3 }
 0x506   :  { %v3191_v55 = vadd.f32 %v3190_v5, %v3062_v42  ;;  %3366 = vmatmul.bf16.gmra.mxu0 %v7326_v58 }
 0x507   :  { %3495 = vmatmul.bf16.gmra.mxu1 %v7338_v19 }
 0x508   :  { %v3320_v3 = vadd.f32 %v3319_v59, %v3191_v55  ;;  %v9217_v59 = vld [vmem:[#allocation66_spill] sm:$0xff]  ;;  %v8042_v12 = vpop.f32.mrf.mxu2 }
 0x509   :  { %9220 = vst [vmem:[#allocation64_spill] sm:$0xff] %v8042_v12 }
 0x50a   :  { %v3449_v39 = vadd.f32 %v3448_v7, %v3320_v3  ;;  %3232 = vmatmul.bf16.gmra.mxu3 %v9213_v11  ;;  %v9218_v7 = vld [vmem:[#allocation113_spill] sm:$0xff] }
 0x50b   :  { %v3329_v21 = vpop.f32.mrf.mxu0  ;;  %v9219_v3 = vld [vmem:[#allocation101_spill] sm:$0xff] }
 0x50c   :  { %v4089_v20 = vmax.f32 %v3449_v39, 0.0  ;;  %v3458_v5 = vpop.f32.mrf.mxu1  ;;  %v3067_v11 = vadd.f32 %v9219_v3, %v9218_v7  ;;  %v9221_v39 = vld [vmem:[#allocation63_spill] sm:$0xff] }
 0x50d   :  { %v3193_v48 = vpop.f32.mrf.mxu3 }
 0x50e   :  { %v3194_v9 = vadd.f32 %v3193_v48, %v3065_v54  ;;  %v8037_v42 = vpack.c.bf16 %v4089_v20, %v4086_v13  ;;  %v9222_v54 = vld [vmem:[#allocation142_spill] sm:$0xff]  ;;  %v9223_v20 = vld [vmem:[#allocation141_spill] sm:$0xff] }
 0x510   :  { %v3323_v58 = vadd.f32 %v3322_v18, %v3194_v9  ;;  %3654 = vmatmul.bf16.gmra.mxu2 %v9217_v59  ;;  %v9224_v18 = vld [vmem:[#allocation104_spill] sm:$0xff]  ;;  %v9225_v9 = vld [vmem:[#allocation105_spill] sm:$0xff] }
 0x512   :  { %v3452_v55 = vadd.f32 %v3451_v27, %v3323_v58  ;;  %v3070_v58 = vadd.f32 %v9225_v9, %v9224_v18 }
 0x513   :  { %v3332_v19 = vpop.f32.mrf.mxu0 }
 0x514   :  { %v3461_v33 = vpop.f32.mrf.mxu1  ;;  %v4092_v27 = vmax.f32 %v3452_v55, 0.0 }
 0x515   :  { %v3195_v1 = vpop.f32.mrf.mxu3 }
 0x516   :  { %v3196_v43 = vadd.f32 %v3195_v1, %v3067_v11  ;;  %3371 = vmatmul.bf16.gmra.mxu0 %v9221_v39  ;;  %v8051_v1 = vpop.f32.mrf.mxu2 }
 0x517   :  { %3500 = vmatmul.bf16.gmra.mxu1 %v9222_v54  ;;  %9226 = vst [vmem:[#allocation107_spill] sm:$0xff] %v8051_v1 }
 0x518   :  { %v3325_v45 = vadd.f32 %v3324_v37, %v3196_v43  ;;  %v9227_v37 = vld [vmem:[#allocation37_spill] sm:$0xff] }
 0x51a   :  { %v3454_v13 = vadd.f32 %v3453_v51, %v3325_v45  ;;  %3237 = vmatmul.bf16.gmra.mxu3 %v9223_v20  ;;  %v9228_v51 = vld [vmem:[#allocation89_spill] sm:$0xff]  ;;  %v9229_v45 = vld [vmem:[#allocation112_spill] sm:$0xff] }
 0x51b   :  { %v3334_v59 = vpop.f32.mrf.mxu0  ;;  %v3072_v20 = vadd.f32 %v9229_v45, %v9228_v51 }
 0x51c   :  { %v4095_v48 = vmax.f32 %v3454_v13, 0.0  ;;  %v3463_v15 = vpop.f32.mrf.mxu1  ;;  %v9230_v13 = vld [vmem:[#allocation147_spill] sm:$0xff] }
 0x51d   :  { %v3198_v3 = vpop.f32.mrf.mxu3 }
 0x51e   :  { %v3199_v7 = vadd.f32 %v3198_v3, %v3070_v58  ;;  %v8049_v12 = vpack.c.bf16 %v4095_v48, %v4092_v27  ;;  %v9231_v58 = vld [vmem:[#allocation149_spill] sm:$0xff]  ;;  %v8058_v27 = vpop.f32.mrf.mxu2  ;;  %v9233_v3 = vld [vmem:[#allocation148_spill] sm:$0xff] }
 0x51f   :  { %9232 = vst [vmem:[#allocation114_spill] sm:$0xff] %v8058_v27  ;;  %v9238_v27 = vld [vmem:[#allocation125_spill] sm:$0xff] }
 0x520   :  { %v3328_v11 = vadd.f32 %v3327_v34, %v3199_v7  ;;  %3659 = vmatmul.bf16.gmra.mxu2 %v9227_v37  ;;  %v9234_v34 = vld [vmem:[#allocation82_spill] sm:$0xff]  ;;  %v9235_v7 = vld [vmem:[#allocation117_spill] sm:$0xff] }
 0x522   :  { %v3457_v43 = vadd.f32 %v3456_v4, %v3328_v11  ;;  %v3075_v4 = vadd.f32 %v9235_v7, %v9234_v34 }
 0x523   :  { %v3337_v54 = vpop.f32.mrf.mxu0 }
 0x524   :  { %v3466_v55 = vpop.f32.mrf.mxu1  ;;  %v4098_v11 = vmax.f32 %v3457_v43, 0.0 }
 0x525   :  { %v3200_v39 = vpop.f32.mrf.mxu3 }
 0x526   :  { %v3201_v9 = vadd.f32 %v3200_v39, %v3072_v20  ;;  %3376 = vmatmul.bf16.gmra.mxu0 %v9230_v13 }
 0x527   :  { %3505 = vmatmul.bf16.gmra.mxu1 %v9231_v58  ;;  %v9237_v58 = vld [vmem:[#allocation88_spill] sm:$0xff] }
 0x528   :  { %v3330_v18 = vadd.f32 %v3329_v21, %v3201_v9  ;;  %v9236_v21 = vld [vmem:[#allocation45_spill] sm:$0xff] }
 0x52a   :  { %v3459_v48 = vadd.f32 %v3458_v5, %v3330_v18  ;;  %3242 = vmatmul.bf16.gmra.mxu3 %v9233_v3  ;;  %v3077_v5 = vadd.f32 %v9238_v27, %v9237_v58  ;;  %v8068_v18 = vpop.f32.mrf.mxu2  ;;  %v9244_v27 = vld [vmem:[#allocation127_spill] sm:$0xff] }
 0x52b   :  { %v3339_v45 = vpop.f32.mrf.mxu0  ;;  %9239 = vst [vmem:[#allocation20_spill] sm:$0xff] %v8068_v18 }
 0x52c   :  { %v4101_v37 = vmax.f32 %v3459_v48, 0.0  ;;  %v3468_v39 = vpop.f32.mrf.mxu1  ;;  %v9240_v48 = vld [vmem:[#allocation27_spill] sm:$0xff] }
 0x52d   :  { %v3203_v1 = vpop.f32.mrf.mxu3 }
 0x52e   :  { %v3204_v51 = vadd.f32 %v3203_v1, %v3075_v4  ;;  %v8063_v20 = vpack.c.bf16 %v4101_v37, %v4098_v11  ;;  %v9241_v1 = vld [vmem:[#allocation155_spill] sm:$0xff]  ;;  %v9242_v11 = vld [vmem:[#allocation154_spill] sm:$0xff]  ;;  %v9243_v37 = vld [vmem:[#allocation80_spill] sm:$0xff] }
 0x530   :  { %v3333_v13 = vadd.f32 %v3332_v19, %v3204_v51  ;;  %3664 = vmatmul.bf16.gmra.mxu2 %v9236_v21  ;;  %v3080_v21 = vadd.f32 %v9244_v27, %v9243_v37 }
 0x532   :  { %v3462_v9 = vadd.f32 %v3461_v33, %v3333_v13  ;;  %v8075_v18 = vpop.f32.mrf.mxu2 }
 0x533   :  { %v3342_v3 = vpop.f32.mrf.mxu0  ;;  %9245 = vst [vmem:[#allocation118_spill] sm:$0xff] %v8075_v18 }
 0x534   :  { %v3471_v43 = vpop.f32.mrf.mxu1  ;;  %v4104_v19 = vmax.f32 %v3462_v9, 0.0 }
 0x535   :  { %v3205_v56 = vpop.f32.mrf.mxu3 }
 0x536   :  { %v3206_v7 = vadd.f32 %v3205_v56, %v3077_v5  ;;  %3381 = vmatmul.bf16.gmra.mxu0 %v9240_v48  ;;  %v9246_v48 = vld [vmem:[#allocation44_spill] sm:$0xff] }
 0x537   :  { %3510 = vmatmul.bf16.gmra.mxu1 %v9241_v1 }
 0x538   :  { %v3335_v34 = vadd.f32 %v3334_v59, %v3206_v7  ;;  %v9247_v59 = vld [vmem:[#allocation99_spill] sm:$0xff] }
 0x53a   :  { %v3464_v4 = vadd.f32 %v3463_v15, %v3335_v34  ;;  %3247 = vmatmul.bf16.gmra.mxu3 %v9242_v11  ;;  %v4283_v15 = vld [vmem:[%s8532_s5] sm:$0x7]  ;;  %v9248_v34 = vld [vmem:[#allocation131_spill] sm:$0xff] }
 0x53b   :  { %v3344_v33 = vpop.f32.mrf.mxu0  ;;  %4287 = vst [vmem:[#allocation1] ss:$9 sm:$0xff] %v4283_v15  ;;  %v3082_v9 = vadd.f32 %v9248_v34, %v9247_v59  ;;  %v9251_v15 = vld [vmem:[#allocation49_spill] sm:$0xff] }
 0x53c   :  { %v4107_v51 = vmax.f32 %v3464_v4, 0.0  ;;  %v3473_v58 = vpop.f32.mrf.mxu1  ;;  %v3085_v18 = vadd.f32 %v9251_v15, %v7551_v46 }
 0x53d   :  { %v3208_v13 = vpop.f32.mrf.mxu3 }
 0x53e   :  { %v8077_v56 = vpack.c.bf16 %v4107_v51, %v4104_v19  ;;  %v3209_v5 = vadd.f32 %v3208_v13, %v3080_v21  ;;  %v8086_v19 = vpop.f32.mrf.mxu2  ;;  %v9250_v21 = vld [vmem:[#allocation162_spill] sm:$0xff] }
 0x53f   :  { %9249 = vst [vmem:[#allocation46_spill] sm:$0xff] %v8086_v19 }
 0x540   :  { %3669 = vmatmul.bf16.gmra.mxu2 %v9246_v48  ;;  %v3338_v7 = vadd.f32 %v3337_v54, %v3209_v5 }
 0x542   :  { %v3467_v51 = vadd.f32 %v3466_v55, %v3338_v7  ;;  %v9254_v7 = vld [vmem:[#allocation134_spill] sm:$0xff] }
 0x543   :  { %v3347_v4 = vpop.f32.mrf.mxu0 }
 0x544   :  { %v3476_v37 = vpop.f32.mrf.mxu1  ;;  %v4110_v34 = vmax.f32 %v3467_v51, 0.0 }
 0x545   :  { %v3210_v11 = vpop.f32.mrf.mxu3 }
 0x546   :  { %v3211_v27 = vadd.f32 %v3210_v11, %v3082_v9  ;;  %3386 = vmatmul.bf16.gmra.mxu0 %v7529_v44  ;;  %v8095_v55 = vpop.f32.mrf.mxu2 }
 0x547   :  { %3515 = vmatmul.bf16.gmra.mxu1 %v7539_v40  ;;  %9252 = vst [vmem:[#allocation21_spill] sm:$0xff] %v8095_v55  ;;  %v9269_v55 = vld [vmem:[#allocation177_spill] sm:$0xff] }
 0x548   :  { %v3340_v13 = vadd.f32 %v3339_v45, %v3211_v27 }
 0x54a   :  { %v3469_v48 = vadd.f32 %v3468_v39, %v3340_v13  ;;  %3252 = vmatmul.bf16.gmra.mxu3 %v9250_v21  ;;  %v9253_v39 = vld [vmem:[#allocation166_spill] sm:$0xff] }
 0x54b   :  { %v3349_v5 = vpop.f32.mrf.mxu0  ;;  %v3087_v27 = vadd.f32 %v9254_v7, %v9253_v39 }
 0x54c   :  { %v4113_v54 = vmax.f32 %v3469_v48, 0.0  ;;  %v3478_v44 = vpop.f32.mrf.mxu1 }
 0x54d   :  { %v3213_v59 = vpop.f32.mrf.mxu3 }
 0x54e   :  { %v8092_v11 = vpack.c.bf16 %v4113_v54, %v4110_v34  ;;  %v3214_v9 = vadd.f32 %v3213_v59, %v3085_v18  ;;  %v8104_v59 = vpop.f32.mrf.mxu2 }
 0x54f   :  { %9256 = vst [vmem:[#allocation42_spill] sm:$0xff] %v8104_v59 }
 0x550   :  { %v3343_v1 = vadd.f32 %v3342_v3, %v3214_v9  ;;  %3674 = vmatmul.bf16.gmra.mxu2 %v6795_v57  ;;  %v9255_v57 = vld [vmem:[#allocation53_spill] sm:$0xff]  ;;  %v8106_v9 = vld [vmem:[#allocation1] sm:$0xff] }
 0x551   :  { %v3090_v3 = vadd.f32 %v9255_v57, %v7603_v14 }
 0x552   :  { %v3472_v45 = vadd.f32 %v3471_v43, %v3343_v1 }
 0x553   :  { %v3352_v13 = vpop.f32.mrf.mxu0 }
 0x554   :  { %v3481_v51 = vpop.f32.mrf.mxu1  ;;  %v4116_v43 = vmax.f32 %v3472_v45, 0.0 }
 0x555   :  { %v3215_v19 = vpop.f32.mrf.mxu3 }
 0x556   :  { %v3216_v15 = vadd.f32 %v3215_v19, %v3087_v27  ;;  %3391 = vmatmul.bf16.gmra.mxu0 %v7585_v61 }
 0x557   :  { %3520 = vmatmul.bf16.gmra.mxu1 %v7595_v52 }
 0x558   :  { %v3345_v48 = vadd.f32 %v3344_v33, %v3216_v15  ;;  %v9257_v15 = vld [vmem:[#allocation137_spill] sm:$0xff] }
 0x55a   :  { %v3474_v18 = vadd.f32 %v3473_v58, %v3345_v48  ;;  %3257 = vmatmul.bf16.gmra.mxu3 %v7593_v24  ;;  %v3092_v48 = vadd.f32 %v9257_v15, %v7508_v41 }
 0x55b   :  { %v3354_v34 = vpop.f32.mrf.mxu0 }
 0x55c   :  { %v4119_v1 = vmax.f32 %v3474_v18, 0.0  ;;  %v3483_v7 = vpop.f32.mrf.mxu1  ;;  %v8115_v18 = vpop.f32.mrf.mxu2 }
 0x55d   :  { %v3218_v54 = vpop.f32.mrf.mxu3  ;;  %9258 = vst [vmem:[#allocation130_spill] sm:$0xff] %v8115_v18 }
 0x55e   :  { %v3219_v19 = vadd.f32 %v3218_v54, %v3090_v3  ;;  %v8108_v27 = vpack.c.bf16 %v4119_v1, %v4116_v43 }
 0x560   :  { %v3348_v33 = vadd.f32 %v3347_v4, %v3219_v19  ;;  %4302 = vmatmul.bf16.vlgmr.msra.gmra.mxu2 %v8106_v9 }
 0x561   :  { %4320 = vmatpush.bf16.msra.mxu2 %v7983_v32 }
 0x562   :  { %v3477_v58 = vadd.f32 %v3476_v37, %v3348_v33  ;;  %v9259_v37 = vld [vmem:[#allocation57_spill] sm:$0xff]  ;;  %v8124_v33 = vld [vmem:[#allocation1 + $0x9] sm:$0xff] }
 0x563   :  { %v3357_v57 = vpop.f32.mrf.mxu0  ;;  %v3095_v4 = vadd.f32 %v9259_v37, %v7474_v26 }
 0x564   :  { %v3486_v3 = vpop.f32.mrf.mxu1  ;;  %v4122_v1 = vmax.f32 %v3477_v58, 0.0  ;;  %v9261_v58 = vld [vmem:[#allocation140_spill] sm:$0xff] }
 0x565   :  { %4321 = vmatpush.bf16.msra.mxu2 %v7971_v0  ;;  %v3220_v45 = vpop.f32.mrf.mxu3 }
 0x566   :  { %v3221_v59 = vadd.f32 %v3220_v45, %v3092_v48  ;;  %3396 = vmatmul.bf16.gmra.mxu0 %v7632_v30  ;;  %v3097_v45 = vadd.f32 %v9261_v58, %v7563_v35 }
 0x567   :  { %3525 = vmatmul.bf16.gmra.mxu1 %v7642_v49 }
 0x568   :  { %v3350_v43 = vadd.f32 %v3349_v5, %v3221_v59 }
 0x569   :  { %4322 = vmatpush.bf16.msra.mxu2 %v7957_v29  ;;  %v8128_v29 = vpop.f32.mrf.mxu2 }
 0x56a   :  { %v3479_v32 = vadd.f32 %v3478_v44, %v3350_v43  ;;  %3262 = vmatmul.bf16.gmra.mxu3 %v7640_v22  ;;  %9260 = vst [vmem:[#allocation68_spill] sm:$0xff] %v8128_v29 }
 0x56b   :  { %v3359_v54 = vpop.f32.mrf.mxu0 }
 0x56c   :  { %v4125_v0 = vmax.f32 %v3479_v32, 0.0  ;;  %v3488_v5 = vpop.f32.mrf.mxu1 }
 0x56d   :  { %4323 = vmatpush.bf16.msra.mxu2 %v7945_v31  ;;  %v3223_v19 = vpop.f32.mrf.mxu3 }
 0x56e   :  { %v3224_v15 = vadd.f32 %v3223_v19, %v3095_v4  ;;  %v8126_v59 = vpack.c.bf16 %v4125_v0, %v4122_v1  ;;  %v9262_v4 = vld [vmem:[#allocation172_spill] sm:$0xff]  ;;  %v9264_v19 = vld [vmem:[#allocation173_spill] sm:$0xff] }
 0x570   :  { %v3353_v44 = vadd.f32 %v3352_v13, %v3224_v15  ;;  %4315 = vmatmul.bf16.vlgmr.msrb.gmra.mxu2 %v8124_v33  ;;  %v9263_v13 = vld [vmem:[#allocation174_spill] sm:$0xff] }
 0x571   :  { %4324 = vmatpush.bf16.msra.mxu2 %v7931_v60  ;;  %v9265_v60 = vld [vmem:[#allocation145_spill] sm:$0xff] }
 0x572   :  { %v3482_v48 = vadd.f32 %v3481_v51, %v3353_v44  ;;  %v9266_v51 = vld [vmem:[#allocation61_spill] sm:$0xff] }
 0x573   :  { %v3362_v43 = vpop.f32.mrf.mxu0  ;;  %v3100_v15 = vadd.f32 %v9266_v51, %v9265_v60 }
 0x574   :  { %v3491_v37 = vpop.f32.mrf.mxu1  ;;  %v4128_v44 = vmax.f32 %v3482_v48, 0.0 }
 0x575   :  { %4325 = vmatpush.bf16.msra.mxu2 %v7917_v36  ;;  %v3225_v31 = vpop.f32.mrf.mxu3 }
 0x576   :  { %v3226_v32 = vadd.f32 %v3225_v31, %v3097_v45  ;;  %3401 = vmatmul.bf16.gmra.mxu0 %v9262_v4 }
 0x577   :  { %3530 = vmatmul.bf16.gmra.mxu1 %v9263_v13 }
 0x578   :  { %v3355_v1 = vadd.f32 %v3354_v34, %v3226_v32  ;;  %v9267_v32 = vld [vmem:[#allocation150_spill] sm:$0xff] }
 0x579   :  { %4326 = vmatpush.bf16.msra.mxu2 %v7905_v2 }
 0x57a   :  { %v3484_v0 = vadd.f32 %v3483_v7, %v3355_v1  ;;  %3267 = vmatmul.bf16.gmra.mxu3 %v9264_v19  ;;  %v9268_v1 = vld [vmem:[#allocation144_spill] sm:$0xff] }
 0x57b   :  { %v3364_v29 = vpop.f32.mrf.mxu0  ;;  %v3102_v18 = vadd.f32 %v9268_v1, %v9267_v32 }
 0x57c   :  { %v4131_v58 = vmax.f32 %v3484_v0, 0.0  ;;  %v3493_v34 = vpop.f32.mrf.mxu1 }
 0x57d   :  { %4327 = vmatpush.bf16.msra.mxu2 %v7885_v63  ;;  %v3228_v36 = vpop.f32.mrf.mxu3 }
 0x57e   :  { %v3229_v45 = vadd.f32 %v3228_v36, %v3100_v15  ;;  %v8143_v31 = vpack.c.bf16 %v4131_v58, %v4128_v44  ;;  %v9270_v15 = vld [vmem:[#allocation179_spill] sm:$0xff]  ;;  %v9271_v44 = vld [vmem:[#allocation178_spill] sm:$0xff] }
 0x580   :  { %v3358_v2 = vadd.f32 %v3357_v57, %v3229_v45 }
 0x581   :  { %4333 = vmatpush.bf16.msrb.mxu2 %v8092_v11 }
 0x582   :  { %v3487_v7 = vadd.f32 %v3486_v3, %v3358_v2  ;;  %v9273_v3 = vld [vmem:[#allocation146_spill] sm:$0xff] }
 0x583   :  { %v3367_v51 = vpop.f32.mrf.mxu0 }
 0x584   :  { %v3496_v63 = vpop.f32.mrf.mxu1  ;;  %v4134_v36 = vmax.f32 %v3487_v7, 0.0 }
 0x585   :  { %4334 = vmatpush.bf16.msrb.mxu2 %v8077_v56  ;;  %v3230_v48 = vpop.f32.mrf.mxu3  ;;  %v9272_v56 = vld [vmem:[#allocation65_spill] sm:$0xff] }
 0x586   :  { %v3231_v0 = vadd.f32 %v3230_v48, %v3102_v18  ;;  %3406 = vmatmul.bf16.gmra.mxu0 %v9269_v55  ;;  %v3105_v58 = vadd.f32 %v9273_v3, %v9272_v56  ;;  %v9276_v3 = vld [vmem:[#allocation182_spill] sm:$0xff] }
 0x587   :  { %3535 = vmatmul.bf16.gmra.mxu1 %v9270_v15  ;;  %v9285_v55 = vld [vmem:[#allocation186_spill] sm:$0xff] }
 0x588   :  { %v3360_v11 = vadd.f32 %v3359_v54, %v3231_v0  ;;  %v9275_v0 = vld [vmem:[#allocation151_spill] sm:$0xff] }
 0x589   :  { %4335 = vmatpush.bf16.msrb.mxu2 %v8063_v20 }
 0x58a   :  { %v3489_v57 = vadd.f32 %v3488_v5, %v3360_v11  ;;  %3272 = vmatmul.bf16.gmra.mxu3 %v9271_v44  ;;  %v9274_v5 = vld [vmem:[#allocation158_spill] sm:$0xff] }
 0x58b   :  { %v3369_v2 = vpop.f32.mrf.mxu0  ;;  %v3107_v11 = vadd.f32 %v9275_v0, %v9274_v5 }
 0x58c   :  { %v4137_v45 = vmax.f32 %v3489_v57, 0.0  ;;  %v3498_v18 = vpop.f32.mrf.mxu1 }
 0x58d   :  { %4336 = vmatpush.bf16.msrb.mxu2 %v8049_v12  ;;  %v3233_v1 = vpop.f32.mrf.mxu3 }
 0x58e   :  { %v3234_v20 = vadd.f32 %v3233_v1, %v3105_v58  ;;  %v8156_v48 = vpack.c.bf16 %v4137_v45, %v4134_v36  ;;  %v9277_v58 = vld [vmem:[#allocation184_spill] sm:$0xff]  ;;  %v9278_v36 = vld [vmem:[#allocation183_spill] sm:$0xff] }
 0x590   :  { %v3363_v54 = vadd.f32 %v3362_v43, %v3234_v20  ;;  %v9279_v20 = vld [vmem:[#allocation123_spill] sm:$0xff] }
 0x591   :  { %4337 = vmatpush.bf16.msrb.mxu2 %v8037_v42 }
 0x592   :  { %v3492_v12 = vadd.f32 %v3491_v37, %v3363_v54  ;;  %v9280_v54 = vld [vmem:[#allocation153_spill] sm:$0xff] }
 0x593   :  { %v3372_v44 = vpop.f32.mrf.mxu0  ;;  %v3110_v0 = vadd.f32 %v9280_v54, %v9279_v20 }
 0x594   :  { %v3501_v57 = vpop.f32.mrf.mxu1 }
 0x595   :  { %4338 = vmatpush.bf16.msrb.mxu2 %v8023_v53  ;;  %v3235_v15 = vpop.f32.mrf.mxu3  ;;  %v4140_v53 = vmax.f32 %v3492_v12, 0.0 }
 0x596   :  { %v3236_v7 = vadd.f32 %v3235_v15, %v3107_v11  ;;  %3411 = vmatmul.bf16.gmra.mxu0 %v9276_v3  ;;  %v8170_v3 = vpop.f32.mrf.mxu2 }
 0x597   :  { %3540 = vmatmul.bf16.gmra.mxu1 %v9277_v58  ;;  %9281 = vst [vmem:[#allocation26_spill] sm:$0xff] %v8170_v3 }
 0x598   :  { %v3365_v42 = vadd.f32 %v3364_v29, %v3236_v7  ;;  %v9282_v29 = vld [vmem:[#allocation143_spill] sm:$0xff]  ;;  %v9283_v7 = vld [vmem:[#allocation157_spill] sm:$0xff] }
 0x599   :  { %4339 = vmatpush.bf16.msrb.mxu2 %v8011_v25  ;;  %v3112_v58 = vadd.f32 %v9283_v7, %v9282_v29 }
 0x59a   :  { %v3494_v43 = vadd.f32 %v3493_v34, %v3365_v42  ;;  %3277 = vmatmul.bf16.gmra.mxu3 %v9278_v36 }
 0x59b   :  { %v3374_v45 = vpop.f32.mrf.mxu0 }
 0x59c   :  { %v4143_v37 = vmax.f32 %v3494_v43, 0.0  ;;  %v3503_v25 = vpop.f32.mrf.mxu1  ;;  %v9284_v43 = vld [vmem:[#allocation41_spill] sm:$0xff] }
 0x59d   :  { %4340 = vmatpush.bf16.msrb.mxu2 %v7997_v47  ;;  %v3238_v1 = vpop.f32.mrf.mxu3 }
 0x59e   :  { %v8168_v15 = vpack.c.bf16 %v4143_v37, %v4140_v53  ;;  %v3239_v11 = vadd.f32 %v3238_v1, %v3110_v0  ;;  %v9286_v53 = vld [vmem:[#allocation17_spill] sm:$0xff]  ;;  %v8177_v3 = vpop.f32.mrf.mxu2 }
 0x59f   :  { %9287 = vst [vmem:[#allocation72_spill] sm:$0xff] %v8177_v3 }
 0x5a0   :  { %v3368_v47 = vadd.f32 %v3367_v51, %v3239_v11  ;;  %v9288_v51 = vld [vmem:[#allocation111_spill] sm:$0xff]  ;;  %v9289_v11 = vld [vmem:[#allocation160_spill] sm:$0xff] }
 0x5a1   :  { %v3115_v29 = vadd.f32 %v9289_v11, %v9288_v51 }
 0x5a2   :  { %v3497_v5 = vadd.f32 %v3496_v63, %v3368_v47  ;;  %v9290_v63 = vld [vmem:[#allocation115_spill] sm:$0xff] }
 0x5a3   :  { %v3377_v34 = vpop.f32.mrf.mxu0 }
 0x5a4   :  { %v3506_v12 = vpop.f32.mrf.mxu1  ;;  %v4146_v37 = vmax.f32 %v3497_v5, 0.0 }
 0x5a5   :  { %v3240_v42 = vpop.f32.mrf.mxu3 }
 0x5a6   :  { %v3241_v36 = vadd.f32 %v3240_v42, %v3112_v58  ;;  %3416 = vmatmul.bf16.gmra.mxu0 %v9284_v43  ;;  %v8181_v43 = vld [vmem:[#allocation1 + $0x12] sm:$0xff]  ;;  %v8186_v3 = vpop.f32.mrf.mxu2 }
 0x5a7   :  { %3545 = vmatmul.bf16.gmra.mxu1 %v9285_v55  ;;  %4328 = vmatmul.bf16.vlgmr.msra.gmra.mxu2 %v8181_v43  ;;  %9292 = vst [vmem:[#allocation75_spill] sm:$0xff] %v8186_v3 }
 0x5a8   :  { %v3370_v56 = vadd.f32 %v3369_v2, %v3241_v36 }
 0x5aa   :  { %v3499_v54 = vadd.f32 %v3498_v18, %v3370_v56  ;;  %3282 = vmatmul.bf16.gmra.mxu3 %v9286_v53  ;;  %v9291_v56 = vld [vmem:[#allocation165_spill] sm:$0xff] }
 0x5ab   :  { %v3379_v0 = vpop.f32.mrf.mxu0  ;;  %v3117_v2 = vadd.f32 %v9291_v56, %v9290_v63  ;;  %v9293_v53 = vld [vmem:[#allocation33_spill] sm:$0xff] }
 0x5ac   :  { %v4149_v1 = vmax.f32 %v3499_v54, 0.0  ;;  %v3508_v58 = vpop.f32.mrf.mxu1 }
 0x5ad   :  { %v3243_v7 = vpop.f32.mrf.mxu3 }
 0x5ae   :  { %v4251_v42 = vpack.c.bf16 %v4149_v1, %v4146_v37  ;;  %v3244_v20 = vadd.f32 %v3243_v7, %v3115_v29  ;;  %v9294_v37 = vld [vmem:[#allocation54_spill] sm:$0xff]  ;;  %v9295_v1 = vld [vmem:[#allocation31_spill] sm:$0xff]  ;;  %v8193_v3 = vpop.f32.mrf.mxu2 }
 0x5af   :  { %9298 = vst [vmem:[#allocation32_spill] sm:$0xff] %v8193_v3 }
 0x5b0   :  { %v3373_v18 = vadd.f32 %v3372_v44, %v3244_v20  ;;  %v9296_v44 = vld [vmem:[#allocation122_spill] sm:$0xff]  ;;  %v9297_v20 = vld [vmem:[#allocation167_spill] sm:$0xff] }
 0x5b1   :  { %v3120_v63 = vadd.f32 %v9297_v20, %v9296_v44  ;;  %v9301_v20 = vld [vmem:[#allocation13_spill] sm:$0xff] }
 0x5b2   :  { %v3502_v11 = vadd.f32 %v3501_v57, %v3373_v18  ;;  %v9299_v57 = vld [vmem:[#allocation168_spill] sm:$0xff] }
 0x5b3   :  { %v3382_v5 = vpop.f32.mrf.mxu0 }
 0x5b4   :  { %v3511_v54 = vpop.f32.mrf.mxu1  ;;  %v4152_v7 = vmax.f32 %v3502_v11, 0.0  ;;  %v9300_v11 = vld [vmem:[#allocation12_spill] sm:$0xff] }
 0x5b5   :  { %v3245_v36 = vpop.f32.mrf.mxu3 }
 0x5b6   :  { %v3246_v47 = vadd.f32 %v3245_v36, %v3117_v2  ;;  %3817 = vmatmul.bf16.vlgmr.msrb.gmra.mxu0 %v9293_v53 }
 0x5b7   :  { %3946 = vmatmul.bf16.vlgmr.msrb.gmra.mxu1 %v9294_v37  ;;  %4341 = vmatmul.bf16.vlgmr.msrb.gmra.mxu2 %v8106_v9 }
 0x5b8   :  { %v3375_v51 = vadd.f32 %v3374_v45, %v3246_v47  ;;  %v3122_v45 = vadd.f32 %v9299_v57, %v9113_v28 }
 0x5ba   :  { %v3504_v29 = vadd.f32 %v3503_v25, %v3375_v51  ;;  %3287 = vmatmul.bf16.gmra.mxu3 %v9295_v1 }
 0x5bb   :  { %v3384_v32 = vpop.f32.mrf.mxu0 }
 0x5bc   :  { %v4155_v55 = vmax.f32 %v3504_v29, 0.0  ;;  %v3513_v36 = vpop.f32.mrf.mxu1 }
 0x5bd   :  { %v3248_v56 = vpop.f32.mrf.mxu3 }
 0x5be   :  { %v4254_v2 = vpack.c.bf16 %v4155_v55, %v4152_v7  ;;  %v3249_v60 = vadd.f32 %v3248_v56, %v3120_v63  ;;  %v9302_v63 = vld [vmem:[#allocation28_spill] sm:$0xff]  ;;  %v9303_v7 = vld [vmem:[#allocation35_spill] sm:$0xff]  ;;  %v9304_v56 = vld [vmem:[#allocation169_spill] sm:$0xff] }
 0x5bf   :  { %v3125_v9 = vadd.f32 %v9304_v56, %v9303_v7 }
 0x5c0   :  { %v3378_v25 = vadd.f32 %v3377_v34, %v3249_v60 }
 0x5c2   :  { %v3507_v37 = vadd.f32 %v3506_v12, %v3378_v25  ;;  %v9305_v12 = vld [vmem:[#allocation170_spill] sm:$0xff] }
 0x5c3   :  { %v3387_v53 = vpop.f32.mrf.mxu0 }
 0x5c4   :  { %v3516_v47 = vpop.f32.mrf.mxu1  ;;  %v4158_v3 = vmax.f32 %v3507_v37, 0.0 }
 0x5c5   :  { %v3250_v51 = vpop.f32.mrf.mxu3 }
 0x5c6   :  { %v3251_v18 = vadd.f32 %v3250_v51, %v3122_v45  ;;  %3822 = vmatmul.bf16.gmra.mxu0 %v9300_v11 }
 0x5c7   :  { %3951 = vmatmul.bf16.gmra.mxu1 %v9301_v20  ;;  %v9306_v20 = vld [vmem:[#allocation36_spill] sm:$0xff] }
 0x5c8   :  { %v3380_v29 = vadd.f32 %v3379_v0, %v3251_v18  ;;  %v3127_v0 = vadd.f32 %v9305_v12, %v7868_v50 }
 0x5ca   :  { %v3509_v55 = vadd.f32 %v3508_v58, %v3380_v29  ;;  %3688 = vmatmul.bf16.vlgmr.msra.gmra.mxu3 %v9302_v63 }
 0x5cb   :  { %v3389_v57 = vpop.f32.mrf.mxu0 }
 0x5cc   :  { %v4161_v44 = vmax.f32 %v3509_v55, 0.0  ;;  %v3518_v45 = vpop.f32.mrf.mxu1  ;;  %v9307_v55 = vld [vmem:[#allocation25_spill] sm:$0xff] }
 0x5cd   :  { %v3253_v60 = vpop.f32.mrf.mxu3 }
 0x5ce   :  { %v4257_v34 = vpack.c.bf16 %v4161_v44, %v4158_v3  ;;  %v3254_v28 = vadd.f32 %v3253_v60, %v3125_v9 }
 0x5d0   :  { %v3383_v51 = vadd.f32 %v3382_v5, %v3254_v28  ;;  %4346 = vmatpush.bf16.msra.mxu2 %v4257_v34  ;;  %v9308_v28 = vld [vmem:[#allocation171_spill] sm:$0xff] }
 0x5d1   :  { %v3130_v5 = vadd.f32 %v9308_v28, %v7855_v23 }
 0x5d2   :  { %v3512_v11 = vadd.f32 %v3511_v54, %v3383_v51  ;;  %v8217_v51 = vpop.f32.mrf.mxu2 }
 0x5d3   :  { %v3392_v58 = vpop.f32.mrf.mxu0 }
 0x5d4   :  { %4347 = vmatpush.bf16.msra.mxu2 %v4254_v2  ;;  %v3521_v29 = vpop.f32.mrf.mxu1  ;;  %v4164_v54 = vmax.f32 %v3512_v11, 0.0 }
 0x5d5   :  { %v3255_v25 = vpop.f32.mrf.mxu3 }
 0x5d6   :  { %v3256_v18 = vadd.f32 %v3255_v25, %v3127_v0  ;;  %3827 = vmatmul.bf16.gmra.mxu0 %v9306_v20  ;;  %v9310_v0 = vld [vmem:[#allocation22_spill] sm:$0xff]  ;;  %v9314_v20 = vld [vmem:[#allocation176_spill] sm:$0xff] }
 0x5d7   :  { %3956 = vmatmul.bf16.gmra.mxu1 %v9307_v55 }
 0x5d8   :  { %v3385_v37 = vadd.f32 %v3384_v32, %v3256_v18  ;;  %4348 = vmatpush.bf16.msra.mxu2 %v4251_v42  ;;  %v9313_v18 = vld [vmem:[#allocation50_spill] sm:$0xff] }
 0x5da   :  { %v3514_v3 = vadd.f32 %v3513_v36, %v3385_v37  ;;  %3693 = vmatmul.bf16.gmra.mxu3 %v9128_v10  ;;  %v9309_v36 = vld [vmem:[#allocation175_spill] sm:$0xff]  ;;  %v3135_v37 = vadd.f32 %v9314_v20, %v9313_v18 }
 0x5db   :  { %v3394_v2 = vpop.f32.mrf.mxu0  ;;  %v3132_v10 = vadd.f32 %v9309_v36, %v7889_v16 }
 0x5dc   :  { %v4167_v44 = vmax.f32 %v3514_v3, 0.0  ;;  %4349 = vmatpush.bf16.msra.mxu2 %v8168_v15  ;;  %v3523_v9 = vpop.f32.mrf.mxu1 }
 0x5dd   :  { %v3258_v63 = vpop.f32.mrf.mxu3 }
 0x5de   :  { %v3259_v56 = vadd.f32 %v3258_v63, %v3130_v5  ;;  %v8211_v60 = vpack.c.bf16 %v4167_v44, %v4164_v54  ;;  %v9315_v63 = vld [vmem:[#allocation14_spill] sm:$0xff] }
 0x5e0   :  { %v3388_v32 = vadd.f32 %v3387_v53, %v3259_v56  ;;  %4350 = vmatpush.bf16.msra.mxu2 %v8156_v48  ;;  %v9311_v53 = vld [vmem:[#allocation23_spill] sm:$0xff]  ;;  %v9316_v56 = vld [vmem:[#allocation180_spill] sm:$0xff] }
 0x5e2   :  { %v3517_v42 = vadd.f32 %v3516_v47, %v3388_v32  ;;  %v9312_v47 = vld [vmem:[#allocation29_spill] sm:$0xff]  ;;  %v3137_v32 = vadd.f32 %v9316_v56, %v9315_v63 }
 0x5e3   :  { %v3397_v34 = vpop.f32.mrf.mxu0 }
 0x5e4   :  { %4351 = vmatpush.bf16.msra.mxu2 %v8143_v31  ;;  %v3526_v12 = vpop.f32.mrf.mxu1  ;;  %v4170_v31 = vmax.f32 %v3517_v42, 0.0 }
 0x5e5   :  { %v3260_v11 = vpop.f32.mrf.mxu3 }
 0x5e6   :  { %v3261_v15 = vadd.f32 %v3260_v11, %v3132_v10  ;;  %3832 = vmatmul.bf16.gmra.mxu0 %v9310_v0 }
 0x5e7   :  { %3961 = vmatmul.bf16.gmra.mxu1 %v9311_v53  ;;  %v9319_v53 = vld [vmem:[#allocation189_spill] sm:$0xff] }
 0x5e8   :  { %v3390_v25 = vadd.f32 %v3389_v57, %v3261_v15  ;;  %4352 = vmatpush.bf16.msra.mxu2 %v8126_v59  ;;  %v8228_v57 = vpop.f32.mrf.mxu2  ;;  %v9317_v15 = vld [vmem:[#allocation70_spill] sm:$0xff] }
 0x5ea   :  { %v3519_v48 = vadd.f32 %v3518_v45, %v3390_v25  ;;  %3698 = vmatmul.bf16.gmra.mxu3 %v9312_v47  ;;  %v9318_v25 = vld [vmem:[#allocation71_spill] sm:$0xff] }
 0x5eb   :  { %v3399_v3 = vpop.f32.mrf.mxu0 }
 0x5ec   :  { %v4173_v55 = vmax.f32 %v3519_v48, 0.0  ;;  %4353 = vmatpush.bf16.msra.mxu2 %v8108_v27  ;;  %v3528_v54 = vpop.f32.mrf.mxu1  ;;  %v9320_v48 = vld [vmem:[#allocation181_spill] sm:$0xff] }
 0x5ed   :  { %v3263_v28 = vpop.f32.mrf.mxu3 }
 0x5ee   :  { %v3264_v5 = vadd.f32 %v3263_v28, %v3135_v37  ;;  %v8226_v44 = vpack.c.bf16 %v4173_v55, %v4170_v31 }
 0x5ef   :  { %4354 = vmatmul.bf16.vlgmr.msra.gmra.mxu2 %v8124_v33  ;;  %v3140_v33 = vadd.f32 %v9320_v48, %v9319_v53  ;;  %v9350_v53 = vld [vmem:[#allocation120_spill] sm:$0xff] }
 0x5f0   :  { %v3393_v59 = vadd.f32 %v3392_v58, %v3264_v5 }
 0x5f2   :  { %v3522_v45 = vadd.f32 %v3521_v29, %v3393_v59 }
 0x5f3   :  { %v3402_v36 = vpop.f32.mrf.mxu0 }
 0x5f4   :  { %v3531_v11 = vpop.f32.mrf.mxu1  ;;  %v4176_v58 = vmax.f32 %v3522_v45, 0.0  ;;  %v9323_v45 = vld [vmem:[#allocation77_spill] sm:$0xff] }
 0x5f5   :  { %v3265_v42 = vpop.f32.mrf.mxu3 }
 0x5f6   :  { %v3266_v10 = vadd.f32 %v3265_v42, %v3137_v32  ;;  %3837 = vmatmul.bf16.gmra.mxu0 %v9142_v38  ;;  %v9321_v38 = vld [vmem:[#allocation185_spill] sm:$0xff]  ;;  %v9322_v42 = vld [vmem:[#allocation74_spill] sm:$0xff] }
 0x5f7   :  { %3966 = vmatmul.bf16.gmra.mxu1 %v9317_v15  ;;  %v9324_v15 = vld [vmem:[#allocation78_spill] sm:$0xff] }
 0x5f8   :  { %v3395_v27 = vadd.f32 %v3394_v2, %v3266_v10  ;;  %v3142_v2 = vadd.f32 %v9321_v38, %v7845_v8  ;;  %v9343_v8 = vld [vmem:[#allocation109_spill] sm:$0xff] }
 0x5fa   :  { %v3524_v0 = vadd.f32 %v3523_v9, %v3395_v27  ;;  %3703 = vmatmul.bf16.gmra.mxu3 %v9318_v25  ;;  %v9326_v25 = vld [vmem:[#allocation62_spill] sm:$0xff] }
 0x5fb   :  { %v3404_v47 = vpop.f32.mrf.mxu0 }
 0x5fc   :  { %v4179_v29 = vmax.f32 %v3524_v0, 0.0  ;;  %v3533_v31 = vpop.f32.mrf.mxu1  ;;  %v9325_v0 = vld [vmem:[#allocation43_spill] sm:$0xff] }
 0x5fd   :  { %v3268_v20 = vpop.f32.mrf.mxu3  ;;  %v3145_v48 = vadd.f32 %v9326_v25, %v9325_v0  ;;  %v9340_v0 = vld [vmem:[#allocation192_spill] sm:$0xff] }
 0x5fe   :  { %v3269_v37 = vadd.f32 %v3268_v20, %v3140_v33  ;;  %v8238_v55 = vpack.c.bf16 %v4179_v29, %v4176_v58 }
 0x600   :  { %v3398_v28 = vadd.f32 %v3397_v34, %v3269_v37 }
 0x602   :  { %v3527_v5 = vadd.f32 %v3526_v12, %v3398_v28 }
 0x603   :  { %v3407_v59 = vpop.f32.mrf.mxu0 }
 0x604   :  { %v3536_v32 = vpop.f32.mrf.mxu1  ;;  %v4182_v34 = vmax.f32 %v3527_v5, 0.0  ;;  %v9329_v5 = vld [vmem:[#allocation86_spill] sm:$0xff] }
 0x605   :  { %v3270_v9 = vpop.f32.mrf.mxu3 }
 0x606   :  { %v3271_v56 = vadd.f32 %v3270_v9, %v3142_v2  ;;  %3842 = vmatmul.bf16.gmra.mxu0 %v9322_v42 }
 0x607   :  { %3971 = vmatmul.bf16.gmra.mxu1 %v9323_v45 }
 0x608   :  { %v3400_v10 = vadd.f32 %v3399_v3, %v3271_v56  ;;  %v9327_v3 = vld [vmem:[#allocation188_spill] sm:$0xff] }
 0x609   :  { %v3147_v2 = vadd.f32 %v9327_v3, %v7865_v17 }
 0x60a   :  { %v3529_v27 = vadd.f32 %v3528_v54, %v3400_v10  ;;  %3708 = vmatmul.bf16.gmra.mxu3 %v9324_v15  ;;  %v9328_v10 = vld [vmem:[#allocation83_spill] sm:$0xff] }
 0x60b   :  { %v3409_v33 = vpop.f32.mrf.mxu0  ;;  %v9330_v15 = vld [vmem:[#allocation87_spill] sm:$0xff] }
 0x60c   :  { %v4185_v12 = vmax.f32 %v3529_v27, 0.0  ;;  %v3538_v20 = vpop.f32.mrf.mxu1 }
 0x60d   :  { %v3273_v58 = vpop.f32.mrf.mxu3 }
 0x60e   :  { %v3274_v29 = vadd.f32 %v3273_v58, %v3145_v48  ;;  %v8247_v37 = vpack.c.bf16 %v4185_v12, %v4182_v34  ;;  %v9332_v12 = vld [vmem:[#allocation58_spill] sm:$0xff] }
 0x610   :  { %v3403_v28 = vadd.f32 %v3402_v36, %v3274_v29 }
 0x612   :  { %v3532_v38 = vadd.f32 %v3531_v11, %v3403_v28  ;;  %v9331_v11 = vld [vmem:[#allocation164_spill] sm:$0xff] }
 0x613   :  { %v3412_v9 = vpop.f32.mrf.mxu0  ;;  %v3150_v58 = vadd.f32 %v9332_v12, %v9331_v11  ;;  %v9336_v12 = vld [vmem:[#allocation98_spill] sm:$0xff]  ;;  %v9337_v11 = vld [vmem:[#allocation156_spill] sm:$0xff] }
 0x614   :  { %v3541_v42 = vpop.f32.mrf.mxu1  ;;  %v4188_v25 = vmax.f32 %v3532_v38, 0.0 }
 0x615   :  { %v3275_v54 = vpop.f32.mrf.mxu3 }
 0x616   :  { %v3276_v56 = vadd.f32 %v3275_v54, %v3147_v2  ;;  %3847 = vmatmul.bf16.gmra.mxu0 %v9328_v10  ;;  %v9333_v2 = vld [vmem:[#allocation187_spill] sm:$0xff]  ;;  %v9334_v54 = vld [vmem:[#allocation190_spill] sm:$0xff] }
 0x617   :  { %3976 = vmatmul.bf16.gmra.mxu1 %v9329_v5  ;;  %v3152_v10 = vadd.f32 %v9334_v54, %v9333_v2  ;;  %v9338_v54 = vld [vmem:[#allocation191_spill] sm:$0xff] }
 0x618   :  { %v3405_v45 = vadd.f32 %v3404_v47, %v3276_v56 }
 0x61a   :  { %v3534_v27 = vadd.f32 %v3533_v31, %v3405_v45  ;;  %3713 = vmatmul.bf16.gmra.mxu3 %v9330_v15  ;;  %v9335_v15 = vld [vmem:[#allocation93_spill] sm:$0xff] }
 0x61b   :  { %v3414_v34 = vpop.f32.mrf.mxu0 }
 0x61c   :  { %v4191_v48 = vmax.f32 %v3534_v27, 0.0  ;;  %v3543_v29 = vpop.f32.mrf.mxu1 }
 0x61d   :  { %v3278_v36 = vpop.f32.mrf.mxu3 }
 0x61e   :  { %v8256_v28 = vpack.c.bf16 %v4191_v48, %v4188_v25  ;;  %v3279_v3 = vadd.f32 %v3278_v36, %v3150_v58 }
 0x620   :  { %v3408_v47 = vadd.f32 %v3407_v59, %v3279_v3  ;;  %v3155_v59 = vadd.f32 %v9338_v54, %v9337_v11  ;;  %v9347_v11 = vld [vmem:[#allocation19_spill] sm:$0xff] }
 0x622   :  { %v3537_v38 = vadd.f32 %v3536_v32, %v3408_v47 }
 0x623   :  { %v3417_v56 = vpop.f32.mrf.mxu0 }
 0x624   :  { %v3546_v45 = vpop.f32.mrf.mxu1  ;;  %v4194_v25 = vmax.f32 %v3537_v38, 0.0 }
 0x625   :  { %v3280_v5 = vpop.f32.mrf.mxu3 }
 0x626   :  { %v3281_v31 = vadd.f32 %v3280_v5, %v3152_v10  ;;  %3852 = vmatmul.bf16.gmra.mxu0 %v9335_v15  ;;  %v9339_v5 = vld [vmem:[#allocation159_spill] sm:$0xff] }
 0x627   :  { %3981 = vmatmul.bf16.gmra.mxu1 %v9166_v6  ;;  %v3157_v15 = vadd.f32 %v9340_v0, %v9339_v5  ;;  %v9345_v0 = vld [vmem:[#allocation16_spill] sm:$0xff] }
 0x628   :  { %v3410_v27 = vadd.f32 %v3409_v33, %v3281_v31  ;;  %v9341_v31 = vld [vmem:[#allocation108_spill] sm:$0xff] }
 0x62a   :  { %v3539_v17 = vadd.f32 %v3538_v20, %v3410_v27  ;;  %3718 = vmatmul.bf16.gmra.mxu3 %v9336_v12  ;;  %v9342_v27 = vld [vmem:[#allocation110_spill] sm:$0xff] }
 0x62b   :  { %v3419_v36 = vpop.f32.mrf.mxu0 }
 0x62c   :  { %v4197_v48 = vmax.f32 %v3539_v17, 0.0  ;;  %v3548_v3 = vpop.f32.mrf.mxu1 }
 0x62d   :  { %v3283_v58 = vpop.f32.mrf.mxu3 }
 0x62e   :  { %v4275_v2 = vpack.c.bf16 %v4197_v48, %v4194_v25  ;;  %v3284_v10 = vadd.f32 %v3283_v58, %v3155_v59  ;;  %v9344_v59 = vld [vmem:[#allocation163_spill] sm:$0xff] }
 0x630   :  { %v3413_v32 = vadd.f32 %v3412_v9, %v3284_v10  ;;  %v3160_v9 = vadd.f32 %v9345_v0, %v9344_v59 }
 0x632   :  { %v3542_v38 = vadd.f32 %v3541_v42, %v3413_v32 }
 0x633   :  { %v3818_v33 = vpop.f32.mrf.mxu0 }
 0x634   :  { %v3947_v20 = vpop.f32.mrf.mxu1  ;;  %v4200_v54 = vmax.f32 %v3542_v38, 0.0 }
 0x635   :  { %v3285_v47 = vpop.f32.mrf.mxu3 }
 0x636   :  { %v3286_v6 = vadd.f32 %v3285_v47, %v3157_v15  ;;  %3857 = vmatmul.bf16.gmra.mxu0 %v9341_v31  ;;  %v9346_v47 = vld [vmem:[#allocation152_spill] sm:$0xff] }
 0x637   :  { %3986 = vmatmul.bf16.gmra.mxu1 %v9342_v27  ;;  %v3162_v31 = vadd.f32 %v9347_v11, %v9346_v47  ;;  %v9349_v27 = vld [vmem:[#allocation121_spill] sm:$0xff] }
 0x638   :  { %v3415_v17 = vadd.f32 %v3414_v34, %v3286_v6 }
 0x63a   :  { %v3544_v12 = vadd.f32 %v3543_v29, %v3415_v17  ;;  %3723 = vmatmul.bf16.gmra.mxu3 %v9343_v8  ;;  %v9348_v17 = vld [vmem:[#allocation119_spill] sm:$0xff] }
 0x63b   :  { %v3820_v48 = vpop.f32.mrf.mxu0 }
 0x63c   :  { %v4203_v25 = vmax.f32 %v3544_v12, 0.0  ;;  %v3949_v5 = vpop.f32.mrf.mxu1 }
 0x63d   :  { %v3288_v58 = vpop.f32.mrf.mxu3 }
 0x63e   :  { %v4278_v10 = vpack.c.bf16 %v4203_v25, %v4200_v54  ;;  %v3289_v15 = vadd.f32 %v3288_v58, %v3160_v9  ;;  %v9351_v54 = vld [vmem:[#allocation124_spill] sm:$0xff]  ;;  %v9352_v25 = vld [vmem:[#allocation15_spill] sm:$0xff] }
 0x63f   :  { %v3561_v58 = vadd.f32 %v9352_v25, %v9351_v54  ;;  %v9357_v25 = vld [vmem:[#allocation128_spill] sm:$0xff] }
 0x640   :  { %v3418_v42 = vadd.f32 %v3417_v56, %v3289_v15 }
 0x642   :  { %v3547_v8 = vadd.f32 %v3546_v45, %v3418_v42  ;;  %v9353_v45 = vld [vmem:[#allocation126_spill] sm:$0xff] }
 0x643   :  { %v3823_v34 = vpop.f32.mrf.mxu0 }
 0x644   :  { %v3952_v29 = vpop.f32.mrf.mxu1  ;;  %v4206_v0 = vmax.f32 %v3547_v8, 0.0 }
 0x645   :  { %v3290_v32 = vpop.f32.mrf.mxu3 }
 0x646   :  { %v3291_v6 = vadd.f32 %v3290_v32, %v3162_v31  ;;  %3862 = vmatmul.bf16.gmra.mxu0 %v9348_v17 }
 0x647   :  { %3991 = vmatmul.bf16.gmra.mxu1 %v9349_v27  ;;  %v9355_v27 = vld [vmem:[#allocation47_spill] sm:$0xff] }
 0x648   :  { %v3420_v38 = vadd.f32 %v3419_v36, %v3291_v6  ;;  %v9354_v36 = vld [vmem:[#allocation24_spill] sm:$0xff] }
 0x649   :  { %v3563_v42 = vadd.f32 %v9354_v36, %v9353_v45 }
 0x64a   :  { %v3549_v12 = vadd.f32 %v3548_v3, %v3420_v38  ;;  %3728 = vmatmul.bf16.gmra.mxu3 %v9350_v53 }
 0x64b   :  { %v3825_v11 = vpop.f32.mrf.mxu0 }
 0x64c   :  { %v4209_v9 = vmax.f32 %v3549_v12, 0.0  ;;  %v3954_v31 = vpop.f32.mrf.mxu1  ;;  %v9356_v12 = vld [vmem:[#allocation129_spill] sm:$0xff] }
 0x64d   :  { %v3689_v56 = vpop.f32.mrf.mxu3 }
 0x64e   :  { %v4281_v15 = vpack.c.bf16 %v4209_v9, %v4206_v0  ;;  %v3690_v47 = vadd.f32 %v3689_v56, %v3561_v58 }
 0x650   :  { %v3819_v32 = vadd.f32 %v3818_v33, %v3690_v47  ;;  %4359 = vmatpush.bf16.msrb.mxu2 %v4281_v15  ;;  %v9358_v33 = vld [vmem:[#allocation30_spill] sm:$0xff] }
 0x652   :  { %v3948_v17 = vadd.f32 %v3947_v20, %v3819_v32  ;;  %v3566_v20 = vadd.f32 %v9358_v33, %v9192_v62  ;;  %v9360_v32 = vld [vmem:[#allocation40_spill] sm:$0xff] }
 0x653   :  { %v3828_v3 = vpop.f32.mrf.mxu0 }
 0x654   :  { %4360 = vmatpush.bf16.msrb.mxu2 %v4278_v10  ;;  %v3957_v38 = vpop.f32.mrf.mxu1  ;;  %v4069_v47 = vmax.f32 %v3948_v17, 0.0  ;;  %v8293_v17 = vpop.f32.mrf.mxu2 }
 0x655   :  { %v3691_v6 = vpop.f32.mrf.mxu3 }
 0x656   :  { %v3692_v53 = vadd.f32 %v3691_v6, %v3563_v42  ;;  %3867 = vmatmul.bf16.gmra.mxu0 %v9355_v27  ;;  %v9361_v6 = vld [vmem:[#allocation51_spill] sm:$0xff]  ;;  %v9364_v27 = vld [vmem:[#allocation106_spill] sm:$0xff] }
 0x657   :  { %3996 = vmatmul.bf16.gmra.mxu1 %v9356_v12 }
 0x658   :  { %v3821_v8 = vadd.f32 %v3820_v48, %v3692_v53  ;;  %4361 = vmatpush.bf16.msrb.mxu2 %v4275_v2 }
 0x65a   :  { %v3950_v54 = vadd.f32 %v3949_v5, %v3821_v8  ;;  %3733 = vmatmul.bf16.gmra.mxu3 %v9357_v25  ;;  %v9359_v5 = vld [vmem:[#allocation116_spill] sm:$0xff] }
 0x65b   :  { %v3830_v10 = vpop.f32.mrf.mxu0  ;;  %v3568_v45 = vadd.f32 %v9360_v32, %v9359_v5  ;;  %v9365_v8 = vld [vmem:[#allocation48_spill] sm:$0xff] }
 0x65c   :  { %v4072_v58 = vmax.f32 %v3950_v54, 0.0  ;;  %4362 = vmatpush.bf16.msrb.mxu2 %v8256_v28  ;;  %v3959_v56 = vpop.f32.mrf.mxu1  ;;  %v3571_v12 = vadd.f32 %v9365_v8, %v9364_v27 }
 0x65d   :  { %v3694_v0 = vpop.f32.mrf.mxu3 }
 0x65e   :  { %v3695_v9 = vadd.f32 %v3694_v0, %v3566_v20  ;;  %v8287_v15 = vpack.c.bf16 %v4072_v58, %v4069_v47  ;;  %v9366_v0 = vld [vmem:[#allocation18_spill] sm:$0xff] }
 0x660   :  { %v3824_v48 = vadd.f32 %v3823_v34, %v3695_v9  ;;  %4363 = vmatpush.bf16.msrb.mxu2 %v8247_v37  ;;  %v9362_v34 = vld [vmem:[#allocation133_spill] sm:$0xff] }
 0x661   :  { %v9367_v9 = vld [vmem:[#allocation69_spill] sm:$0xff] }
 0x662   :  { %v3953_v2 = vadd.f32 %v3952_v29, %v3824_v48  ;;  %v9363_v29 = vld [vmem:[#allocation132_spill] sm:$0xff]  ;;  %v3573_v48 = vadd.f32 %v9367_v9, %v9366_v0 }
 0x663   :  { %v3833_v62 = vpop.f32.mrf.mxu0 }
 0x664   :  { %4364 = vmatpush.bf16.msrb.mxu2 %v8238_v55  ;;  %v3962_v42 = vpop.f32.mrf.mxu1  ;;  %v4075_v55 = vmax.f32 %v3953_v2, 0.0 }
 0x665   :  { %v3696_v36 = vpop.f32.mrf.mxu3 }
 0x666   :  { %v3697_v28 = vadd.f32 %v3696_v36, %v3568_v45  ;;  %3872 = vmatmul.bf16.gmra.mxu0 %v9361_v6 }
 0x667   :  { %4001 = vmatmul.bf16.gmra.mxu1 %v9362_v34  ;;  %v9371_v34 = vld [vmem:[#allocation94_spill] sm:$0xff] }
 0x668   :  { %v3826_v53 = vadd.f32 %v3825_v11, %v3697_v28  ;;  %4365 = vmatpush.bf16.msrb.mxu2 %v8226_v44  ;;  %v8304_v11 = vpop.f32.mrf.mxu2  ;;  %v9369_v28 = vld [vmem:[#allocation136_spill] sm:$0xff] }
 0x66a   :  { %v3955_v37 = vadd.f32 %v3954_v31, %v3826_v53  ;;  %3738 = vmatmul.bf16.gmra.mxu3 %v9363_v29  ;;  %v9370_v53 = vld [vmem:[#allocation135_spill] sm:$0xff] }
 0x66b   :  { %v3835_v25 = vpop.f32.mrf.mxu0 }
 0x66c   :  { %v4078_v54 = vmax.f32 %v3955_v37, 0.0  ;;  %4366 = vmatpush.bf16.msrb.mxu2 %v8211_v60  ;;  %v3964_v47 = vpop.f32.mrf.mxu1  ;;  %v9368_v60 = vld [vmem:[#allocation55_spill] sm:$0xff]  ;;  %v9372_v37 = vld [vmem:[#allocation38_spill] sm:$0xff] }
 0x66d   :  { %v3699_v33 = vpop.f32.mrf.mxu3 }
 0x66e   :  { %v3700_v20 = vadd.f32 %v3699_v33, %v3571_v12  ;;  %v8302_v58 = vpack.c.bf16 %v4078_v54, %v4075_v55 }
 0x66f   :  { %4367 = vmatmul.bf16.vlgmr.msrb.gmra.mxu2 %v8181_v43  ;;  %v3576_v43 = vadd.f32 %v9372_v37, %v9371_v34 }
 0x670   :  { %v3829_v44 = vadd.f32 %v3828_v3, %v3700_v20  ;;  %v9373_v20 = vld [vmem:[#allocation100_spill] sm:$0xff] }
 0x672   :  { %v3958_v31 = vadd.f32 %v3957_v38, %v3829_v44 }
 0x673   :  { %v3838_v5 = vpop.f32.mrf.mxu0 }
 0x674   :  { %v3967_v45 = vpop.f32.mrf.mxu1  ;;  %v4081_v3 = vmax.f32 %v3958_v31, 0.0  ;;  %v9376_v31 = vld [vmem:[#allocation139_spill] sm:$0xff] }
 0x675   :  { %v3701_v2 = vpop.f32.mrf.mxu3 }
 0x676   :  { %v3702_v32 = vadd.f32 %v3701_v2, %v3573_v48  ;;  %3877 = vmatmul.bf16.gmra.mxu0 %v9368_v60  ;;  %v9375_v2 = vld [vmem:[#allocation59_spill] sm:$0xff] }
 0x677   :  { %4006 = vmatmul.bf16.gmra.mxu1 %v9369_v28  ;;  %v9378_v28 = vld [vmem:[#allocation92_spill] sm:$0xff] }
 0x678   :  { %v3831_v36 = vadd.f32 %v3830_v10, %v3702_v32  ;;  %v9374_v10 = vld [vmem:[#allocation73_spill] sm:$0xff] }
 0x679   :  { %v3578_v44 = vadd.f32 %v9374_v10, %v9373_v20 }
 0x67a   :  { %v3960_v6 = vadd.f32 %v3959_v56, %v3831_v36  ;;  %3743 = vmatmul.bf16.gmra.mxu3 %v9370_v53  ;;  %v9377_v36 = vld [vmem:[#allocation138_spill] sm:$0xff] }
 0x67b   :  { %v3840_v29 = vpop.f32.mrf.mxu0 }
 0x67c   :  { %v4084_v38 = vmax.f32 %v3960_v6, 0.0  ;;  %v3969_v12 = vpop.f32.mrf.mxu1  ;;  %v9379_v6 = vld [vmem:[#allocation52_spill] sm:$0xff] }
 0x67d   :  { %v3704_v27 = vpop.f32.mrf.mxu3  ;;  %v3581_v53 = vadd.f32 %v9379_v6, %v9378_v28  ;;  %v9386_v6 = vld [vmem:[#allocation81_spill] sm:$0xff] }
 0x67e   :  { %v3705_v8 = vadd.f32 %v3704_v27, %v3576_v43  ;;  %v8314_v55 = vpack.c.bf16 %v4084_v38, %v4081_v3 }
 0x680   :  { %v3834_v54 = vadd.f32 %v3833_v62, %v3705_v8 }
 0x682   :  { %v3963_v33 = vadd.f32 %v3962_v42, %v3834_v54  ;;  %v9380_v54 = vld [vmem:[#allocation113_spill] sm:$0xff] }
 0x683   :  { %v3843_v0 = vpop.f32.mrf.mxu0 }
 0x684   :  { %v3972_v48 = vpop.f32.mrf.mxu1  ;;  %v4087_v62 = vmax.f32 %v3963_v33, 0.0  ;;  %v9383_v33 = vld [vmem:[#allocation142_spill] sm:$0xff] }
 0x685   :  { %v3706_v56 = vpop.f32.mrf.mxu3 }
 0x686   :  { %v3707_v9 = vadd.f32 %v3706_v56, %v3578_v44  ;;  %3882 = vmatmul.bf16.gmra.mxu0 %v9375_v2 }
 0x687   :  { %4011 = vmatmul.bf16.gmra.mxu1 %v9376_v31  ;;  %v9384_v31 = vld [vmem:[#allocation141_spill] sm:$0xff] }
 0x688   :  { %v3836_v32 = vadd.f32 %v3835_v25, %v3707_v9  ;;  %v9381_v25 = vld [vmem:[#allocation76_spill] sm:$0xff]  ;;  %v9382_v9 = vld [vmem:[#allocation63_spill] sm:$0xff] }
 0x689   :  { %v3583_v20 = vadd.f32 %v9381_v25, %v9380_v54 }
 0x68a   :  { %v3965_v60 = vadd.f32 %v3964_v47, %v3836_v32  ;;  %3748 = vmatmul.bf16.gmra.mxu3 %v9377_v36 }
 0x68b   :  { %v3845_v34 = vpop.f32.mrf.mxu0 }
 0x68c   :  { %v4090_v42 = vmax.f32 %v3965_v60, 0.0  ;;  %v3974_v3 = vpop.f32.mrf.mxu1 }
 0x68d   :  { %v3709_v37 = vpop.f32.mrf.mxu3 }
 0x68e   :  { %v3710_v43 = vadd.f32 %v3709_v37, %v3581_v53  ;;  %v8323_v38 = vpack.c.bf16 %v4090_v42, %v4087_v62 }
 0x690   :  { %v3839_v27 = vadd.f32 %v3838_v5, %v3710_v43  ;;  %v9387_v43 = vld [vmem:[#allocation89_spill] sm:$0xff] }
 0x692   :  { %v3968_v8 = vadd.f32 %v3967_v45, %v3839_v27  ;;  %v9385_v45 = vld [vmem:[#allocation104_spill] sm:$0xff] }
 0x693   :  { %v3848_v10 = vpop.f32.mrf.mxu0  ;;  %v3586_v53 = vadd.f32 %v9386_v6, %v9385_v45  ;;  %v9388_v27 = vld [vmem:[#allocation56_spill] sm:$0xff]  ;;  %v9392_v45 = vld [vmem:[#allocation82_spill] sm:$0xff]  ;;  %v9393_v6 = vld [vmem:[#allocation85_spill] sm:$0xff] }
 0x694   :  { %v3977_v56 = vpop.f32.mrf.mxu1  ;;  %v4093_v60 = vmax.f32 %v3968_v8, 0.0  ;;  %v3588_v54 = vadd.f32 %v9388_v27, %v9387_v43  ;;  %v9394_v27 = vld [vmem:[#allocation88_spill] sm:$0xff] }
 0x695   :  { %v3711_v47 = vpop.f32.mrf.mxu3 }
 0x696   :  { %v3712_v44 = vadd.f32 %v3711_v47, %v3583_v20  ;;  %3887 = vmatmul.bf16.gmra.mxu0 %v9382_v9 }
 0x697   :  { %4016 = vmatmul.bf16.gmra.mxu1 %v9383_v33 }
 0x698   :  { %v3841_v2 = vadd.f32 %v3840_v29, %v3712_v44  ;;  %v9389_v44 = vld [vmem:[#allocation147_spill] sm:$0xff] }
 0x69a   :  { %v3970_v32 = vadd.f32 %v3969_v12, %v3841_v2  ;;  %3753 = vmatmul.bf16.gmra.mxu3 %v9384_v31  ;;  %v9390_v2 = vld [vmem:[#allocation149_spill] sm:$0xff] }
 0x69b   :  { %v3850_v28 = vpop.f32.mrf.mxu0 }
 0x69c   :  { %v4096_v36 = vmax.f32 %v3970_v32, 0.0  ;;  %v3979_v62 = vpop.f32.mrf.mxu1  ;;  %v9391_v32 = vld [vmem:[#allocation148_spill] sm:$0xff] }
 0x69d   :  { %v3714_v5 = vpop.f32.mrf.mxu3 }
 0x69e   :  { %v8332_v42 = vpack.c.bf16 %v4096_v36, %v4093_v60  ;;  %v3715_v37 = vadd.f32 %v3714_v5, %v3586_v53 }
 0x6a0   :  { %v3844_v29 = vadd.f32 %v3843_v0, %v3715_v37  ;;  %v3591_v0 = vadd.f32 %v9393_v6, %v9392_v45  ;;  %v9399_v6 = vld [vmem:[#allocation80_spill] sm:$0xff] }
 0x6a2   :  { %v3973_v8 = vadd.f32 %v3972_v48, %v3844_v29 }
 0x6a3   :  { %v3853_v25 = vpop.f32.mrf.mxu0 }
 0x6a4   :  { %v3982_v47 = vpop.f32.mrf.mxu1  ;;  %v4099_v31 = vmax.f32 %v3973_v8, 0.0 }
 0x6a5   :  { %v3716_v20 = vpop.f32.mrf.mxu3 }
 0x6a6   :  { %v3717_v12 = vadd.f32 %v3716_v20, %v3588_v54  ;;  %3892 = vmatmul.bf16.gmra.mxu0 %v9389_v44  ;;  %v9395_v54 = vld [vmem:[#allocation91_spill] sm:$0xff] }
 0x6a7   :  { %4021 = vmatmul.bf16.gmra.mxu1 %v9390_v2  ;;  %v3593_v20 = vadd.f32 %v9395_v54, %v9394_v27  ;;  %v9396_v44 = vld [vmem:[#allocation27_spill] sm:$0xff] }
 0x6a8   :  { %v3846_v9 = vadd.f32 %v3845_v34, %v3717_v12  ;;  %v9397_v2 = vld [vmem:[#allocation155_spill] sm:$0xff] }
 0x6aa   :  { %v3975_v33 = vadd.f32 %v3974_v3, %v3846_v9  ;;  %3758 = vmatmul.bf16.gmra.mxu3 %v9391_v32  ;;  %v9398_v32 = vld [vmem:[#allocation154_spill] sm:$0xff] }
 0x6ab   :  { %v3855_v36 = vpop.f32.mrf.mxu0 }
 0x6ac   :  { %v4102_v60 = vmax.f32 %v3975_v33, 0.0  ;;  %v3984_v53 = vpop.f32.mrf.mxu1 }
 0x6ad   :  { %v3719_v5 = vpop.f32.mrf.mxu3 }
 0x6ae   :  { %v4228_v37 = vpack.c.bf16 %v4102_v60, %v4099_v31  ;;  %v3720_v43 = vadd.f32 %v3719_v5, %v3591_v0  ;;  %v9400_v0 = vld [vmem:[#allocation60_spill] sm:$0xff] }
 0x6b0   :  { %v3849_v48 = vadd.f32 %v3848_v10, %v3720_v43  ;;  %v3596_v10 = vadd.f32 %v9400_v0, %v9399_v6 }
 0x6b2   :  { %v3978_v8 = vadd.f32 %v3977_v56, %v3849_v48 }
 0x6b3   :  { %v3858_v34 = vpop.f32.mrf.mxu0 }
 0x6b4   :  { %v3987_v3 = vpop.f32.mrf.mxu1  ;;  %v4105_v45 = vmax.f32 %v3978_v8, 0.0 }
 0x6b5   :  { %v3721_v29 = vpop.f32.mrf.mxu3 }
 0x6b6   :  { %v3722_v12 = vadd.f32 %v3721_v29, %v3593_v20  ;;  %3897 = vmatmul.bf16.gmra.mxu0 %v9396_v44  ;;  %v9401_v20 = vld [vmem:[#allocation99_spill] sm:$0xff]  ;;  %v9402_v29 = vld [vmem:[#allocation96_spill] sm:$0xff] }
 0x6b7   :  { %4026 = vmatmul.bf16.gmra.mxu1 %v9397_v2  ;;  %v3598_v44 = vadd.f32 %v9402_v29, %v9401_v20  ;;  %v8355_v20 = vpop.f32.mrf.mxu2 }
 0x6b8   :  { %v3851_v9 = vadd.f32 %v3850_v28, %v3722_v12 }
 0x6ba   :  { %v3980_v33 = vadd.f32 %v3979_v62, %v3851_v9  ;;  %3763 = vmatmul.bf16.gmra.mxu3 %v9398_v32  ;;  %v9403_v9 = vld [vmem:[#allocation161_spill] sm:$0xff] }
 0x6bb   :  { %v3860_v60 = vpop.f32.mrf.mxu0  ;;  %v9404_v32 = vld [vmem:[#allocation97_spill] sm:$0xff] }
 0x6bc   :  { %v4108_v31 = vmax.f32 %v3980_v33, 0.0  ;;  %v3989_v27 = vpop.f32.mrf.mxu1 }
 0x6bd   :  { %v3724_v5 = vpop.f32.mrf.mxu3 }
 0x6be   :  { %v4231_v43 = vpack.c.bf16 %v4108_v31, %v4105_v45  ;;  %v3725_v54 = vadd.f32 %v3724_v5, %v3596_v10  ;;  %v3601_v45 = vadd.f32 %v9404_v32, %v7551_v46 }
 0x6c0   :  { %v3854_v56 = vadd.f32 %v3853_v25, %v3725_v54 }
 0x6c2   :  { %v3983_v8 = vadd.f32 %v3982_v47, %v3854_v56 }
 0x6c3   :  { %v3863_v28 = vpop.f32.mrf.mxu0 }
 0x6c4   :  { %v3992_v62 = vpop.f32.mrf.mxu1  ;;  %v4111_v31 = vmax.f32 %v3983_v8, 0.0 }
 0x6c5   :  { %v3726_v48 = vpop.f32.mrf.mxu3 }
 0x6c6   :  { %v3727_v12 = vadd.f32 %v3726_v48, %v3598_v44  ;;  %3902 = vmatmul.bf16.gmra.mxu0 %v9403_v9  ;;  %v8360_v48 = vpop.f32.mrf.mxu2 }
 0x6c7   :  { %4031 = vmatmul.bf16.gmra.mxu1 %v7539_v40  ;;  %v9405_v40 = vld [vmem:[#allocation103_spill] sm:$0xff] }
 0x6c8   :  { %v3856_v2 = vadd.f32 %v3855_v36, %v3727_v12  ;;  %v3603_v36 = vadd.f32 %v9405_v40, %v9253_v39 }
 0x6ca   :  { %v3985_v33 = vadd.f32 %v3984_v53, %v3856_v2  ;;  %3768 = vmatmul.bf16.gmra.mxu3 %v9250_v21 }
 0x6cb   :  { %v3865_v6 = vpop.f32.mrf.mxu0 }
 0x6cc   :  { %v4114_v5 = vmax.f32 %v3985_v33, 0.0  ;;  %v3994_v54 = vpop.f32.mrf.mxu1 }
 0x6cd   :  { %v3729_v25 = vpop.f32.mrf.mxu3 }
 0x6ce   :  { %v4234_v0 = vpack.c.bf16 %v4114_v5, %v4111_v31  ;;  %v3730_v10 = vadd.f32 %v3729_v25, %v3601_v45 }
 0x6d0   :  { %v3859_v29 = vadd.f32 %v3858_v34, %v3730_v10  ;;  %4372 = vmatpush.bf16.msra.mxu2 %v4234_v0  ;;  %v9406_v34 = vld [vmem:[#allocation64_spill] sm:$0xff] }
 0x6d2   :  { %v3988_v47 = vadd.f32 %v3987_v3, %v3859_v29  ;;  %v3606_v3 = vadd.f32 %v9406_v34, %v7603_v14 }
 0x6d3   :  { %v3868_v21 = vpop.f32.mrf.mxu0 }
 0x6d4   :  { %4373 = vmatpush.bf16.msra.mxu2 %v4231_v43  ;;  %v3997_v46 = vpop.f32.mrf.mxu1  ;;  %v4117_v39 = vmax.f32 %v3988_v47, 0.0 }
 0x6d5   :  { %v3731_v53 = vpop.f32.mrf.mxu3 }
 0x6d6   :  { %v3732_v44 = vadd.f32 %v3731_v53, %v3603_v36  ;;  %3907 = vmatmul.bf16.gmra.mxu0 %v7585_v61 }
 0x6d7   :  { %4036 = vmatmul.bf16.gmra.mxu1 %v7595_v52 }
 0x6d8   :  { %v3861_v56 = vadd.f32 %v3860_v60, %v3732_v44  ;;  %4374 = vmatpush.bf16.msra.mxu2 %v4228_v37 }
 0x6da   :  { %v3990_v12 = vadd.f32 %v3989_v27, %v3861_v56  ;;  %3773 = vmatmul.bf16.gmra.mxu3 %v7593_v24  ;;  %v8370_v27 = vpop.f32.mrf.mxu2  ;;  %v9407_v24 = vld [vmem:[#allocation107_spill] sm:$0xff]  ;;  %v9410_v56 = vld [vmem:[#allocation145_spill] sm:$0xff] }
 0x6db   :  { %v3870_v9 = vpop.f32.mrf.mxu0  ;;  %v3608_v33 = vadd.f32 %v9407_v24, %v7508_v41 }
 0x6dc   :  { %v4120_v43 = vmax.f32 %v3990_v12, 0.0  ;;  %4375 = vmatpush.bf16.msra.mxu2 %v8332_v42  ;;  %v3999_v61 = vpop.f32.mrf.mxu1 }
 0x6dd   :  { %v3734_v8 = vpop.f32.mrf.mxu3 }
 0x6de   :  { %v3735_v2 = vadd.f32 %v3734_v8, %v3606_v3  ;;  %v8367_v60 = vpack.c.bf16 %v4120_v43, %v4117_v39 }
 0x6e0   :  { %v3864_v37 = vadd.f32 %v3863_v28, %v3735_v2  ;;  %4376 = vmatpush.bf16.msra.mxu2 %v8323_v38  ;;  %v9408_v28 = vld [vmem:[#allocation114_spill] sm:$0xff] }
 0x6e2   :  { %v3993_v52 = vadd.f32 %v3992_v62, %v3864_v37  ;;  %v3611_v62 = vadd.f32 %v9408_v28, %v7474_v26  ;;  %v8382_v25 = vpop.f32.mrf.mxu2  ;;  %v9417_v28 = vld [vmem:[#allocation178_spill] sm:$0xff] }
 0x6e3   :  { %v3873_v14 = vpop.f32.mrf.mxu0 }
 0x6e4   :  { %4377 = vmatpush.bf16.msra.mxu2 %v8314_v55  ;;  %v4002_v45 = vpop.f32.mrf.mxu1  ;;  %v4123_v41 = vmax.f32 %v3993_v52, 0.0 }
 0x6e5   :  { %v3736_v32 = vpop.f32.mrf.mxu3 }
 0x6e6   :  { %v3737_v42 = vadd.f32 %v3736_v32, %v3608_v33  ;;  %3912 = vmatmul.bf16.gmra.mxu0 %v7632_v30  ;;  %v9415_v32 = vld [vmem:[#allocation177_spill] sm:$0xff] }
 0x6e7   :  { %4041 = vmatmul.bf16.gmra.mxu1 %v7642_v49 }
 0x6e8   :  { %v3866_v31 = vadd.f32 %v3865_v6, %v3737_v42  ;;  %4378 = vmatpush.bf16.msra.mxu2 %v8302_v58  ;;  %v5234_v58 = vld [vmem:[#allocation1] sm:$0xff] }
 0x6ea   :  { %v3995_v38 = vadd.f32 %v3994_v54, %v3866_v31  ;;  %3778 = vmatmul.bf16.gmra.mxu3 %v7640_v22  ;;  %v9409_v22 = vld [vmem:[#allocation20_spill] sm:$0xff]  ;;  %v9416_v31 = vld [vmem:[#allocation179_spill] sm:$0xff] }
 0x6eb   :  { %v3875_v55 = vpop.f32.mrf.mxu0  ;;  %v3613_v29 = vadd.f32 %v9409_v22, %v7563_v35 }
 0x6ec   :  { %v4126_v5 = vmax.f32 %v3995_v38, 0.0  ;;  %4379 = vmatpush.bf16.msra.mxu2 %v8287_v15  ;;  %v4004_v6 = vpop.f32.mrf.mxu1  ;;  %v8388_v15 = vpop.f32.mrf.mxu2 }
 0x6ed   :  { %v3739_v0 = vpop.f32.mrf.mxu3 }
 0x6ee   :  { %v3740_v30 = vadd.f32 %v3739_v0, %v3611_v62  ;;  %v8384_v10 = vpack.c.bf16 %v4126_v5, %v4123_v41  ;;  %v9419_v41 = vld [vmem:[#allocation21_spill] sm:$0xff] }
 0x6ef   :  { %4380 = vmatmul.bf16.vlgmr.msra.gmra.mxu2 %v5234_v58 }
 0x6f0   :  { %v3869_v49 = vadd.f32 %v3868_v21, %v3740_v30  ;;  %v9411_v21 = vld [vmem:[#allocation118_spill] sm:$0xff] }
 0x6f2   :  { %v3998_v54 = vadd.f32 %v3997_v46, %v3869_v49  ;;  %v3616_v46 = vadd.f32 %v9411_v21, %v9410_v56 }
 0x6f3   :  { %v3878_v26 = vpop.f32.mrf.mxu0 }
 0x6f4   :  { %v4007_v36 = vpop.f32.mrf.mxu1  ;;  %v4129_v12 = vmax.f32 %v3998_v54, 0.0  ;;  %v8397_v37 = vpop.f32.mrf.mxu2 }
 0x6f5   :  { %v3741_v47 = vpop.f32.mrf.mxu3  ;;  %9412 = vst [vmem:[#allocation79_spill] sm:$0xff] %v8397_v37 }
 0x6f6   :  { %v3742_v40 = vadd.f32 %v3741_v47, %v3613_v29  ;;  %3917 = vmatmul.bf16.gmra.mxu0 %v9262_v4  ;;  %v9420_v47 = vld [vmem:[#allocation158_spill] sm:$0xff] }
 0x6f7   :  { %4046 = vmatmul.bf16.gmra.mxu1 %v9263_v13  ;;  %v9414_v13 = vld [vmem:[#allocation46_spill] sm:$0xff] }
 0x6f8   :  { %v3871_v53 = vadd.f32 %v3870_v9, %v3742_v40  ;;  %v9413_v9 = vld [vmem:[#allocation150_spill] sm:$0xff] }
 0x6f9   :  { %v9421_v40 = vld [vmem:[#allocation42_spill] sm:$0xff] }
 0x6fa   :  { %v4000_v44 = vadd.f32 %v3999_v61, %v3871_v53  ;;  %3783 = vmatmul.bf16.gmra.mxu3 %v9264_v19  ;;  %v3618_v61 = vadd.f32 %v9414_v13, %v9413_v9  ;;  %v9425_v13 = vld [vmem:[#allocation123_spill] sm:$0xff] }
 0x6fb   :  { %v3880_v35 = vpop.f32.mrf.mxu0 }
 0x6fc   :  { %v4132_v34 = vmax.f32 %v4000_v44, 0.0  ;;  %v4009_v43 = vpop.f32.mrf.mxu1  ;;  %v8404_v62 = vpop.f32.mrf.mxu2 }
 0x6fd   :  { %v3744_v3 = vpop.f32.mrf.mxu3 }
 0x6fe   :  { %v3745_v39 = vadd.f32 %v3744_v3, %v3616_v46  ;;  %v8395_v8 = vpack.c.bf16 %v4132_v34, %v4129_v12  ;;  %v9422_v12 = vld [vmem:[#allocation182_spill] sm:$0xff]  ;;  %v9423_v3 = vld [vmem:[#allocation184_spill] sm:$0xff] }
 0x700   :  { %v3874_v2 = vadd.f32 %v3873_v14, %v3745_v39  ;;  %v9418_v14 = vld [vmem:[#allocation65_spill] sm:$0xff] }
 0x702   :  { %v4003_v4 = vadd.f32 %v4002_v45, %v3874_v2  ;;  %v3621_v45 = vadd.f32 %v9419_v41, %v9418_v14  ;;  %v9424_v2 = vld [vmem:[#allocation183_spill] sm:$0xff] }
 0x703   :  { %v3883_v52 = vpop.f32.mrf.mxu0 }
 0x704   :  { %v4012_v33 = vpop.f32.mrf.mxu1  ;;  %v4135_v5 = vmax.f32 %v4003_v4, 0.0  ;;  %v8412_v44 = vpop.f32.mrf.mxu2 }
 0x705   :  { %v3746_v19 = vpop.f32.mrf.mxu3 }
 0x706   :  { %v3747_v24 = vadd.f32 %v3746_v19, %v3618_v61  ;;  %3922 = vmatmul.bf16.gmra.mxu0 %v9415_v32  ;;  %v9426_v61 = vld [vmem:[#allocation130_spill] sm:$0xff] }
 0x707   :  { %4051 = vmatmul.bf16.gmra.mxu1 %v9416_v31  ;;  %v3626_v19 = vadd.f32 %v9426_v61, %v9425_v13 }
 0x708   :  { %v3876_v42 = vadd.f32 %v3875_v55, %v3747_v24 }
 0x70a   :  { %v4005_v38 = vadd.f32 %v4004_v6, %v3876_v42  ;;  %3788 = vmatmul.bf16.gmra.mxu3 %v9417_v28  ;;  %v3623_v6 = vadd.f32 %v9421_v40, %v9420_v47  ;;  %v9431_v40 = vld [vmem:[#allocation17_spill] sm:$0xff] }
 0x70b   :  { %v3885_v30 = vpop.f32.mrf.mxu0 }
 0x70c   :  { %v4138_v0 = vmax.f32 %v4005_v38, 0.0  ;;  %v4014_v54 = vpop.f32.mrf.mxu1  ;;  %v8423_v42 = vpop.f32.mrf.mxu2  ;;  %v9427_v38 = vld [vmem:[#allocation143_spill] sm:$0xff] }
 0x70d   :  { %v3749_v58 = vpop.f32.mrf.mxu3 }
 0x70e   :  { %v3750_v49 = vadd.f32 %v3749_v58, %v3621_v45  ;;  %v8408_v22 = vpack.c.bf16 %v4138_v0, %v4135_v5  ;;  %v9429_v0 = vld [vmem:[#allocation41_spill] sm:$0xff] }
 0x710   :  { %v3879_v29 = vadd.f32 %v3878_v26, %v3750_v49 }
 0x712   :  { %v4008_v55 = vadd.f32 %v4007_v36, %v3879_v29 }
 0x713   :  { %v3888_v53 = vpop.f32.mrf.mxu0 }
 0x714   :  { %v8414_v46 = vpop.f32.mrf.mxu1  ;;  %v4141_v26 = vmax.f32 %v4008_v55, 0.0  ;;  %v8428_v29 = vpop.f32.mrf.mxu2  ;;  %v9430_v55 = vld [vmem:[#allocation186_spill] sm:$0xff] }
 0x715   :  { %v3751_v56 = vpop.f32.mrf.mxu3 }
 0x716   :  { %v3752_v21 = vadd.f32 %v3751_v56, %v3623_v6  ;;  %3927 = vmatmul.bf16.gmra.mxu0 %v9422_v12 }
 0x717   :  { %4056 = vmatmul.bf16.gmra.mxu1 %v9423_v3 }
 0x718   :  { %v3881_v34 = vadd.f32 %v3880_v35, %v3752_v21  ;;  %v9428_v35 = vld [vmem:[#allocation68_spill] sm:$0xff] }
 0x719   :  { %v3628_v28 = vadd.f32 %v9428_v35, %v9427_v38 }
 0x71a   :  { %v4010_v39 = vadd.f32 %v4009_v43, %v3881_v34  ;;  %3793 = vmatmul.bf16.gmra.mxu3 %v9424_v2 }
 0x71b   :  { %v3890_v4 = vpop.f32.mrf.mxu0 }
 0x71c   :  { %v4144_v36 = vmax.f32 %v4010_v39, 0.0  ;;  %v4019_v32 = vpop.f32.mrf.mxu1  ;;  %v8432_v3 = vpop.f32.mrf.mxu2 }
 0x71d   :  { %v3754_v9 = vpop.f32.mrf.mxu3 }
 0x71e   :  { %v8421_v24 = vpack.c.bf16 %v4144_v36, %v4141_v26  ;;  %v3755_v31 = vadd.f32 %v3754_v9, %v3626_v19  ;;  %v9434_v9 = vld [vmem:[#allocation75_spill] sm:$0xff] }
 0x71f   :  { %v9435_v19 = vld [vmem:[#allocation115_spill] sm:$0xff] }
 0x720   :  { %v3884_v14 = vadd.f32 %v3883_v52, %v3755_v31  ;;  %v9436_v31 = vld [vmem:[#allocation72_spill] sm:$0xff] }
 0x721   :  { %v3633_v38 = vadd.f32 %v9436_v31, %v9435_v19 }
 0x722   :  { %v4013_v58 = vadd.f32 %v4012_v33, %v3884_v14  ;;  %v9438_v14 = vld [vmem:[#allocation26_spill] sm:$0xff] }
 0x723   :  { %v3893_v43 = vpop.f32.mrf.mxu0 }
 0x724   :  { %v4022_v5 = vpop.f32.mrf.mxu1  ;;  %v4147_v6 = vmax.f32 %v4013_v58, 0.0  ;;  %v9440_v58 = vld [vmem:[#allocation32_spill] sm:$0xff] }
 0x725   :  { %v3756_v41 = vpop.f32.mrf.mxu3 }
 0x726   :  { %v3757_v45 = vadd.f32 %v3756_v41, %v3628_v28  ;;  %3932 = vmatmul.bf16.gmra.mxu0 %v9429_v0  ;;  %v9437_v28 = vld [vmem:[#allocation111_spill] sm:$0xff]  ;;  %v9439_v0 = vld [vmem:[#allocation102_spill] sm:$0xff] }
 0x727   :  { %4061 = vmatmul.bf16.gmra.mxu1 %v9430_v55  ;;  %v3631_v41 = vadd.f32 %v9438_v14, %v9437_v28 }
 0x728   :  { %v3886_v49 = vadd.f32 %v3885_v30, %v3757_v45  ;;  %v8435_v30 = vpop.f32.mrf.mxu2 }
 0x729   :  { %9432 = vst [vmem:[#allocation84_spill] sm:$0xff] %v8435_v30 }
 0x72a   :  { %v4015_v47 = vadd.f32 %v4014_v54, %v3886_v49  ;;  %3798 = vmatmul.bf16.gmra.mxu3 %v9431_v40  ;;  %v9433_v54 = vld [vmem:[#allocation122_spill] sm:$0xff]  ;;  %v3638_v49 = vadd.f32 %v9440_v58, %v9439_v0 }
 0x72b   :  { %v3895_v21 = vpop.f32.mrf.mxu0  ;;  %v3636_v13 = vadd.f32 %v9434_v9, %v9433_v54 }
 0x72c   :  { %v4150_v56 = vmax.f32 %v4015_v47, 0.0  ;;  %v4024_v34 = vpop.f32.mrf.mxu1 }
 0x72d   :  { %v3759_v12 = vpop.f32.mrf.mxu3 }
 0x72e   :  { %v4252_v52 = vpack.c.bf16 %v4150_v56, %v4147_v6 }
 0x730   :  { %v8445_v6 = vpop.f32.mrf.mxu2 }
 0x733   :  { %v3898_v39 = vpop.f32.mrf.mxu0 }
 0x734   :  { %v4027_v26 = vpop.f32.mrf.mxu1 }
 0x735   :  { %v3761_v2 = vpop.f32.mrf.mxu3 }
 0x736   :  { %v3762_v45 = vadd.f32 %v3761_v2, %v3633_v38  ;;  %v3641_v2 = vadd.f32 %v8217_v51, %v9303_v7 }
 0x738   :  { %v3891_v56 = vadd.f32 %v3890_v4, %v3762_v45 }
 0x73a   :  { %3803 = vmatmul.bf16.gmra.mxu3 %v9295_v1  ;;  %v3760_v1 = vadd.f32 %v3759_v12, %v3631_v41 }
 0x73b   :  { %v3900_v33 = vpop.f32.mrf.mxu0 }
 0x73c   :  { %v4029_v61 = vpop.f32.mrf.mxu1  ;;  %v3889_v37 = vadd.f32 %v3888_v53, %v3760_v1 }
 0x73d   :  { %v3764_v36 = vpop.f32.mrf.mxu3 }
 0x73e   :  { %v3765_v35 = vadd.f32 %v3764_v36, %v3636_v13  ;;  %v4020_v36 = vadd.f32 %v4019_v32, %v3891_v56  ;;  %v4018_v31 = vadd.f32 %v8414_v46, %v3889_v37 }
 0x740   :  { %v3894_v55 = vadd.f32 %v3893_v43, %v3765_v35  ;;  %v4305_v35 = vpop.f32.mrf.mxu2  ;;  %v4156_v28 = vmax.f32 %v4020_v36, 0.0  ;;  %v4153_v45 = vmax.f32 %v4018_v31, 0.0  ;;  %v5235_v31 = vld [vmem:[#allocation1 + $0x9] sm:$0xff] }
 0x742   :  { %v4023_v30 = vadd.f32 %v4022_v5, %v3894_v55  ;;  %v4255_v5 = vpack.c.bf16 %v4156_v28, %v4153_v45 }
 0x743   :  { %v3903_v47 = vpop.f32.mrf.mxu0 }
 0x744   :  { %v4032_v9 = vpop.f32.mrf.mxu1  ;;  %v4159_v38 = vmax.f32 %v4023_v30, 0.0 }
 0x745   :  { %v3766_v40 = vpop.f32.mrf.mxu3 }
 0x746   :  { %v3767_v54 = vadd.f32 %v3766_v40, %v3638_v49 }
 0x748   :  { %v3896_v19 = vadd.f32 %v3895_v21, %v3767_v54  ;;  %v3643_v21 = vadd.f32 %v8228_v57, %v7868_v50  ;;  %v8452_v51 = vpop.f32.mrf.mxu2 }
 0x74a   :  { %v4025_v13 = vadd.f32 %v4024_v34, %v3896_v19 }
 0x74b   :  { %v3905_v4 = vpop.f32.mrf.mxu0 }
 0x74c   :  { %v4162_v12 = vmax.f32 %v4025_v13, 0.0  ;;  %v4034_v53 = vpop.f32.mrf.mxu1 }
 0x74d   :  { %v3769_v43 = vpop.f32.mrf.mxu3 }
 0x74e   :  { %v4258_v14 = vpack.c.bf16 %v4162_v12, %v4159_v38  ;;  %v3770_v41 = vadd.f32 %v3769_v43, %v3641_v2 }
 0x750   :  { %v3899_v0 = vadd.f32 %v3898_v39, %v3770_v41  ;;  %4385 = vmatpush.bf16.msrb.mxu2 %v4258_v14  ;;  %v3646_v39 = vadd.f32 %v8293_v17, %v7855_v23  ;;  %v4318_v55 = vpop.f32.mrf.mxu2  ;;  %v9441_v41 = vld [vmem:[#allocation189_spill] sm:$0xff] }
 0x752   :  { %v4028_v32 = vadd.f32 %v4027_v26, %v3899_v0 }
 0x753   :  { %v3908_v34 = vpop.f32.mrf.mxu0 }
 0x754   :  { %4386 = vmatpush.bf16.msrb.mxu2 %v4255_v5  ;;  %v4037_v58 = vpop.f32.mrf.mxu1  ;;  %v4165_v49 = vmax.f32 %v4028_v32, 0.0 }
 0x755   :  { %v3771_v7 = vpop.f32.mrf.mxu3 }
 0x756   :  { %v3772_v37 = vadd.f32 %v3771_v7, %v3643_v21 }
 0x758   :  { %v3901_v46 = vadd.f32 %v3900_v33, %v3772_v37  ;;  %4387 = vmatpush.bf16.msrb.mxu2 %v4252_v52  ;;  %v8463_v56 = vpop.f32.mrf.mxu2 }
 0x75a   :  { %v4030_v30 = vadd.f32 %v4029_v61, %v3901_v46  ;;  %v3648_v61 = vadd.f32 %v8304_v11, %v7889_v16  ;;  %v9442_v46 = vld [vmem:[#allocation34_spill] sm:$0xff] }
 0x75b   :  { %v3910_v52 = vpop.f32.mrf.mxu0 }
 0x75c   :  { %v4168_v1 = vmax.f32 %v4030_v30, 0.0  ;;  %4388 = vmatpush.bf16.msrb.mxu2 %v8421_v24  ;;  %v4039_v23 = vpop.f32.mrf.mxu1 }
 0x75d   :  { %v3774_v26 = vpop.f32.mrf.mxu3 }
 0x75e   :  { %v8457_v50 = vpack.c.bf16 %v4168_v1, %v4165_v49  ;;  %v3775_v57 = vadd.f32 %v3774_v26, %v3646_v39  ;;  %v9443_v26 = vld [vmem:[#allocation43_spill] sm:$0xff] }
 0x75f   :  { %v3661_v55 = vadd.f32 %v8388_v15, %v9443_v26 }
 0x760   :  { %v3904_v40 = vadd.f32 %v3903_v47, %v3775_v57  ;;  %4389 = vmatpush.bf16.msrb.mxu2 %v8408_v22  ;;  %v3651_v47 = vadd.f32 %v8355_v20, %v9313_v18  ;;  %v4331_v11 = vpop.f32.mrf.mxu2 }
 0x762   :  { %v4033_v33 = vadd.f32 %v4032_v9, %v3904_v40 }
 0x763   :  { %v3913_v36 = vpop.f32.mrf.mxu0 }
 0x764   :  { %4390 = vmatpush.bf16.msrb.mxu2 %v8395_v8  ;;  %v4171_v22 = vmax.f32 %v4033_v33, 0.0  ;;  %v4042_v2 = vpop.f32.mrf.mxu1 }
 0x765   :  { %v3776_v17 = vpop.f32.mrf.mxu3 }
 0x766   :  { %v3777_v24 = vadd.f32 %v3776_v17, %v3648_v61 }
 0x768   :  { %v3906_v54 = vadd.f32 %v3905_v4, %v3777_v24  ;;  %4391 = vmatpush.bf16.msrb.mxu2 %v8384_v10  ;;  %v3653_v10 = vadd.f32 %v8360_v48, %v9315_v63  ;;  %v4342_v18 = vpop.f32.mrf.mxu2  ;;  %v3656_v4 = vadd.f32 %v8370_v27, %v9441_v41  ;;  %v8490_v24 = vstv %s8533_s6  ;;  %s5322_s6 = smov [#allocation8]  }
 0x769   :  { %s4431_s15 = sshll.u32 %s5322_s6, 4  ;;  %s4432_s15 = int_to_ptr.vmem [resolvable:$true] %s4431_s15 }
 0x76a   :  { %v4035_v19 = vadd.f32 %v4034_v53, %v3906_v54 }
 0x76b   :  { %v3915_v35 = vpop.f32.mrf.mxu0 }
 0x76c   :  { %v4174_v9 = vmax.f32 %v4035_v19, 0.0  ;;  %4392 = vmatpush.bf16.msrb.mxu2 %v8367_v60  ;;  %v4044_v60 = vpop.f32.mrf.mxu1  ;;  %v4343_v19 = vadd.f32 %v4342_v18, %v8490_v24 }
 0x76d   :  { %v3779_v16 = vpop.f32.mrf.mxu3 }
 0x76e   :  { %v8469_v8 = vpack.c.bf16 %v4174_v9, %v4171_v22  ;;  %v3780_v13 = vadd.f32 %v3779_v16, %v3651_v47  ;;  %v4304_v47 = vadd.f32 %v8445_v6, %v8490_v24 }
 0x76f   :  { %4393 = vmatmul.bf16.vlgmr.msrb.gmra.mxu2 %v5235_v31 }
 0x770   :  { %v3909_v38 = vadd.f32 %v3908_v34, %v3780_v13  ;;  %v4344_v5 = vpop.f32.mrf.mxu2  ;;  %v3658_v34 = vadd.f32 %v8382_v25, %v9442_v46  ;;  %v4317_v16 = vadd.f32 %v8452_v51, %v4304_v47  ;;  %v9449_v47 = vld [vmem:[#allocation84_spill] sm:$0xff] }
 0x772   :  { %v4038_v12 = vadd.f32 %v4037_v58, %v3909_v38 }
 0x773   :  { %v3918_v37 = vpop.f32.mrf.mxu0 }
 0x774   :  { %v4177_v45 = vmax.f32 %v4038_v12, 0.0  ;;  %v4047_v48 = vpop.f32.mrf.mxu1 }
 0x775   :  { %v3781_v43 = vpop.f32.mrf.mxu3 }
 0x776   :  { %v3782_v20 = vadd.f32 %v3781_v43, %v3653_v10  ;;  %v9444_v43 = vld [vmem:[#allocation164_spill] sm:$0xff] }
 0x777   :  { %v3666_v18 = vadd.f32 %v8404_v62, %v9444_v43 }
 0x778   :  { %v3911_v28 = vadd.f32 %v3910_v52, %v3782_v20  ;;  %v4355_v58 = vpop.f32.mrf.mxu2 }
 0x779   :  { %v4356_v22 = vadd.f32 %v4355_v58, %v4343_v19 }
 0x77a   :  { %v4040_v14 = vadd.f32 %v4039_v23, %v3911_v28  ;;  %v9445_v28 = vld [vmem:[#allocation187_spill] sm:$0xff] }
 0x77b   :  { %v8479_v27 = vpop.f32.mrf.mxu0 }
 0x77c   :  { %v4180_v0 = vmax.f32 %v4040_v14, 0.0  ;;  %v8483_v33 = vpop.f32.mrf.mxu1 }
 0x77d   :  { %v3784_v53 = vpop.f32.mrf.mxu3 }
 0x77e   :  { %v8475_v32 = vpack.c.bf16 %v4180_v0, %v4177_v45  ;;  %v3785_v21 = vadd.f32 %v3784_v53, %v3656_v4 }
 0x780   :  { %v3914_v7 = vadd.f32 %v3913_v36, %v3785_v21  ;;  %v4357_v61 = vpop.f32.mrf.mxu2 }
 0x782   :  { %v4043_v63 = vadd.f32 %v4042_v2, %v3914_v7  ;;  %v4330_v2 = vadd.f32 %v8463_v56, %v4317_v16 }
 0x783   :  { %v3923_v15 = vpop.f32.mrf.mxu0 }
 0x784   :  { %v4183_v57 = vmax.f32 %v4043_v63, 0.0  ;;  %v4052_v13 = vpop.f32.mrf.mxu1 }
 0x785   :  { %v3786_v30 = vpop.f32.mrf.mxu3 }
 0x786   :  { %v3787_v39 = vadd.f32 %v3786_v30, %v3658_v34  ;;  %v9447_v34 = vld [vmem:[#allocation159_spill] sm:$0xff] }
 0x788   :  { %v3916_v49 = vadd.f32 %v3915_v35, %v3787_v39  ;;  %v4368_v36 = vpop.f32.mrf.mxu2 }
 0x789   :  { %v4369_v11 = vadd.f32 %v4368_v36, %v4356_v22 }
 0x78a   :  { %v4045_v1 = vadd.f32 %v4044_v60, %v3916_v49  ;;  %v3668_v60 = vadd.f32 %v8412_v44, %v9445_v28  ;;  %v3673_v44 = vadd.f32 %v8428_v29, %v9447_v34 }
 0x78b   :  { %v4414_v31 = vrot.slane %v4369_v11, 7  ;;  %v3925_v20 = vpop.f32.mrf.mxu0 }
 0x78c   :  { %v4186_v40 = vmax.f32 %v4045_v1, 0.0  ;;  %v4054_v35 = vpop.f32.mrf.mxu1 }
 0x78d   :  { %v3789_v52 = vpop.f32.mrf.mxu3  ;;  %v8499_v38 = vsel %vm4416_vm0, %v4330_v2, %v4414_v31  ;;  %v9451_v2 = vld [vmem:[#allocation79_spill] sm:$0xff] }
 0x78e   :  { %v8485_v23 = vpack.c.bf16 %v4186_v40, %v4183_v57  ;;  %v3790_v17 = vadd.f32 %v3789_v52, %v3661_v55 }
 0x790   :  { %v3919_v25 = vadd.f32 %v3918_v37, %v3790_v17  ;;  %v4370_v10 = vpop.f32.mrf.mxu2  ;;  %v9446_v37 = vld [vmem:[#allocation156_spill] sm:$0xff] }
 0x791   :  { %v3671_v62 = vadd.f32 %v8423_v42, %v9446_v37  ;;  %v3676_v42 = vadd.f32 %v8432_v3, %v9344_v59 }
 0x792   :  { %v8492_v54 = vadd.f32 %v4047_v48, %v3919_v25 }
 0x793   :  { %v3928_v45 = vpop.f32.mrf.mxu0 }
 0x794   :  { %v4057_v53 = vpop.f32.mrf.mxu1 }
 0x795   :  { %v3791_v9 = vpop.f32.mrf.mxu3 }
 0x798   :  { %v4381_v28 = vpop.f32.mrf.mxu2 }
 0x79b   :  { %v3930_v46 = vpop.f32.mrf.mxu0 }
 0x79c   :  { %v4059_v39 = vpop.f32.mrf.mxu1 }
 0x79d   :  { %v3794_v12 = vpop.f32.mrf.mxu3 }
 0x79e   :  { %v3795_v6 = vadd.f32 %v3794_v12, %v3666_v18 }
 0x7a0   :  { %v3924_v51 = vadd.f32 %v3923_v15, %v3795_v6  ;;  %v9448_v15 = vld [vmem:[#allocation152_spill] sm:$0xff] }
 0x7a1   :  { %v3678_v29 = vadd.f32 %v9449_v47, %v9448_v15 }
 0x7a2   :  { %v4053_v4 = vadd.f32 %v4052_v13, %v3924_v51  ;;  %v9450_v13 = vld [vmem:[#allocation39_spill] sm:$0xff] }
 0x7a3   :  { %v3933_v61 = vpop.f32.mrf.mxu0  ;;  %v3663_v31 = vadd.f32 %v9451_v2, %v9450_v13 }
 0x7a4   :  { %v4195_v5 = vmax.f32 %v4053_v4, 0.0  ;;  %v4062_v25 = vpop.f32.mrf.mxu1 }
 0x7a5   :  { %v3796_v14 = vpop.f32.mrf.mxu3  ;;  %v3792_v18 = vadd.f32 %v3791_v9, %v3663_v31 }
 0x7a6   :  { %v3797_v41 = vadd.f32 %v3796_v14, %v3668_v60  ;;  %v4383_v14 = vpop.f32.mrf.mxu2 }
 0x7a7   :  { %v3921_v3 = vadd.f32 %v8479_v27, %v3792_v18  ;;  %v5236_v27 = vld [vmem:[#allocation1 + $0x12] sm:$0xff] }
 0x7a8   :  { %v3926_v56 = vadd.f32 %v3925_v20, %v3797_v41  ;;  %v4189_v41 = vmax.f32 %v8492_v54, 0.0 }
 0x7a9   :  { %v4050_v60 = vadd.f32 %v8483_v33, %v3921_v3  ;;  %v4382_v33 = vadd.f32 %v4381_v28, %v8490_v24 }
 0x7aa   :  { %v4055_v0 = vadd.f32 %v4054_v35, %v3926_v56 }
 0x7ab   :  { %v3935_v11 = vpop.f32.mrf.mxu0  ;;  %v4192_v51 = vmax.f32 %v4050_v60, 0.0 }
 0x7ac   :  { %v4198_v21 = vmax.f32 %v4055_v0, 0.0  ;;  %v4064_v43 = vpop.f32.mrf.mxu1  ;;  %v4421_v0 = vlaneseq }
 0x7ad   :  { %v3799_v7 = vpop.f32.mrf.mxu3  ;;  %v4273_v4 = vpack.c.bf16 %v4192_v51, %v4189_v41 }
 0x7ae   :  { %v4276_v63 = vpack.c.bf16 %v4198_v21, %v4195_v5  ;;  %v3800_v48 = vadd.f32 %v3799_v7, %v3671_v62  ;;  %vm4423_vm2 = vcmp.lt.s32.totalorder %v4421_v0, 384 }
 0x7b0   :  { %v3929_v30 = vadd.f32 %v3928_v45, %v3800_v48 }
 0x7b2   :  { %v4058_v1 = vadd.f32 %v4057_v53, %v3929_v30 }
 0x7b4   :  { %v4201_v57 = vmax.f32 %v4058_v1, 0.0 }
 0x7b5   :  { %v3801_v58 = vpop.f32.mrf.mxu3 }
 0x7b6   :  { %v3802_v49 = vadd.f32 %v3801_v58, %v3673_v44 }
 0x7b8   :  { %v3931_v26 = vadd.f32 %v3930_v46, %v3802_v49 }
 0x7ba   :  { %v4060_v55 = vadd.f32 %v4059_v39, %v3931_v26 }
 0x7bc   :  { %v4204_v40 = vmax.f32 %v4060_v55, 0.0 }
 0x7bd   :  { %v3804_v52 = vpop.f32.mrf.mxu3 }
 0x7be   :  { %v4279_v17 = vpack.c.bf16 %v4204_v40, %v4201_v57  ;;  %v3805_v19 = vadd.f32 %v3804_v52, %v3676_v42 }
 0x7c0   :  { %v3934_v22 = vadd.f32 %v3933_v61, %v3805_v19 }
 0x7c2   :  { %v4063_v12 = vadd.f32 %v4062_v25, %v3934_v22 }
 0x7c4   :  { %v4207_v6 = vmax.f32 %v4063_v12, 0.0 }
 0x7c5   :  { %v3806_v36 = vpop.f32.mrf.mxu3 }
 0x7c6   :  { %v3807_v16 = vadd.f32 %v3806_v36, %v3678_v29 }
 0x7c8   :  { %v3936_v10 = vadd.f32 %v3935_v11, %v3807_v16 }
 0x7ca   :  { %v4065_v20 = vadd.f32 %v4064_v43, %v3936_v10 }
 0x7cc   :  { %v4210_v59 = vmax.f32 %v4065_v20, 0.0 }
 0x7ce   :  { %v4282_v35 = vpack.c.bf16 %v4210_v59, %v4207_v6 }
 0x7d0   :  { %4398 = vmatpush.bf16.msra.mxu2 %v4282_v35 }
 0x7d4   :  { %4399 = vmatpush.bf16.msra.mxu2 %v4279_v17 }
 0x7d8   :  { %4400 = vmatpush.bf16.msra.mxu2 %v4276_v63 }
 0x7dc   :  { %4401 = vmatpush.bf16.msra.mxu2 %v4273_v4 }
 0x7e0   :  { %4402 = vmatpush.bf16.msra.mxu2 %v8485_v23 }
 0x7e4   :  { %4403 = vmatpush.bf16.msra.mxu2 %v8475_v32 }
 0x7e8   :  { %4404 = vmatpush.bf16.msra.mxu2 %v8469_v8 }
 0x7ec   :  { %4405 = vmatpush.bf16.msra.mxu2 %v8457_v50 }
 0x7ef   :  { %4406 = vmatmul.bf16.vlgmr.msra.gmra.mxu2 %v5236_v27 }
 0x7f2   :  { %v4394_v9 = vpop.f32.mrf.mxu2 }
 0x7f3   :  { %v4395_v56 = vadd.f32 %v4394_v9, %v4382_v33 }
 0x7fa   :  { %v4396_v45 = vpop.f32.mrf.mxu2 }
 0x872   :  { %v4407_v54 = vpop.f32.mrf.mxu2 }
 0x873   :  { %v4408_v53 = vadd.f32 %v4407_v54, %v4395_v56 }
 0x875   :  { %v4415_v8 = vrot.slane %v4408_v53, 6 }
 0x877   :  { %v4419_v50 = vsel %vm4418_vm1, %v8499_v38, %v4415_v8 }
 0x878   :  { %4425 = vst.msk [vmem:[#allocation8] sm:$0x7] %vm4423_vm2, %v4419_v50 }
 0x879   :  { %4436 = dma.vmem_to_hbm [thread:$0]  %s4432_s15, 48, %s4434_s2, [#allocation5]  }
 0x87a   :  { %v4409_v32 = vpop.f32.mrf.mxu2 }
 0x87b   :  { %5313 = dma.done.wait [#allocation5], 48  }
 0x87c   :  { %5314 = vsyncadd [#allocation5], 4294967248 }
 0x87d   :  { %4441 = vsyncpa [#allocation4], 1 }
 0x87e   :  { %4442 = vsyncpa [#allocation7], 1 }
 0x87f   :  { %4443 = vsyncpa [#allocation5], 1 }

</bundles_post_ra>
